<compile_context>
chip_gen: v7x
topology: tpu7x:2x2x1
jax: 0.10.0
libtpu: 0.0.40
codegen_flags: <defaults>
</compile_context>

<pallas_src>
import math
import jax
import jax.numpy as jnp
from jax import lax
from jax.experimental import pallas as pl
from jax.experimental.pallas import tpu as pltpu

# ---------------- model hyper-parameters (small, consistent with module) ----
VOCAB_SIZE = 40        # CHAR_SMI_SET_LEN stand-in
VOCAB_PAD = 128        # padded one-hot width (lane-aligned)
EMBED_DIM = 64
HIDDEN_DIM = 128       # matches `hidden_dim = 128` in the reference file
N_LAYERS = 2
BATCH = 2
SEQ = 8
LN_EPS = 1e-5

_VMEM = pl.BlockSpec(memory_space=pltpu.MemorySpace.VMEM)


# ----------------------------- fused Pallas kernel ---------------------------
def _fused_kernel(ids_ref, emb_ref,
                  wih1_ref, whh1_ref, b1_ref,
                  wih2_ref, whh2_ref, b2_ref,
                  wqkv_ref, ln_g_ref, ln_b_ref, wfc_ref, bfc_ref,
                  bias_ref, bsel_ref,
                  out_ref,
                  hs1_ref, hs2_ref):
    """Entire forward pass in one kernel.

    ids_ref:   (T*B, 1) int32, row = t*B + b (time-major flattened tokens)
    emb_ref:   (VOCAB_PAD, E) bf16 embedding table (row 0 = padding_idx)
    wih*_ref:  (E_in, 4H) bf16, columns packed [i | f | o | g]
    whh*_ref:  (H, 4H)  bf16
    b*_ref:    (1, 4H)  f32   (b_ih + b_hh)
    wqkv_ref:  (H, 3H)  bf16  [W_q | W_k | W_v]
    ln_g/b:    (1, H)   f32
    wfc_ref:   (H, 1)   f32 ; bfc_ref (1,1) f32
    bias_ref:  (T*B, T*B) f32, 0 where rows belong to same batch, -1e30 otherwise
    bsel_ref:  (B, T*B)   f32, 1 where flat row belongs to batch b
    out_ref:   (B, 1)   f32
    hs1/hs2:   (T*B, H) f32 VMEM scratch for per-layer hidden-state sequences
    """
    B = out_ref.shape[0]
    TB = ids_ref.shape[0]
    T = TB // B
    H = whh1_ref.shape[0]
    vocab_pad = emb_ref.shape[0]

    # ---- embedding lookup as a one-hot MXU matmul (no XLA gather) ----------
    ids = ids_ref[...]                                            # (TB, 1)
    lane = lax.broadcasted_iota(jnp.int32, (TB, vocab_pad), 1)
    onehot = jnp.where(ids == lane, 1.0, 0.0).astype(jnp.bfloat16)
    x0 = jnp.dot(onehot, emb_ref[...],
                 preferred_element_type=jnp.float32)              # (TB, E) f32

    def lstm_layer(x_flat, wih, whh, b, hs_ref):
        # Hoisted input projection: one big matmul outside the recurrence.
        ig = jnp.dot(x_flat.astype(jnp.bfloat16), wih,
                     preferred_element_type=jnp.float32) + b      # (TB, 4H)
        h = jnp.zeros((B, H), jnp.float32)
        c = jnp.zeros((B, H), jnp.float32)
        for t in range(T):                       # static T -> fully unrolled
            gates = ig[t * B:(t + 1) * B, :] + jnp.dot(
                h.astype(jnp.bfloat16), whh,
                preferred_element_type=jnp.float32)               # (B, 4H)
            sig = jax.nn.sigmoid(gates[:, :3 * H])   # contiguous [i | f | o]
            i_g = sig[:, 0:H]
            f_g = sig[:, H:2 * H]
            o_g = sig[:, 2 * H:3 * H]
            g_g = jnp.tanh(gates[:, 3 * H:])
            c = f_g * c + i_g * g_g
            h = o_g * jnp.tanh(c)
            hs_ref[t * B:(t + 1) * B, :] = h     # tiny VMEM-resident store
        return hs_ref[...]                       # (TB, H), row = t*B + b

    x1 = lstm_layer(x0, wih1_ref[...], whh1_ref[...], b1_ref[...], hs1_ref)
    x2 = lstm_layer(x1, wih2_ref[...], whh2_ref[...], b2_ref[...], hs2_ref)

    # ---- fused QKV projection: single (TB, H) x (H, 3H) matmul -------------
    qkv = jnp.dot(x2.astype(jnp.bfloat16), wqkv_ref[...],
                  preferred_element_type=jnp.float32)             # (TB, 3H)
    q = qkv[:, 0:H]
    k = qkv[:, H:2 * H]
    v = qkv[:, 2 * H:3 * H]

    # ---- attention over all flat (row, col) pairs; cross-batch masked ------
    scores = jnp.einsum('rd,cd->rc', q, k,
                        preferred_element_type=jnp.float32) * (1.0 / math.sqrt(H))
    scores = scores + bias_ref[...]                # -1e30 on cross-batch pairs
    scores = scores - jnp.max(scores, axis=-1, keepdims=True)
    p = jnp.exp(scores)
    alpha = p / jnp.sum(p, axis=-1, keepdims=True)                # (TB, TB)

    # context.sum(over query t) == (sum_t alpha[t, :]) @ V   (linearity)
    w_sum = jnp.sum(alpha, axis=0, keepdims=True)                 # (1, TB)
    sel = bsel_ref[...] * w_sum                                   # (B, TB)
    ctx = jnp.dot(sel, v, preferred_element_type=jnp.float32)     # (B, H)

    # ---- LayerNorm + fc ----------------------------------------------------
    mean = jnp.mean(ctx, axis=-1, keepdims=True)
    var = jnp.mean(jnp.square(ctx - mean), axis=-1, keepdims=True)
    ln = (ctx - mean) * lax.rsqrt(var + LN_EPS)
    ln = ln * ln_g_ref[...] + ln_b_ref[...]
    out_ref[...] = jnp.dot(ln, wfc_ref[...],
                           preferred_element_type=jnp.float32) + bfc_ref[...]


# ----------------------------- wrapper ---------------------------------------
def lstm_attention_forward(params, input_ids, input_lengths):
    # input_lengths is unused in the PyTorch forward; kept for signature parity.
    del input_lengths
    B, T = input_ids.shape
    H = HIDDEN_DIM

    # Time-major flattened token ids: row = t*B + b.
    ids_tb = jnp.transpose(input_ids, (1, 0)).reshape(T * B, 1).astype(jnp.int32)

    # Static batch-block masks (constant-folded under jit; tiny).
    rb = jnp.arange(T * B, dtype=jnp.int32) % B                    # batch id / row
    attn_bias = jnp.where(rb[:, None] == rb[None, :], 0.0,
                          -1e30).astype(jnp.float32)               # (TB, TB)
    bsel = (jnp.arange(B, dtype=jnp.int32)[:, None]
            == rb[None, :]).astype(jnp.float32)                    # (B, TB)

    l0, l1 = params['lstm']
    return pl.pallas_call(
        _fused_kernel,
        out_shape=jax.ShapeDtypeStruct((B, 1), jnp.float32),
        in_specs=[_VMEM] * 15,
        out_specs=_VMEM,
        scratch_shapes=[pltpu.VMEM((T * B, H), jnp.float32),
                        pltpu.VMEM((T * B, H), jnp.float32)],
    )(ids_tb, params['embedding'],
      l0['wih_t'], l0['whh_t'], l0['b'],
      l1['wih_t'], l1['whh_t'], l1['b'],
      params['wqkv_t'], params['ln_gamma'], params['ln_beta'],
      params['wfc_t'], params['bfc'],
      attn_bias, bsel)


# ----------------------------- parameter init --------------------------------
def init_params(key):
    ks = jax.random.split(key, 12)
    scale = 0.1

    emb = jax.random.normal(ks[0], (VOCAB_SIZE, EMBED_DIM), jnp.float32) * 0.5
    emb = emb.at[0].set(0.0)                                     # padding_idx=0
    emb_pad = jnp.zeros((VOCAB_PAD, EMBED_DIM), jnp.float32).at[:VOCAB_SIZE].set(emb)

    lstm_layers = []
    for l in range(N_LAYERS):
        in_dim = EMBED_DIM if l == 0 else HIDDEN_DIM
        k1, k2, k3, k4 = jax.random.split(ks[1 + l], 4)
        # Columns packed [i | f | o | g] (a permutation of PyTorch's (i,f,g,o)
        # packing; equivalent module up to re-ordering of the random init).
        wih = jax.random.normal(k1, (in_dim, 4 * HIDDEN_DIM), jnp.float32) * scale
        whh = jax.random.normal(k2, (HIDDEN_DIM, 4 * HIDDEN_DIM), jnp.float32) * scale
        b_ih = jax.random.normal(k3, (4 * HIDDEN_DIM,), jnp.float32) * scale
        b_hh = jax.random.normal(k4, (4 * HIDDEN_DIM,), jnp.float32) * scale
        lstm_layers.append(dict(
            wih_t=wih.astype(jnp.bfloat16),                      # (in, 4H)
            whh_t=whh.astype(jnp.bfloat16),                      # (H, 4H)
            b=(b_ih + b_hh).reshape(1, 4 * HIDDEN_DIM).astype(jnp.float32),
        ))

    wq = jax.random.normal(ks[8], (HIDDEN_DIM, HIDDEN_DIM), jnp.float32) * scale
    wk = jax.random.normal(ks[9], (HIDDEN_DIM, HIDDEN_DIM), jnp.float32) * scale
    wv = jax.random.normal(ks[10], (HIDDEN_DIM, HIDDEN_DIM), jnp.float32) * scale
    wqkv = jnp.concatenate([wq, wk, wv], axis=1)                 # (H, 3H)
    k_fc1, k_fc2 = jax.random.split(ks[11])
    wfc = jax.random.normal(k_fc1, (HIDDEN_DIM, 1), jnp.float32) * scale
    bfc = jax.random.normal(k_fc2, (1,), jnp.float32) * scale

    return dict(
        embedding=emb_pad.astype(jnp.bfloat16),                  # (VOCAB_PAD, E)
        lstm=lstm_layers,
        wqkv_t=wqkv.astype(jnp.bfloat16),                        # (H, 3H)
        ln_gamma=jnp.ones((1, HIDDEN_DIM), jnp.float32),
        ln_beta=jnp.zeros((1, HIDDEN_DIM), jnp.float32),
        wfc_t=wfc,                                               # (H, 1) f32
        bfc=bfc.reshape(1, 1),
    )


# ----------------------------- pure-JAX reference ----------------------------
def reference_forward(params, input_ids, input_lengths):
    """Independent XLA implementation (standard batched attention layout),
    using the same bf16-weight / f32-accumulate precision policy."""
    del input_lengths
    H = HIDDEN_DIM
    emb = params['embedding'].astype(jnp.float32)
    x = emb[input_ids]                                           # (B, T, E)
    B = x.shape[0]
    for layer in params['lstm']:
        wih, whh, b = layer['wih_t'], layer['whh_t'], layer['b'][0]

        def step(carry, x_t):
            h, c = carry
            gates = (jnp.dot(x_t.astype(jnp.bfloat16), wih,
                             preferred_element_type=jnp.float32)
                     + jnp.dot(h.astype(jnp.bfloat16), whh,
                               preferred_element_type=jnp.float32) + b)
            i_g = jax.nn.sigmoid(gates[:, 0:H])
            f_g = jax.nn.sigmoid(gates[:, H:2 * H])
            o_g = jax.nn.sigmoid(gates[:, 2 * H:3 * H])
            g_g = jnp.tanh(gates[:, 3 * H:])
            c_new = f_g * c + i_g * g_g
            h_new = o_g * jnp.tanh(c_new)
            return (h_new, c_new), h_new

        init = (jnp.zeros((B, H), jnp.float32), jnp.zeros((B, H), jnp.float32))
        _, outs = lax.scan(step, init, jnp.transpose(x, (1, 0, 2)))
        x = jnp.transpose(outs, (1, 0, 2))                       # (B, T, H)

    qkv = jnp.einsum('bth,hd->btd', x.astype(jnp.bfloat16), params['wqkv_t'],
                     preferred_element_type=jnp.float32)         # (B, T, 3H)
    q, k, v = qkv[..., :H], qkv[..., H:2 * H], qkv[..., 2 * H:]
    scores = jnp.einsum('btd,bsd->bts', q, k) / math.sqrt(H)
    alpha = jax.nn.softmax(scores, axis=-1)
    ctx = jnp.einsum('bts,bsd->btd', alpha, v).sum(axis=1)       # (B, H)
    mean = ctx.mean(-1, keepdims=True)
    var = ((ctx - mean) ** 2).mean(-1, keepdims=True)
    ln = (ctx - mean) / jnp.sqrt(var + LN_EPS)
    ln = ln * params['ln_gamma'] + params['ln_beta']
    return jnp.dot(ln, params['wfc_t']) + params['bfc']


# ----------------------------- main ------------------------------------------
if __name__ == "__main__":
    key = jax.random.PRNGKey(0)
    k_param, k_ids = jax.random.split(key)
    params = init_params(k_param)

    input_ids = jax.random.randint(k_ids, (BATCH, SEQ), 0, VOCAB_SIZE,
                                   dtype=jnp.int32)
    input_ids = input_ids.at[:, -2:].set(0)            # some padding tokens
    input_lengths = jnp.full((BATCH,), SEQ - 2, dtype=jnp.int32)

    fwd = jax.jit(lstm_attention_forward)
    out = jax.block_until_ready(fwd(params, input_ids, input_lengths))
    assert out.shape == (BATCH, 1), out.shape

    ref = reference_forward(params, input_ids, input_lengths)
    assert jnp.allclose(out, ref, atol=1e-2, rtol=1e-2), (out, ref)

    print("KERNEL_OK")
</pallas_src>

<mosaic_0001>
module attributes {stable_mosaic.version = 11 : i64} {
  func.func @_fused_kernel(%arg0: memref<16x1xi32, #tpu.memory_space<vmem>>, %arg1: memref<128x64xbf16, #tpu.memory_space<vmem>>, %arg2: memref<64x512xbf16, #tpu.memory_space<vmem>>, %arg3: memref<128x512xbf16, #tpu.memory_space<vmem>>, %arg4: memref<1x512xf32, #tpu.memory_space<vmem>>, %arg5: memref<128x512xbf16, #tpu.memory_space<vmem>>, %arg6: memref<128x512xbf16, #tpu.memory_space<vmem>>, %arg7: memref<1x512xf32, #tpu.memory_space<vmem>>, %arg8: memref<128x384xbf16, #tpu.memory_space<vmem>>, %arg9: memref<1x128xf32, #tpu.memory_space<vmem>>, %arg10: memref<1x128xf32, #tpu.memory_space<vmem>>, %arg11: memref<128x1xf32, #tpu.memory_space<vmem>>, %arg12: memref<1x1xf32, #tpu.memory_space<vmem>>, %arg13: memref<16x16xf32, #tpu.memory_space<vmem>>, %arg14: memref<2x16xf32, #tpu.memory_space<vmem>>, %arg15: memref<2x1xf32, #tpu.memory_space<vmem>>, %arg16: memref<16x128xf32, #tpu.memory_space<vmem>>, %arg17: memref<16x128xf32, #tpu.memory_space<vmem>>) attributes {dimension_semantics = [], scalar_prefetch = 0 : i64, scratch_operands = 2 : i64, tpu.core_type = #tpu.core_type<tc>} {
    %c0 = arith.constant 0 : index
    %c0_0 = arith.constant 0 : index
    %0 = vector.load %arg0[%c0, %c0_0] : memref<16x1xi32, #tpu.memory_space<vmem>>, vector<16x1xi32>
    %1 = tpu.iota {dimensions = array<i32: 1>} : vector<16x128xi32>
    %2 = vector.broadcast %0 : vector<16x1xi32> to vector<16x128xi32>
    %3 = arith.cmpi eq, %2, %1 : vector<16x128xi32>
    %cst = arith.constant 1.000000e+00 : f32
    %cst_1 = arith.constant 0.000000e+00 : f32
    %4 = vector.broadcast %cst : f32 to vector<16x128xf32>
    %5 = vector.broadcast %cst_1 : f32 to vector<16x128xf32>
    %6 = arith.select %3, %4, %5 : vector<16x128xi1>, vector<16x128xf32>
    %7 = arith.truncf %6 : vector<16x128xf32> to vector<16x128xbf16>
    %c0_2 = arith.constant 0 : index
    %c0_3 = arith.constant 0 : index
    %8 = vector.load %arg1[%c0_2, %c0_3] : memref<128x64xbf16, #tpu.memory_space<vmem>>, vector<128x64xbf16>
    %cst_4 = arith.constant dense<0.000000e+00> : vector<16x64xf32>
    %9 = tpu.matmul %7, %8, %cst_4 {dimension_numbers = #tpu.dot_dimension_numbers<[1], [0], [0], [1], [0, 0, 1, 1], [], []>} : vector<16x128xbf16>, vector<128x64xbf16>, vector<16x64xf32> -> vector<16x64xf32>
    %c0_5 = arith.constant 0 : index
    %c0_6 = arith.constant 0 : index
    %10 = vector.load %arg2[%c0_5, %c0_6] : memref<64x512xbf16, #tpu.memory_space<vmem>>, vector<64x512xbf16>
    %c0_7 = arith.constant 0 : index
    %c0_8 = arith.constant 0 : index
    %11 = vector.load %arg3[%c0_7, %c0_8] : memref<128x512xbf16, #tpu.memory_space<vmem>>, vector<128x512xbf16>
    %c0_9 = arith.constant 0 : index
    %c0_10 = arith.constant 0 : index
    %12 = vector.load %arg4[%c0_9, %c0_10] : memref<1x512xf32, #tpu.memory_space<vmem>>, vector<1x512xf32>
    %13 = arith.truncf %9 : vector<16x64xf32> to vector<16x64xbf16>
    %cst_11 = arith.constant dense<0.000000e+00> : vector<16x512xf32>
    %14 = tpu.matmul %13, %10, %cst_11 {dimension_numbers = #tpu.dot_dimension_numbers<[1], [0], [0], [1], [0, 0, 1, 1], [], []>} : vector<16x64xbf16>, vector<64x512xbf16>, vector<16x512xf32> -> vector<16x512xf32>
    %15 = vector.broadcast %12 : vector<1x512xf32> to vector<16x512xf32>
    %16 = arith.addf %14, %15 : vector<16x512xf32>
    %cst_12 = arith.constant 0.000000e+00 : f32
    %17 = vector.broadcast %cst_12 : f32 to vector<2x128xf32>
    %cst_13 = arith.constant 0.000000e+00 : f32
    %18 = vector.broadcast %cst_13 : f32 to vector<2x128xf32>
    %19 = vector.extract_strided_slice %16 {offsets = [0, 0], sizes = [2, 512], strides = [1, 1]} : vector<16x512xf32> to vector<2x512xf32>
    %20 = arith.truncf %17 : vector<2x128xf32> to vector<2x128xbf16>
    %cst_14 = arith.constant dense<0.000000e+00> : vector<2x512xf32>
    %21 = tpu.matmul %20, %11, %cst_14 {dimension_numbers = #tpu.dot_dimension_numbers<[1], [0], [0], [1], [0, 0, 1, 1], [], []>} : vector<2x128xbf16>, vector<128x512xbf16>, vector<2x512xf32> -> vector<2x512xf32>
    %22 = arith.addf %19, %21 : vector<2x512xf32>
    %23 = vector.extract_strided_slice %22 {offsets = [0, 0], sizes = [2, 384], strides = [1, 1]} : vector<2x512xf32> to vector<2x384xf32>
    %24 = arith.negf %23 : vector<2x384xf32>
    %25 = math.exp %24 : vector<2x384xf32>
    %cst_15 = arith.constant 1.000000e+00 : f32
    %26 = vector.broadcast %cst_15 : f32 to vector<2x384xf32>
    %27 = arith.addf %26, %25 : vector<2x384xf32>
    %28 = arith.divf %26, %27 : vector<2x384xf32>
    %29 = vector.extract_strided_slice %28 {offsets = [0, 0], sizes = [2, 128], strides = [1, 1]} : vector<2x384xf32> to vector<2x128xf32>
    %30 = vector.extract_strided_slice %28 {offsets = [0, 128], sizes = [2, 128], strides = [1, 1]} : vector<2x384xf32> to vector<2x128xf32>
    %31 = vector.extract_strided_slice %28 {offsets = [0, 256], sizes = [2, 128], strides = [1, 1]} : vector<2x384xf32> to vector<2x128xf32>
    %32 = vector.extract_strided_slice %22 {offsets = [0, 384], sizes = [2, 128], strides = [1, 1]} : vector<2x512xf32> to vector<2x128xf32>
    %33 = math.tanh %32 : vector<2x128xf32>
    %34 = arith.mulf %30, %18 : vector<2x128xf32>
    %35 = arith.mulf %29, %33 : vector<2x128xf32>
    %36 = arith.addf %34, %35 : vector<2x128xf32>
    %37 = math.tanh %36 : vector<2x128xf32>
    %38 = arith.mulf %31, %37 : vector<2x128xf32>
    %c0_16 = arith.constant 0 : index
    %c0_17 = arith.constant 0 : index
    %39 = vector.load %arg16[%c0_16, %c0_17] : memref<16x128xf32, #tpu.memory_space<vmem>>, vector<2x128xf32>
    tpu.vector_store %arg16[%c0_16, %c0_17], %38 {strides = array<i32>} : memref<16x128xf32, #tpu.memory_space<vmem>>, vector<2x128xf32>,
    %40 = vector.extract_strided_slice %16 {offsets = [2, 0], sizes = [2, 512], strides = [1, 1]} : vector<16x512xf32> to vector<2x512xf32>
    %41 = arith.truncf %38 : vector<2x128xf32> to vector<2x128xbf16>
    %cst_18 = arith.constant dense<0.000000e+00> : vector<2x512xf32>
    %42 = tpu.matmul %41, %11, %cst_18 {dimension_numbers = #tpu.dot_dimension_numbers<[1], [0], [0], [1], [0, 0, 1, 1], [], []>} : vector<2x128xbf16>, vector<128x512xbf16>, vector<2x512xf32> -> vector<2x512xf32>
    %43 = arith.addf %40, %42 : vector<2x512xf32>
    %44 = vector.extract_strided_slice %43 {offsets = [0, 0], sizes = [2, 384], strides = [1, 1]} : vector<2x512xf32> to vector<2x384xf32>
    %45 = arith.negf %44 : vector<2x384xf32>
    %46 = math.exp %45 : vector<2x384xf32>
    %cst_19 = arith.constant 1.000000e+00 : f32
    %47 = vector.broadcast %cst_19 : f32 to vector<2x384xf32>
    %48 = arith.addf %47, %46 : vector<2x384xf32>
    %49 = arith.divf %47, %48 : vector<2x384xf32>
    %50 = vector.extract_strided_slice %49 {offsets = [0, 0], sizes = [2, 128], strides = [1, 1]} : vector<2x384xf32> to vector<2x128xf32>
    %51 = vector.extract_strided_slice %49 {offsets = [0, 128], sizes = [2, 128], strides = [1, 1]} : vector<2x384xf32> to vector<2x128xf32>
    %52 = vector.extract_strided_slice %49 {offsets = [0, 256], sizes = [2, 128], strides = [1, 1]} : vector<2x384xf32> to vector<2x128xf32>
    %53 = vector.extract_strided_slice %43 {offsets = [0, 384], sizes = [2, 128], strides = [1, 1]} : vector<2x512xf32> to vector<2x128xf32>
    %54 = math.tanh %53 : vector<2x128xf32>
    %55 = arith.mulf %51, %36 : vector<2x128xf32>
    %56 = arith.mulf %50, %54 : vector<2x128xf32>
    %57 = arith.addf %55, %56 : vector<2x128xf32>
    %58 = math.tanh %57 : vector<2x128xf32>
    %59 = arith.mulf %52, %58 : vector<2x128xf32>
    %c2 = arith.constant 2 : index
    %c0_20 = arith.constant 0 : index
    %60 = vector.load %arg16[%c2, %c0_20] : memref<16x128xf32, #tpu.memory_space<vmem>>, vector<2x128xf32>
    tpu.vector_store %arg16[%c2, %c0_20], %59 {strides = array<i32>} : memref<16x128xf32, #tpu.memory_space<vmem>>, vector<2x128xf32>,
    %61 = vector.extract_strided_slice %16 {offsets = [4, 0], sizes = [2, 512], strides = [1, 1]} : vector<16x512xf32> to vector<2x512xf32>
    %62 = arith.truncf %59 : vector<2x128xf32> to vector<2x128xbf16>
    %cst_21 = arith.constant dense<0.000000e+00> : vector<2x512xf32>
    %63 = tpu.matmul %62, %11, %cst_21 {dimension_numbers = #tpu.dot_dimension_numbers<[1], [0], [0], [1], [0, 0, 1, 1], [], []>} : vector<2x128xbf16>, vector<128x512xbf16>, vector<2x512xf32> -> vector<2x512xf32>
    %64 = arith.addf %61, %63 : vector<2x512xf32>
    %65 = vector.extract_strided_slice %64 {offsets = [0, 0], sizes = [2, 384], strides = [1, 1]} : vector<2x512xf32> to vector<2x384xf32>
    %66 = arith.negf %65 : vector<2x384xf32>
    %67 = math.exp %66 : vector<2x384xf32>
    %cst_22 = arith.constant 1.000000e+00 : f32
    %68 = vector.broadcast %cst_22 : f32 to vector<2x384xf32>
    %69 = arith.addf %68, %67 : vector<2x384xf32>
    %70 = arith.divf %68, %69 : vector<2x384xf32>
    %71 = vector.extract_strided_slice %70 {offsets = [0, 0], sizes = [2, 128], strides = [1, 1]} : vector<2x384xf32> to vector<2x128xf32>
    %72 = vector.extract_strided_slice %70 {offsets = [0, 128], sizes = [2, 128], strides = [1, 1]} : vector<2x384xf32> to vector<2x128xf32>
    %73 = vector.extract_strided_slice %70 {offsets = [0, 256], sizes = [2, 128], strides = [1, 1]} : vector<2x384xf32> to vector<2x128xf32>
    %74 = vector.extract_strided_slice %64 {offsets = [0, 384], sizes = [2, 128], strides = [1, 1]} : vector<2x512xf32> to vector<2x128xf32>
    %75 = math.tanh %74 : vector<2x128xf32>
    %76 = arith.mulf %72, %57 : vector<2x128xf32>
    %77 = arith.mulf %71, %75 : vector<2x128xf32>
    %78 = arith.addf %76, %77 : vector<2x128xf32>
    %79 = math.tanh %78 : vector<2x128xf32>
    %80 = arith.mulf %73, %79 : vector<2x128xf32>
    %c4 = arith.constant 4 : index
    %c0_23 = arith.constant 0 : index
    %81 = vector.load %arg16[%c4, %c0_23] : memref<16x128xf32, #tpu.memory_space<vmem>>, vector<2x128xf32>
    tpu.vector_store %arg16[%c4, %c0_23], %80 {strides = array<i32>} : memref<16x128xf32, #tpu.memory_space<vmem>>, vector<2x128xf32>,
    %82 = vector.extract_strided_slice %16 {offsets = [6, 0], sizes = [2, 512], strides = [1, 1]} : vector<16x512xf32> to vector<2x512xf32>
    %83 = arith.truncf %80 : vector<2x128xf32> to vector<2x128xbf16>
    %cst_24 = arith.constant dense<0.000000e+00> : vector<2x512xf32>
    %84 = tpu.matmul %83, %11, %cst_24 {dimension_numbers = #tpu.dot_dimension_numbers<[1], [0], [0], [1], [0, 0, 1, 1], [], []>} : vector<2x128xbf16>, vector<128x512xbf16>, vector<2x512xf32> -> vector<2x512xf32>
    %85 = arith.addf %82, %84 : vector<2x512xf32>
    %86 = vector.extract_strided_slice %85 {offsets = [0, 0], sizes = [2, 384], strides = [1, 1]} : vector<2x512xf32> to vector<2x384xf32>
    %87 = arith.negf %86 : vector<2x384xf32>
    %88 = math.exp %87 : vector<2x384xf32>
    %cst_25 = arith.constant 1.000000e+00 : f32
    %89 = vector.broadcast %cst_25 : f32 to vector<2x384xf32>
    %90 = arith.addf %89, %88 : vector<2x384xf32>
    %91 = arith.divf %89, %90 : vector<2x384xf32>
    %92 = vector.extract_strided_slice %91 {offsets = [0, 0], sizes = [2, 128], strides = [1, 1]} : vector<2x384xf32> to vector<2x128xf32>
    %93 = vector.extract_strided_slice %91 {offsets = [0, 128], sizes = [2, 128], strides = [1, 1]} : vector<2x384xf32> to vector<2x128xf32>
    %94 = vector.extract_strided_slice %91 {offsets = [0, 256], sizes = [2, 128], strides = [1, 1]} : vector<2x384xf32> to vector<2x128xf32>
    %95 = vector.extract_strided_slice %85 {offsets = [0, 384], sizes = [2, 128], strides = [1, 1]} : vector<2x512xf32> to vector<2x128xf32>
    %96 = math.tanh %95 : vector<2x128xf32>
    %97 = arith.mulf %93, %78 : vector<2x128xf32>
    %98 = arith.mulf %92, %96 : vector<2x128xf32>
    %99 = arith.addf %97, %98 : vector<2x128xf32>
    %100 = math.tanh %99 : vector<2x128xf32>
    %101 = arith.mulf %94, %100 : vector<2x128xf32>
    %c6 = arith.constant 6 : index
    %c0_26 = arith.constant 0 : index
    %102 = vector.load %arg16[%c6, %c0_26] : memref<16x128xf32, #tpu.memory_space<vmem>>, vector<2x128xf32>
    tpu.vector_store %arg16[%c6, %c0_26], %101 {strides = array<i32>} : memref<16x128xf32, #tpu.memory_space<vmem>>, vector<2x128xf32>,
    %103 = vector.extract_strided_slice %16 {offsets = [8, 0], sizes = [2, 512], strides = [1, 1]} : vector<16x512xf32> to vector<2x512xf32>
    %104 = arith.truncf %101 : vector<2x128xf32> to vector<2x128xbf16>
    %cst_27 = arith.constant dense<0.000000e+00> : vector<2x512xf32>
    %105 = tpu.matmul %104, %11, %cst_27 {dimension_numbers = #tpu.dot_dimension_numbers<[1], [0], [0], [1], [0, 0, 1, 1], [], []>} : vector<2x128xbf16>, vector<128x512xbf16>, vector<2x512xf32> -> vector<2x512xf32>
    %106 = arith.addf %103, %105 : vector<2x512xf32>
    %107 = vector.extract_strided_slice %106 {offsets = [0, 0], sizes = [2, 384], strides = [1, 1]} : vector<2x512xf32> to vector<2x384xf32>
    %108 = arith.negf %107 : vector<2x384xf32>
    %109 = math.exp %108 : vector<2x384xf32>
    %cst_28 = arith.constant 1.000000e+00 : f32
    %110 = vector.broadcast %cst_28 : f32 to vector<2x384xf32>
    %111 = arith.addf %110, %109 : vector<2x384xf32>
    %112 = arith.divf %110, %111 : vector<2x384xf32>
    %113 = vector.extract_strided_slice %112 {offsets = [0, 0], sizes = [2, 128], strides = [1, 1]} : vector<2x384xf32> to vector<2x128xf32>
    %114 = vector.extract_strided_slice %112 {offsets = [0, 128], sizes = [2, 128], strides = [1, 1]} : vector<2x384xf32> to vector<2x128xf32>
    %115 = vector.extract_strided_slice %112 {offsets = [0, 256], sizes = [2, 128], strides = [1, 1]} : vector<2x384xf32> to vector<2x128xf32>
    %116 = vector.extract_strided_slice %106 {offsets = [0, 384], sizes = [2, 128], strides = [1, 1]} : vector<2x512xf32> to vector<2x128xf32>
    %117 = math.tanh %116 : vector<2x128xf32>
    %118 = arith.mulf %114, %99 : vector<2x128xf32>
    %119 = arith.mulf %113, %117 : vector<2x128xf32>
    %120 = arith.addf %118, %119 : vector<2x128xf32>
    %121 = math.tanh %120 : vector<2x128xf32>
    %122 = arith.mulf %115, %121 : vector<2x128xf32>
    %c8 = arith.constant 8 : index
    %c0_29 = arith.constant 0 : index
    %123 = vector.load %arg16[%c8, %c0_29] : memref<16x128xf32, #tpu.memory_space<vmem>>, vector<2x128xf32>
    tpu.vector_store %arg16[%c8, %c0_29], %122 {strides = array<i32>} : memref<16x128xf32, #tpu.memory_space<vmem>>, vector<2x128xf32>,
    %124 = vector.extract_strided_slice %16 {offsets = [10, 0], sizes = [2, 512], strides = [1, 1]} : vector<16x512xf32> to vector<2x512xf32>
    %125 = arith.truncf %122 : vector<2x128xf32> to vector<2x128xbf16>
    %cst_30 = arith.constant dense<0.000000e+00> : vector<2x512xf32>
    %126 = tpu.matmul %125, %11, %cst_30 {dimension_numbers = #tpu.dot_dimension_numbers<[1], [0], [0], [1], [0, 0, 1, 1], [], []>} : vector<2x128xbf16>, vector<128x512xbf16>, vector<2x512xf32> -> vector<2x512xf32>
    %127 = arith.addf %124, %126 : vector<2x512xf32>
    %128 = vector.extract_strided_slice %127 {offsets = [0, 0], sizes = [2, 384], strides = [1, 1]} : vector<2x512xf32> to vector<2x384xf32>
    %129 = arith.negf %128 : vector<2x384xf32>
    %130 = math.exp %129 : vector<2x384xf32>
    %cst_31 = arith.constant 1.000000e+00 : f32
    %131 = vector.broadcast %cst_31 : f32 to vector<2x384xf32>
    %132 = arith.addf %131, %130 : vector<2x384xf32>
    %133 = arith.divf %131, %132 : vector<2x384xf32>
    %134 = vector.extract_strided_slice %133 {offsets = [0, 0], sizes = [2, 128], strides = [1, 1]} : vector<2x384xf32> to vector<2x128xf32>
    %135 = vector.extract_strided_slice %133 {offsets = [0, 128], sizes = [2, 128], strides = [1, 1]} : vector<2x384xf32> to vector<2x128xf32>
    %136 = vector.extract_strided_slice %133 {offsets = [0, 256], sizes = [2, 128], strides = [1, 1]} : vector<2x384xf32> to vector<2x128xf32>
    %137 = vector.extract_strided_slice %127 {offsets = [0, 384], sizes = [2, 128], strides = [1, 1]} : vector<2x512xf32> to vector<2x128xf32>
    %138 = math.tanh %137 : vector<2x128xf32>
    %139 = arith.mulf %135, %120 : vector<2x128xf32>
    %140 = arith.mulf %134, %138 : vector<2x128xf32>
    %141 = arith.addf %139, %140 : vector<2x128xf32>
    %142 = math.tanh %141 : vector<2x128xf32>
    %143 = arith.mulf %136, %142 : vector<2x128xf32>
    %c10 = arith.constant 10 : index
    %c0_32 = arith.constant 0 : index
    %144 = vector.load %arg16[%c10, %c0_32] : memref<16x128xf32, #tpu.memory_space<vmem>>, vector<2x128xf32>
    tpu.vector_store %arg16[%c10, %c0_32], %143 {strides = array<i32>} : memref<16x128xf32, #tpu.memory_space<vmem>>, vector<2x128xf32>,
    %145 = vector.extract_strided_slice %16 {offsets = [12, 0], sizes = [2, 512], strides = [1, 1]} : vector<16x512xf32> to vector<2x512xf32>
    %146 = arith.truncf %143 : vector<2x128xf32> to vector<2x128xbf16>
    %cst_33 = arith.constant dense<0.000000e+00> : vector<2x512xf32>
    %147 = tpu.matmul %146, %11, %cst_33 {dimension_numbers = #tpu.dot_dimension_numbers<[1], [0], [0], [1], [0, 0, 1, 1], [], []>} : vector<2x128xbf16>, vector<128x512xbf16>, vector<2x512xf32> -> vector<2x512xf32>
    %148 = arith.addf %145, %147 : vector<2x512xf32>
    %149 = vector.extract_strided_slice %148 {offsets = [0, 0], sizes = [2, 384], strides = [1, 1]} : vector<2x512xf32> to vector<2x384xf32>
    %150 = arith.negf %149 : vector<2x384xf32>
    %151 = math.exp %150 : vector<2x384xf32>
    %cst_34 = arith.constant 1.000000e+00 : f32
    %152 = vector.broadcast %cst_34 : f32 to vector<2x384xf32>
    %153 = arith.addf %152, %151 : vector<2x384xf32>
    %154 = arith.divf %152, %153 : vector<2x384xf32>
    %155 = vector.extract_strided_slice %154 {offsets = [0, 0], sizes = [2, 128], strides = [1, 1]} : vector<2x384xf32> to vector<2x128xf32>
    %156 = vector.extract_strided_slice %154 {offsets = [0, 128], sizes = [2, 128], strides = [1, 1]} : vector<2x384xf32> to vector<2x128xf32>
    %157 = vector.extract_strided_slice %154 {offsets = [0, 256], sizes = [2, 128], strides = [1, 1]} : vector<2x384xf32> to vector<2x128xf32>
    %158 = vector.extract_strided_slice %148 {offsets = [0, 384], sizes = [2, 128], strides = [1, 1]} : vector<2x512xf32> to vector<2x128xf32>
    %159 = math.tanh %158 : vector<2x128xf32>
    %160 = arith.mulf %156, %141 : vector<2x128xf32>
    %161 = arith.mulf %155, %159 : vector<2x128xf32>
    %162 = arith.addf %160, %161 : vector<2x128xf32>
    %163 = math.tanh %162 : vector<2x128xf32>
    %164 = arith.mulf %157, %163 : vector<2x128xf32>
    %c12 = arith.constant 12 : index
    %c0_35 = arith.constant 0 : index
    %165 = vector.load %arg16[%c12, %c0_35] : memref<16x128xf32, #tpu.memory_space<vmem>>, vector<2x128xf32>
    tpu.vector_store %arg16[%c12, %c0_35], %164 {strides = array<i32>} : memref<16x128xf32, #tpu.memory_space<vmem>>, vector<2x128xf32>,
    %166 = vector.extract_strided_slice %16 {offsets = [14, 0], sizes = [2, 512], strides = [1, 1]} : vector<16x512xf32> to vector<2x512xf32>
    %167 = arith.truncf %164 : vector<2x128xf32> to vector<2x128xbf16>
    %cst_36 = arith.constant dense<0.000000e+00> : vector<2x512xf32>
    %168 = tpu.matmul %167, %11, %cst_36 {dimension_numbers = #tpu.dot_dimension_numbers<[1], [0], [0], [1], [0, 0, 1, 1], [], []>} : vector<2x128xbf16>, vector<128x512xbf16>, vector<2x512xf32> -> vector<2x512xf32>
    %169 = arith.addf %166, %168 : vector<2x512xf32>
    %170 = vector.extract_strided_slice %169 {offsets = [0, 0], sizes = [2, 384], strides = [1, 1]} : vector<2x512xf32> to vector<2x384xf32>
    %171 = arith.negf %170 : vector<2x384xf32>
    %172 = math.exp %171 : vector<2x384xf32>
    %cst_37 = arith.constant 1.000000e+00 : f32
    %173 = vector.broadcast %cst_37 : f32 to vector<2x384xf32>
    %174 = arith.addf %173, %172 : vector<2x384xf32>
    %175 = arith.divf %173, %174 : vector<2x384xf32>
    %176 = vector.extract_strided_slice %175 {offsets = [0, 0], sizes = [2, 128], strides = [1, 1]} : vector<2x384xf32> to vector<2x128xf32>
    %177 = vector.extract_strided_slice %175 {offsets = [0, 128], sizes = [2, 128], strides = [1, 1]} : vector<2x384xf32> to vector<2x128xf32>
    %178 = vector.extract_strided_slice %175 {offsets = [0, 256], sizes = [2, 128], strides = [1, 1]} : vector<2x384xf32> to vector<2x128xf32>
    %179 = vector.extract_strided_slice %169 {offsets = [0, 384], sizes = [2, 128], strides = [1, 1]} : vector<2x512xf32> to vector<2x128xf32>
    %180 = math.tanh %179 : vector<2x128xf32>
    %181 = arith.mulf %177, %162 : vector<2x128xf32>
    %182 = arith.mulf %176, %180 : vector<2x128xf32>
    %183 = arith.addf %181, %182 : vector<2x128xf32>
    %184 = math.tanh %183 : vector<2x128xf32>
    %185 = arith.mulf %178, %184 : vector<2x128xf32>
    %c14 = arith.constant 14 : index
    %c0_38 = arith.constant 0 : index
    %186 = vector.load %arg16[%c14, %c0_38] : memref<16x128xf32, #tpu.memory_space<vmem>>, vector<2x128xf32>
    tpu.vector_store %arg16[%c14, %c0_38], %185 {strides = array<i32>} : memref<16x128xf32, #tpu.memory_space<vmem>>, vector<2x128xf32>,
    %c0_39 = arith.constant 0 : index
    %c0_40 = arith.constant 0 : index
    %187 = vector.load %arg16[%c0_39, %c0_40] : memref<16x128xf32, #tpu.memory_space<vmem>>, vector<16x128xf32>
    %c0_41 = arith.constant 0 : index
    %c0_42 = arith.constant 0 : index
    %188 = vector.load %arg5[%c0_41, %c0_42] : memref<128x512xbf16, #tpu.memory_space<vmem>>, vector<128x512xbf16>
    %c0_43 = arith.constant 0 : index
    %c0_44 = arith.constant 0 : index
    %189 = vector.load %arg6[%c0_43, %c0_44] : memref<128x512xbf16, #tpu.memory_space<vmem>>, vector<128x512xbf16>
    %c0_45 = arith.constant 0 : index
    %c0_46 = arith.constant 0 : index
    %190 = vector.load %arg7[%c0_45, %c0_46] : memref<1x512xf32, #tpu.memory_space<vmem>>, vector<1x512xf32>
    %191 = arith.truncf %187 : vector<16x128xf32> to vector<16x128xbf16>
    %cst_47 = arith.constant dense<0.000000e+00> : vector<16x512xf32>
    %192 = tpu.matmul %191, %188, %cst_47 {dimension_numbers = #tpu.dot_dimension_numbers<[1], [0], [0], [1], [0, 0, 1, 1], [], []>} : vector<16x128xbf16>, vector<128x512xbf16>, vector<16x512xf32> -> vector<16x512xf32>
    %193 = vector.broadcast %190 : vector<1x512xf32> to vector<16x512xf32>
    %194 = arith.addf %192, %193 : vector<16x512xf32>
    %cst_48 = arith.constant 0.000000e+00 : f32
    %195 = vector.broadcast %cst_48 : f32 to vector<2x128xf32>
    %cst_49 = arith.constant 0.000000e+00 : f32
    %196 = vector.broadcast %cst_49 : f32 to vector<2x128xf32>
    %197 = vector.extract_strided_slice %194 {offsets = [0, 0], sizes = [2, 512], strides = [1, 1]} : vector<16x512xf32> to vector<2x512xf32>
    %198 = arith.truncf %195 : vector<2x128xf32> to vector<2x128xbf16>
    %cst_50 = arith.constant dense<0.000000e+00> : vector<2x512xf32>
    %199 = tpu.matmul %198, %189, %cst_50 {dimension_numbers = #tpu.dot_dimension_numbers<[1], [0], [0], [1], [0, 0, 1, 1], [], []>} : vector<2x128xbf16>, vector<128x512xbf16>, vector<2x512xf32> -> vector<2x512xf32>
    %200 = arith.addf %197, %199 : vector<2x512xf32>
    %201 = vector.extract_strided_slice %200 {offsets = [0, 0], sizes = [2, 384], strides = [1, 1]} : vector<2x512xf32> to vector<2x384xf32>
    %202 = arith.negf %201 : vector<2x384xf32>
    %203 = math.exp %202 : vector<2x384xf32>
    %cst_51 = arith.constant 1.000000e+00 : f32
    %204 = vector.broadcast %cst_51 : f32 to vector<2x384xf32>
    %205 = arith.addf %204, %203 : vector<2x384xf32>
    %206 = arith.divf %204, %205 : vector<2x384xf32>
    %207 = vector.extract_strided_slice %206 {offsets = [0, 0], sizes = [2, 128], strides = [1, 1]} : vector<2x384xf32> to vector<2x128xf32>
    %208 = vector.extract_strided_slice %206 {offsets = [0, 128], sizes = [2, 128], strides = [1, 1]} : vector<2x384xf32> to vector<2x128xf32>
    %209 = vector.extract_strided_slice %206 {offsets = [0, 256], sizes = [2, 128], strides = [1, 1]} : vector<2x384xf32> to vector<2x128xf32>
    %210 = vector.extract_strided_slice %200 {offsets = [0, 384], sizes = [2, 128], strides = [1, 1]} : vector<2x512xf32> to vector<2x128xf32>
    %211 = math.tanh %210 : vector<2x128xf32>
    %212 = arith.mulf %208, %196 : vector<2x128xf32>
    %213 = arith.mulf %207, %211 : vector<2x128xf32>
    %214 = arith.addf %212, %213 : vector<2x128xf32>
    %215 = math.tanh %214 : vector<2x128xf32>
    %216 = arith.mulf %209, %215 : vector<2x128xf32>
    %c0_52 = arith.constant 0 : index
    %c0_53 = arith.constant 0 : index
    %217 = vector.load %arg17[%c0_52, %c0_53] : memref<16x128xf32, #tpu.memory_space<vmem>>, vector<2x128xf32>
    tpu.vector_store %arg17[%c0_52, %c0_53], %216 {strides = array<i32>} : memref<16x128xf32, #tpu.memory_space<vmem>>, vector<2x128xf32>,
    %218 = vector.extract_strided_slice %194 {offsets = [2, 0], sizes = [2, 512], strides = [1, 1]} : vector<16x512xf32> to vector<2x512xf32>
    %219 = arith.truncf %216 : vector<2x128xf32> to vector<2x128xbf16>
    %cst_54 = arith.constant dense<0.000000e+00> : vector<2x512xf32>
    %220 = tpu.matmul %219, %189, %cst_54 {dimension_numbers = #tpu.dot_dimension_numbers<[1], [0], [0], [1], [0, 0, 1, 1], [], []>} : vector<2x128xbf16>, vector<128x512xbf16>, vector<2x512xf32> -> vector<2x512xf32>
    %221 = arith.addf %218, %220 : vector<2x512xf32>
    %222 = vector.extract_strided_slice %221 {offsets = [0, 0], sizes = [2, 384], strides = [1, 1]} : vector<2x512xf32> to vector<2x384xf32>
    %223 = arith.negf %222 : vector<2x384xf32>
    %224 = math.exp %223 : vector<2x384xf32>
    %cst_55 = arith.constant 1.000000e+00 : f32
    %225 = vector.broadcast %cst_55 : f32 to vector<2x384xf32>
    %226 = arith.addf %225, %224 : vector<2x384xf32>
    %227 = arith.divf %225, %226 : vector<2x384xf32>
    %228 = vector.extract_strided_slice %227 {offsets = [0, 0], sizes = [2, 128], strides = [1, 1]} : vector<2x384xf32> to vector<2x128xf32>
    %229 = vector.extract_strided_slice %227 {offsets = [0, 128], sizes = [2, 128], strides = [1, 1]} : vector<2x384xf32> to vector<2x128xf32>
    %230 = vector.extract_strided_slice %227 {offsets = [0, 256], sizes = [2, 128], strides = [1, 1]} : vector<2x384xf32> to vector<2x128xf32>
    %231 = vector.extract_strided_slice %221 {offsets = [0, 384], sizes = [2, 128], strides = [1, 1]} : vector<2x512xf32> to vector<2x128xf32>
    %232 = math.tanh %231 : vector<2x128xf32>
    %233 = arith.mulf %229, %214 : vector<2x128xf32>
    %234 = arith.mulf %228, %232 : vector<2x128xf32>
    %235 = arith.addf %233, %234 : vector<2x128xf32>
    %236 = math.tanh %235 : vector<2x128xf32>
    %237 = arith.mulf %230, %236 : vector<2x128xf32>
    %c2_56 = arith.constant 2 : index
    %c0_57 = arith.constant 0 : index
    %238 = vector.load %arg17[%c2_56, %c0_57] : memref<16x128xf32, #tpu.memory_space<vmem>>, vector<2x128xf32>
    tpu.vector_store %arg17[%c2_56, %c0_57], %237 {strides = array<i32>} : memref<16x128xf32, #tpu.memory_space<vmem>>, vector<2x128xf32>,
    %239 = vector.extract_strided_slice %194 {offsets = [4, 0], sizes = [2, 512], strides = [1, 1]} : vector<16x512xf32> to vector<2x512xf32>
    %240 = arith.truncf %237 : vector<2x128xf32> to vector<2x128xbf16>
    %cst_58 = arith.constant dense<0.000000e+00> : vector<2x512xf32>
    %241 = tpu.matmul %240, %189, %cst_58 {dimension_numbers = #tpu.dot_dimension_numbers<[1], [0], [0], [1], [0, 0, 1, 1], [], []>} : vector<2x128xbf16>, vector<128x512xbf16>, vector<2x512xf32> -> vector<2x512xf32>
    %242 = arith.addf %239, %241 : vector<2x512xf32>
    %243 = vector.extract_strided_slice %242 {offsets = [0, 0], sizes = [2, 384], strides = [1, 1]} : vector<2x512xf32> to vector<2x384xf32>
    %244 = arith.negf %243 : vector<2x384xf32>
    %245 = math.exp %244 : vector<2x384xf32>
    %cst_59 = arith.constant 1.000000e+00 : f32
    %246 = vector.broadcast %cst_59 : f32 to vector<2x384xf32>
    %247 = arith.addf %246, %245 : vector<2x384xf32>
    %248 = arith.divf %246, %247 : vector<2x384xf32>
    %249 = vector.extract_strided_slice %248 {offsets = [0, 0], sizes = [2, 128], strides = [1, 1]} : vector<2x384xf32> to vector<2x128xf32>
    %250 = vector.extract_strided_slice %248 {offsets = [0, 128], sizes = [2, 128], strides = [1, 1]} : vector<2x384xf32> to vector<2x128xf32>
    %251 = vector.extract_strided_slice %248 {offsets = [0, 256], sizes = [2, 128], strides = [1, 1]} : vector<2x384xf32> to vector<2x128xf32>
    %252 = vector.extract_strided_slice %242 {offsets = [0, 384], sizes = [2, 128], strides = [1, 1]} : vector<2x512xf32> to vector<2x128xf32>
    %253 = math.tanh %252 : vector<2x128xf32>
    %254 = arith.mulf %250, %235 : vector<2x128xf32>
    %255 = arith.mulf %249, %253 : vector<2x128xf32>
    %256 = arith.addf %254, %255 : vector<2x128xf32>
    %257 = math.tanh %256 : vector<2x128xf32>
    %258 = arith.mulf %251, %257 : vector<2x128xf32>
    %c4_60 = arith.constant 4 : index
    %c0_61 = arith.constant 0 : index
    %259 = vector.load %arg17[%c4_60, %c0_61] : memref<16x128xf32, #tpu.memory_space<vmem>>, vector<2x128xf32>
    tpu.vector_store %arg17[%c4_60, %c0_61], %258 {strides = array<i32>} : memref<16x128xf32, #tpu.memory_space<vmem>>, vector<2x128xf32>,
    %260 = vector.extract_strided_slice %194 {offsets = [6, 0], sizes = [2, 512], strides = [1, 1]} : vector<16x512xf32> to vector<2x512xf32>
    %261 = arith.truncf %258 : vector<2x128xf32> to vector<2x128xbf16>
    %cst_62 = arith.constant dense<0.000000e+00> : vector<2x512xf32>
    %262 = tpu.matmul %261, %189, %cst_62 {dimension_numbers = #tpu.dot_dimension_numbers<[1], [0], [0], [1], [0, 0, 1, 1], [], []>} : vector<2x128xbf16>, vector<128x512xbf16>, vector<2x512xf32> -> vector<2x512xf32>
    %263 = arith.addf %260, %262 : vector<2x512xf32>
    %264 = vector.extract_strided_slice %263 {offsets = [0, 0], sizes = [2, 384], strides = [1, 1]} : vector<2x512xf32> to vector<2x384xf32>
    %265 = arith.negf %264 : vector<2x384xf32>
    %266 = math.exp %265 : vector<2x384xf32>
    %cst_63 = arith.constant 1.000000e+00 : f32
    %267 = vector.broadcast %cst_63 : f32 to vector<2x384xf32>
    %268 = arith.addf %267, %266 : vector<2x384xf32>
    %269 = arith.divf %267, %268 : vector<2x384xf32>
    %270 = vector.extract_strided_slice %269 {offsets = [0, 0], sizes = [2, 128], strides = [1, 1]} : vector<2x384xf32> to vector<2x128xf32>
    %271 = vector.extract_strided_slice %269 {offsets = [0, 128], sizes = [2, 128], strides = [1, 1]} : vector<2x384xf32> to vector<2x128xf32>
    %272 = vector.extract_strided_slice %269 {offsets = [0, 256], sizes = [2, 128], strides = [1, 1]} : vector<2x384xf32> to vector<2x128xf32>
    %273 = vector.extract_strided_slice %263 {offsets = [0, 384], sizes = [2, 128], strides = [1, 1]} : vector<2x512xf32> to vector<2x128xf32>
    %274 = math.tanh %273 : vector<2x128xf32>
    %275 = arith.mulf %271, %256 : vector<2x128xf32>
    %276 = arith.mulf %270, %274 : vector<2x128xf32>
    %277 = arith.addf %275, %276 : vector<2x128xf32>
    %278 = math.tanh %277 : vector<2x128xf32>
    %279 = arith.mulf %272, %278 : vector<2x128xf32>
    %c6_64 = arith.constant 6 : index
    %c0_65 = arith.constant 0 : index
    %280 = vector.load %arg17[%c6_64, %c0_65] : memref<16x128xf32, #tpu.memory_space<vmem>>, vector<2x128xf32>
    tpu.vector_store %arg17[%c6_64, %c0_65], %279 {strides = array<i32>} : memref<16x128xf32, #tpu.memory_space<vmem>>, vector<2x128xf32>,
    %281 = vector.extract_strided_slice %194 {offsets = [8, 0], sizes = [2, 512], strides = [1, 1]} : vector<16x512xf32> to vector<2x512xf32>
    %282 = arith.truncf %279 : vector<2x128xf32> to vector<2x128xbf16>
    %cst_66 = arith.constant dense<0.000000e+00> : vector<2x512xf32>
    %283 = tpu.matmul %282, %189, %cst_66 {dimension_numbers = #tpu.dot_dimension_numbers<[1], [0], [0], [1], [0, 0, 1, 1], [], []>} : vector<2x128xbf16>, vector<128x512xbf16>, vector<2x512xf32> -> vector<2x512xf32>
    %284 = arith.addf %281, %283 : vector<2x512xf32>
    %285 = vector.extract_strided_slice %284 {offsets = [0, 0], sizes = [2, 384], strides = [1, 1]} : vector<2x512xf32> to vector<2x384xf32>
    %286 = arith.negf %285 : vector<2x384xf32>
    %287 = math.exp %286 : vector<2x384xf32>
    %cst_67 = arith.constant 1.000000e+00 : f32
    %288 = vector.broadcast %cst_67 : f32 to vector<2x384xf32>
    %289 = arith.addf %288, %287 : vector<2x384xf32>
    %290 = arith.divf %288, %289 : vector<2x384xf32>
    %291 = vector.extract_strided_slice %290 {offsets = [0, 0], sizes = [2, 128], strides = [1, 1]} : vector<2x384xf32> to vector<2x128xf32>
    %292 = vector.extract_strided_slice %290 {offsets = [0, 128], sizes = [2, 128], strides = [1, 1]} : vector<2x384xf32> to vector<2x128xf32>
    %293 = vector.extract_strided_slice %290 {offsets = [0, 256], sizes = [2, 128], strides = [1, 1]} : vector<2x384xf32> to vector<2x128xf32>
    %294 = vector.extract_strided_slice %284 {offsets = [0, 384], sizes = [2, 128], strides = [1, 1]} : vector<2x512xf32> to vector<2x128xf32>
    %295 = math.tanh %294 : vector<2x128xf32>
    %296 = arith.mulf %292, %277 : vector<2x128xf32>
    %297 = arith.mulf %291, %295 : vector<2x128xf32>
    %298 = arith.addf %296, %297 : vector<2x128xf32>
    %299 = math.tanh %298 : vector<2x128xf32>
    %300 = arith.mulf %293, %299 : vector<2x128xf32>
    %c8_68 = arith.constant 8 : index
    %c0_69 = arith.constant 0 : index
    %301 = vector.load %arg17[%c8_68, %c0_69] : memref<16x128xf32, #tpu.memory_space<vmem>>, vector<2x128xf32>
    tpu.vector_store %arg17[%c8_68, %c0_69], %300 {strides = array<i32>} : memref<16x128xf32, #tpu.memory_space<vmem>>, vector<2x128xf32>,
    %302 = vector.extract_strided_slice %194 {offsets = [10, 0], sizes = [2, 512], strides = [1, 1]} : vector<16x512xf32> to vector<2x512xf32>
    %303 = arith.truncf %300 : vector<2x128xf32> to vector<2x128xbf16>
    %cst_70 = arith.constant dense<0.000000e+00> : vector<2x512xf32>
    %304 = tpu.matmul %303, %189, %cst_70 {dimension_numbers = #tpu.dot_dimension_numbers<[1], [0], [0], [1], [0, 0, 1, 1], [], []>} : vector<2x128xbf16>, vector<128x512xbf16>, vector<2x512xf32> -> vector<2x512xf32>
    %305 = arith.addf %302, %304 : vector<2x512xf32>
    %306 = vector.extract_strided_slice %305 {offsets = [0, 0], sizes = [2, 384], strides = [1, 1]} : vector<2x512xf32> to vector<2x384xf32>
    %307 = arith.negf %306 : vector<2x384xf32>
    %308 = math.exp %307 : vector<2x384xf32>
    %cst_71 = arith.constant 1.000000e+00 : f32
    %309 = vector.broadcast %cst_71 : f32 to vector<2x384xf32>
    %310 = arith.addf %309, %308 : vector<2x384xf32>
    %311 = arith.divf %309, %310 : vector<2x384xf32>
    %312 = vector.extract_strided_slice %311 {offsets = [0, 0], sizes = [2, 128], strides = [1, 1]} : vector<2x384xf32> to vector<2x128xf32>
    %313 = vector.extract_strided_slice %311 {offsets = [0, 128], sizes = [2, 128], strides = [1, 1]} : vector<2x384xf32> to vector<2x128xf32>
    %314 = vector.extract_strided_slice %311 {offsets = [0, 256], sizes = [2, 128], strides = [1, 1]} : vector<2x384xf32> to vector<2x128xf32>
    %315 = vector.extract_strided_slice %305 {offsets = [0, 384], sizes = [2, 128], strides = [1, 1]} : vector<2x512xf32> to vector<2x128xf32>
    %316 = math.tanh %315 : vector<2x128xf32>
    %317 = arith.mulf %313, %298 : vector<2x128xf32>
    %318 = arith.mulf %312, %316 : vector<2x128xf32>
    %319 = arith.addf %317, %318 : vector<2x128xf32>
    %320 = math.tanh %319 : vector<2x128xf32>
    %321 = arith.mulf %314, %320 : vector<2x128xf32>
    %c10_72 = arith.constant 10 : index
    %c0_73 = arith.constant 0 : index
    %322 = vector.load %arg17[%c10_72, %c0_73] : memref<16x128xf32, #tpu.memory_space<vmem>>, vector<2x128xf32>
    tpu.vector_store %arg17[%c10_72, %c0_73], %321 {strides = array<i32>} : memref<16x128xf32, #tpu.memory_space<vmem>>, vector<2x128xf32>,
    %323 = vector.extract_strided_slice %194 {offsets = [12, 0], sizes = [2, 512], strides = [1, 1]} : vector<16x512xf32> to vector<2x512xf32>
    %324 = arith.truncf %321 : vector<2x128xf32> to vector<2x128xbf16>
    %cst_74 = arith.constant dense<0.000000e+00> : vector<2x512xf32>
    %325 = tpu.matmul %324, %189, %cst_74 {dimension_numbers = #tpu.dot_dimension_numbers<[1], [0], [0], [1], [0, 0, 1, 1], [], []>} : vector<2x128xbf16>, vector<128x512xbf16>, vector<2x512xf32> -> vector<2x512xf32>
    %326 = arith.addf %323, %325 : vector<2x512xf32>
    %327 = vector.extract_strided_slice %326 {offsets = [0, 0], sizes = [2, 384], strides = [1, 1]} : vector<2x512xf32> to vector<2x384xf32>
    %328 = arith.negf %327 : vector<2x384xf32>
    %329 = math.exp %328 : vector<2x384xf32>
    %cst_75 = arith.constant 1.000000e+00 : f32
    %330 = vector.broadcast %cst_75 : f32 to vector<2x384xf32>
    %331 = arith.addf %330, %329 : vector<2x384xf32>
    %332 = arith.divf %330, %331 : vector<2x384xf32>
    %333 = vector.extract_strided_slice %332 {offsets = [0, 0], sizes = [2, 128], strides = [1, 1]} : vector<2x384xf32> to vector<2x128xf32>
    %334 = vector.extract_strided_slice %332 {offsets = [0, 128], sizes = [2, 128], strides = [1, 1]} : vector<2x384xf32> to vector<2x128xf32>
    %335 = vector.extract_strided_slice %332 {offsets = [0, 256], sizes = [2, 128], strides = [1, 1]} : vector<2x384xf32> to vector<2x128xf32>
    %336 = vector.extract_strided_slice %326 {offsets = [0, 384], sizes = [2, 128], strides = [1, 1]} : vector<2x512xf32> to vector<2x128xf32>
    %337 = math.tanh %336 : vector<2x128xf32>
    %338 = arith.mulf %334, %319 : vector<2x128xf32>
    %339 = arith.mulf %333, %337 : vector<2x128xf32>
    %340 = arith.addf %338, %339 : vector<2x128xf32>
    %341 = math.tanh %340 : vector<2x128xf32>
    %342 = arith.mulf %335, %341 : vector<2x128xf32>
    %c12_76 = arith.constant 12 : index
    %c0_77 = arith.constant 0 : index
    %343 = vector.load %arg17[%c12_76, %c0_77] : memref<16x128xf32, #tpu.memory_space<vmem>>, vector<2x128xf32>
    tpu.vector_store %arg17[%c12_76, %c0_77], %342 {strides = array<i32>} : memref<16x128xf32, #tpu.memory_space<vmem>>, vector<2x128xf32>,
    %344 = vector.extract_strided_slice %194 {offsets = [14, 0], sizes = [2, 512], strides = [1, 1]} : vector<16x512xf32> to vector<2x512xf32>
    %345 = arith.truncf %342 : vector<2x128xf32> to vector<2x128xbf16>
    %cst_78 = arith.constant dense<0.000000e+00> : vector<2x512xf32>
    %346 = tpu.matmul %345, %189, %cst_78 {dimension_numbers = #tpu.dot_dimension_numbers<[1], [0], [0], [1], [0, 0, 1, 1], [], []>} : vector<2x128xbf16>, vector<128x512xbf16>, vector<2x512xf32> -> vector<2x512xf32>
    %347 = arith.addf %344, %346 : vector<2x512xf32>
    %348 = vector.extract_strided_slice %347 {offsets = [0, 0], sizes = [2, 384], strides = [1, 1]} : vector<2x512xf32> to vector<2x384xf32>
    %349 = arith.negf %348 : vector<2x384xf32>
    %350 = math.exp %349 : vector<2x384xf32>
    %cst_79 = arith.constant 1.000000e+00 : f32
    %351 = vector.broadcast %cst_79 : f32 to vector<2x384xf32>
    %352 = arith.addf %351, %350 : vector<2x384xf32>
    %353 = arith.divf %351, %352 : vector<2x384xf32>
    %354 = vector.extract_strided_slice %353 {offsets = [0, 0], sizes = [2, 128], strides = [1, 1]} : vector<2x384xf32> to vector<2x128xf32>
    %355 = vector.extract_strided_slice %353 {offsets = [0, 128], sizes = [2, 128], strides = [1, 1]} : vector<2x384xf32> to vector<2x128xf32>
    %356 = vector.extract_strided_slice %353 {offsets = [0, 256], sizes = [2, 128], strides = [1, 1]} : vector<2x384xf32> to vector<2x128xf32>
    %357 = vector.extract_strided_slice %347 {offsets = [0, 384], sizes = [2, 128], strides = [1, 1]} : vector<2x512xf32> to vector<2x128xf32>
    %358 = math.tanh %357 : vector<2x128xf32>
    %359 = arith.mulf %355, %340 : vector<2x128xf32>
    %360 = arith.mulf %354, %358 : vector<2x128xf32>
    %361 = arith.addf %359, %360 : vector<2x128xf32>
    %362 = math.tanh %361 : vector<2x128xf32>
    %363 = arith.mulf %356, %362 : vector<2x128xf32>
    %c14_80 = arith.constant 14 : index
    %c0_81 = arith.constant 0 : index
    %364 = vector.load %arg17[%c14_80, %c0_81] : memref<16x128xf32, #tpu.memory_space<vmem>>, vector<2x128xf32>
    tpu.vector_store %arg17[%c14_80, %c0_81], %363 {strides = array<i32>} : memref<16x128xf32, #tpu.memory_space<vmem>>, vector<2x128xf32>,
    %c0_82 = arith.constant 0 : index
    %c0_83 = arith.constant 0 : index
    %365 = vector.load %arg17[%c0_82, %c0_83] : memref<16x128xf32, #tpu.memory_space<vmem>>, vector<16x128xf32>
    %366 = arith.truncf %365 : vector<16x128xf32> to vector<16x128xbf16>
    %c0_84 = arith.constant 0 : index
    %c0_85 = arith.constant 0 : index
    %367 = vector.load %arg8[%c0_84, %c0_85] : memref<128x384xbf16, #tpu.memory_space<vmem>>, vector<128x384xbf16>
    %cst_86 = arith.constant dense<0.000000e+00> : vector<16x384xf32>
    %368 = tpu.matmul %366, %367, %cst_86 {dimension_numbers = #tpu.dot_dimension_numbers<[1], [0], [0], [1], [0, 0, 1, 1], [], []>} : vector<16x128xbf16>, vector<128x384xbf16>, vector<16x384xf32> -> vector<16x384xf32>
    %369 = vector.extract_strided_slice %368 {offsets = [0, 0], sizes = [16, 128], strides = [1, 1]} : vector<16x384xf32> to vector<16x128xf32>
    %370 = vector.extract_strided_slice %368 {offsets = [0, 128], sizes = [16, 128], strides = [1, 1]} : vector<16x384xf32> to vector<16x128xf32>
    %371 = vector.extract_strided_slice %368 {offsets = [0, 256], sizes = [16, 128], strides = [1, 1]} : vector<16x384xf32> to vector<16x128xf32>
    "tpu.trace_start"() <{level = 10 : i32, message = "rd,cd->rc"}> : () -> ()
    %cst_87 = arith.constant dense<0.000000e+00> : vector<16x16xf32>
    %372 = tpu.matmul %369, %370, %cst_87 {dimension_numbers = #tpu.dot_dimension_numbers<[1], [1], [0], [0], [0, 0, 1, 0], [], []>} : vector<16x128xf32>, vector<16x128xf32>, vector<16x16xf32> -> vector<16x16xf32>
    "tpu.trace_stop"() : () -> ()
    %cst_88 = arith.constant 0.0883883461 : f32
    %373 = vector.broadcast %cst_88 : f32 to vector<16x16xf32>
    %374 = arith.mulf %372, %373 : vector<16x16xf32>
    %c0_89 = arith.constant 0 : index
    %c0_90 = arith.constant 0 : index
    %375 = vector.load %arg13[%c0_89, %c0_90] : memref<16x16xf32, #tpu.memory_space<vmem>>, vector<16x16xf32>
    %376 = arith.addf %374, %375 : vector<16x16xf32>
    %cst_91 = arith.constant dense<0xFF800000> : vector<16xf32>
    %377 = vector.multi_reduction <maximumf>, %376, %cst_91 [1] : vector<16x16xf32> to vector<16xf32>
    %378 = vector.shape_cast %377 : vector<16xf32> to vector<16x1xf32>
    %379 = vector.broadcast %378 : vector<16x1xf32> to vector<16x16xf32>
    %380 = arith.subf %376, %379 : vector<16x16xf32>
    %381 = math.exp %380 : vector<16x16xf32>
    %cst_92 = arith.constant dense<0.000000e+00> : vector<16xf32>
    %382 = vector.multi_reduction <add>, %381, %cst_92 [1] : vector<16x16xf32> to vector<16xf32>
    %383 = vector.shape_cast %382 : vector<16xf32> to vector<16x1xf32>
    %384 = vector.broadcast %383 : vector<16x1xf32> to vector<16x16xf32>
    %385 = arith.divf %381, %384 : vector<16x16xf32>
    %cst_93 = arith.constant dense<0.000000e+00> : vector<16xf32>
    %386 = vector.multi_reduction <add>, %385, %cst_93 [0] : vector<16x16xf32> to vector<16xf32>
    %387 = vector.shape_cast %386 : vector<16xf32> to vector<1x16xf32>
    %c0_94 = arith.constant 0 : index
    %c0_95 = arith.constant 0 : index
    %388 = vector.load %arg14[%c0_94, %c0_95] : memref<2x16xf32, #tpu.memory_space<vmem>>, vector<2x16xf32>
    %389 = vector.broadcast %387 : vector<1x16xf32> to vector<2x16xf32>
    %390 = arith.mulf %388, %389 : vector<2x16xf32>
    %cst_96 = arith.constant dense<0.000000e+00> : vector<2x128xf32>
    %391 = tpu.matmul %390, %371, %cst_96 {dimension_numbers = #tpu.dot_dimension_numbers<[1], [0], [0], [1], [0, 0, 1, 1], [], []>} : vector<2x16xf32>, vector<16x128xf32>, vector<2x128xf32> -> vector<2x128xf32>
    %cst_97 = arith.constant dense<0.000000e+00> : vector<2xf32>
    %392 = vector.multi_reduction <add>, %391, %cst_97 [1] : vector<2x128xf32> to vector<2xf32>
    %393 = vector.shape_cast %392 : vector<2xf32> to vector<2x1xf32>
    %cst_98 = arith.constant 1.280000e+02 : f32
    %394 = vector.broadcast %cst_98 : f32 to vector<2x1xf32>
    %395 = arith.divf %393, %394 : vector<2x1xf32>
    %396 = vector.broadcast %395 : vector<2x1xf32> to vector<2x128xf32>
    %397 = arith.subf %391, %396 : vector<2x128xf32>
    %398 = arith.mulf %397, %397 : vector<2x128xf32>
    %cst_99 = arith.constant dense<0.000000e+00> : vector<2xf32>
    %399 = vector.multi_reduction <add>, %398, %cst_99 [1] : vector<2x128xf32> to vector<2xf32>
    %400 = vector.shape_cast %399 : vector<2xf32> to vector<2x1xf32>
    %cst_100 = arith.constant 1.280000e+02 : f32
    %401 = vector.broadcast %cst_100 : f32 to vector<2x1xf32>
    %402 = arith.divf %400, %401 : vector<2x1xf32>
    %403 = vector.broadcast %395 : vector<2x1xf32> to vector<2x128xf32>
    %404 = arith.subf %391, %403 : vector<2x128xf32>
    %cst_101 = arith.constant 9.99999974E-6 : f32
    %405 = vector.broadcast %cst_101 : f32 to vector<2x1xf32>
    %406 = arith.addf %402, %405 : vector<2x1xf32>
    %407 = math.rsqrt %406 : vector<2x1xf32>
    %408 = vector.broadcast %407 : vector<2x1xf32> to vector<2x128xf32>
    %409 = arith.mulf %404, %408 : vector<2x128xf32>
    %c0_102 = arith.constant 0 : index
    %c0_103 = arith.constant 0 : index
    %410 = vector.load %arg9[%c0_102, %c0_103] : memref<1x128xf32, #tpu.memory_space<vmem>>, vector<1x128xf32>
    %411 = vector.broadcast %410 : vector<1x128xf32> to vector<2x128xf32>
    %412 = arith.mulf %409, %411 : vector<2x128xf32>
    %c0_104 = arith.constant 0 : index
    %c0_105 = arith.constant 0 : index
    %413 = vector.load %arg10[%c0_104, %c0_105] : memref<1x128xf32, #tpu.memory_space<vmem>>, vector<1x128xf32>
    %414 = vector.broadcast %413 : vector<1x128xf32> to vector<2x128xf32>
    %415 = arith.addf %412, %414 : vector<2x128xf32>
    %c0_106 = arith.constant 0 : index
    %c0_107 = arith.constant 0 : index
    %416 = vector.load %arg11[%c0_106, %c0_107] : memref<128x1xf32, #tpu.memory_space<vmem>>, vector<128x1xf32>
    %cst_108 = arith.constant dense<0.000000e+00> : vector<2x1xf32>
    %417 = tpu.matmul %415, %416, %cst_108 {dimension_numbers = #tpu.dot_dimension_numbers<[1], [0], [0], [1], [0, 0, 1, 1], [], []>} : vector<2x128xf32>, vector<128x1xf32>, vector<2x1xf32> -> vector<2x1xf32>
    %c0_109 = arith.constant 0 : index
    %c0_110 = arith.constant 0 : index
    %418 = vector.load %arg12[%c0_109, %c0_110] : memref<1x1xf32, #tpu.memory_space<vmem>>, vector<1x1xf32>
    %419 = vector.broadcast %418 : vector<1x1xf32> to vector<2x1xf32>
    %420 = arith.addf %417, %419 : vector<2x1xf32>
    %c0_111 = arith.constant 0 : index
    %c0_112 = arith.constant 0 : index
    %421 = vector.load %arg15[%c0_111, %c0_112] : memref<2x1xf32, #tpu.memory_space<vmem>>, vector<2x1xf32>
    tpu.vector_store %arg15[%c0_111, %c0_112], %420 {strides = array<i32>} : memref<2x1xf32, #tpu.memory_space<vmem>>, vector<2x1xf32>,
    return
  }
}

</mosaic_0001>

<bundles_post_ra>
// kernel: lstm_attention_forward.1
= control target key start
LH: loop header
LB: loop body
LE: loop exit
PB: predicated region body
PF: predicated region fallthrough
CT: control target
= control target key end

     0   :  { %s6050_s0 = inlined_call_operand.vmem [shape: s32[16,1], index: 0, kind: input, shape index: {}]   ;;  %s6051_s1 = inlined_call_operand.vmem [shape: bf16[128,64], index: 1, kind: input, shape index: {}]   ;;  %s6052_s2 = inlined_call_operand.hbm [shape: bf16[64,512], index: 2, kind: input, shape index: {}]   ;;  %s6053_s3 = inlined_call_operand.vmem [shape: bf16[128,512], index: 3, kind: input, shape index: {}]   ;;  %s6054_s4 = inlined_call_operand.vmem [shape: f32[1,512], index: 4, kind: input, shape index: {}]   ;;  %s6055_s5 = inlined_call_operand.hbm [shape: bf16[128,512], index: 5, kind: input, shape index: {}]   ;;  %s6056_s6 = inlined_call_operand.hbm [shape: bf16[128,512], index: 6, kind: input, shape index: {}]   ;;  %s6057_s7 = inlined_call_operand.vmem [shape: f32[1,512], index: 7, kind: input, shape index: {}]   ;;  %s6058_s8 = inlined_call_operand.hbm [shape: bf16[128,384], index: 8, kind: input, shape index: {}]   ;;  %s6059_s9 = inlined_call_operand.vmem [shape: f32[1,128], index: 9, kind: input, shape index: {}]   ;;  %s6060_s10 = inlined_call_operand.vmem [shape: f32[1,128], index: 10, kind: input, shape index: {}]   ;;  %s6061_s11 = inlined_call_operand.vmem [shape: f32[128,1], index: 11, kind: input, shape index: {}]   ;;  %s6062_s12 = inlined_call_operand.<no memory space> [shape: f32[1,1], index: 12, kind: input, shape index: {}]   ;;  %s6063_s13 = inlined_call_operand.vmem [shape: f32[16,16], index: 13, kind: input, shape index: {}]   ;;  %s6064_s14 = inlined_call_operand.vmem [shape: f32[2,16], index: 14, kind: input, shape index: {}]   ;;  %s6065_s15 = inlined_call_operand.vmem [shape: f32[2,1], index: 15, kind: output, shape index: {}]  }
   0x1   :  { %v20_v0 = vstv %s6062_s12 }
   0x2   :  { %21 = vst [vmem:[#allocation4] sm:$0x1] %v20_v0 }
   0x3   :  { %22 = vsyncpa [#allocation6], 0 }
   0x4   :  { %23 = vsyncpa [#allocation8], 0 }
   0x5   :  { %24 = vsyncpa [#allocation11], 0  ;;  %s4705_s20 = smov [#allocation7]   ;;  %s4706_s22 = smov [#allocation5]  }
   0x6   :  { %s50_s21 = sshll.u32 %s4705_s20, 4  ;;  %s34_s23 = sshll.u32 %s4706_s22, 4  ;;  %s51_s21 = int_to_ptr.vmem [resolvable:$true] %s50_s21  ;;  %s4801_s23 = int_to_ptr.vmem [resolvable:$true] %s34_s23 }
   0x7   :  { %s4611_s26 = scalar_lea.hbm %s6055_s5, 4096 }
   0x8   :  { %p4612_p0 = scmp.ne.s32.totalorder %s6055_s5, %s4611_s26  ;;  %p4615_p1 = scmp.lt.u32.totalorder %s4611_s26, %s6055_s5 }
   0xa   :  { %p4617_p2 = pnand %p4615_p1, %p4612_p0 }
   0xc   :  { %4620 = shalt.err (!%p4617_p2)
}
   0xd   :  { %s4621_s30 = scalar_lea.vmem %s51_s21, 4096  ;;  %p4626_p4 = scmp.lt.s32.totalorder %s51_s21, %s51_s21 }
   0xe   :  { %p4622_p3 = scmp.ne.s32.totalorder %s51_s21, %s4621_s30  ;;  %p4627_p5 = scmp.lt.s32.totalorder %s4621_s30, %s4621_s30 }
  0x10   :  { %p4628_p6 = por %p4627_p5, %p4626_p4 }
  0x12   :  { %p4629_p7 = pnand %p4628_p6, %p4622_p3 }
  0x14   :  { %4632 = shalt.err (!%p4629_p7)
}
  0x15   :  { %s4707_s16 = smov 256   ;;  %s4708_s17 = smov 16  }
  0x16   :  { %56 = dma.hbm_to_vmem [thread:$0]  %s6055_s5, 4096, %s51_s21, [#allocation8], %s4707_s16, %s4707_s16, %s4708_s17  }
  0x17   :  { %s4633_s24 = scalar_lea.hbm %s6052_s2, 2048 }
  0x18   :  { %p4634_p8 = scmp.ne.s32.totalorder %s6052_s2, %s4633_s24  ;;  %p4637_p9 = scmp.lt.u32.totalorder %s4633_s24, %s6052_s2 }
  0x1a   :  { %p4639_p10 = pnand %p4637_p9, %p4634_p8 }
  0x1c   :  { %4642 = shalt.err (!%p4639_p10)
}
  0x1d   :  { %s4643_s12 = scalar_lea.vmem %s4801_s23, 2048  ;;  %p4648_p12 = scmp.lt.s32.totalorder %s4801_s23, %s4801_s23 }
  0x1e   :  { %p4644_p11 = scmp.ne.s32.totalorder %s4801_s23, %s4643_s12  ;;  %p4649_p13 = scmp.lt.s32.totalorder %s4643_s12, %s4643_s12 }
  0x20   :  { %p4650_p0 = por %p4649_p13, %p4648_p12 }
  0x22   :  { %p4651_p1 = pnand %p4650_p0, %p4644_p11 }
  0x24   :  { %4654 = shalt.err (!%p4651_p1)
}
  0x25   :  { %40 = dma.hbm_to_vmem [thread:$0]  %s6052_s2, 2048, %s4801_s23, [#allocation6], %s4707_s16, %s4707_s16, %s4708_s17  }
  0x26   :  { %s4709_s29 = smov [#allocation9]   ;;  %s4710_s18 = smov [#allocation10]  }
  0x27   :  { %s62_s30 = sshll.u32 %s4709_s29, 4  ;;  %s76_s19 = sshll.u32 %s4710_s18, 4  ;;  %s63_s30 = int_to_ptr.vmem [resolvable:$true] %s62_s30  ;;  %s4838_s19 = int_to_ptr.vmem [resolvable:$true] %s76_s19 }
  0x28   :  { %s4655_s24 = scalar_lea.hbm %s6056_s6, 4096 }
  0x29   :  { %p4656_p2 = scmp.ne.s32.totalorder %s6056_s6, %s4655_s24  ;;  %p4659_p3 = scmp.lt.u32.totalorder %s4655_s24, %s6056_s6 }
  0x2b   :  { %p4661_p4 = pnand %p4659_p3, %p4656_p2 }
  0x2d   :  { %4664 = shalt.err (!%p4661_p4)
}
  0x2e   :  { %s4665_s2 = scalar_lea.vmem %s63_s30, 4096  ;;  %p4670_p6 = scmp.lt.s32.totalorder %s63_s30, %s63_s30 }
  0x2f   :  { %p4666_p5 = scmp.ne.s32.totalorder %s63_s30, %s4665_s2  ;;  %p4671_p7 = scmp.lt.s32.totalorder %s4665_s2, %s4665_s2 }
  0x31   :  { %p4672_p8 = por %p4671_p7, %p4670_p6 }
  0x33   :  { %p4673_p9 = pnand %p4672_p8, %p4666_p5 }
  0x35   :  { %4676 = shalt.err (!%p4673_p9)
}
  0x36   :  { %68 = dma.hbm_to_vmem [thread:$0]  %s6056_s6, 4096, %s63_s30, [#allocation8], %s4707_s16, %s4707_s16, %s4708_s17  }
  0x37   :  { %s4677_s29 = scalar_lea.hbm %s6058_s8, 3072 }
  0x38   :  { %p4678_p10 = scmp.ne.s32.totalorder %s6058_s8, %s4677_s29  ;;  %p4681_p11 = scmp.lt.u32.totalorder %s4677_s29, %s6058_s8 }
  0x3a   :  { %p4683_p12 = pnand %p4681_p11, %p4678_p10 }
  0x3c   :  { %4686 = shalt.err (!%p4683_p12)
}
  0x3d   :  { %s4687_s25 = scalar_lea.vmem %s4838_s19, 3072  ;;  %p4692_p0 = scmp.lt.s32.totalorder %s4838_s19, %s4838_s19 }
  0x3e   :  { %p4688_p13 = scmp.ne.s32.totalorder %s4838_s19, %s4687_s25  ;;  %p4693_p1 = scmp.lt.s32.totalorder %s4687_s25, %s4687_s25 }
  0x40   :  { %p4694_p2 = por %p4693_p1, %p4692_p0 }
  0x42   :  { %p4695_p3 = pnand %p4694_p2, %p4688_p13 }
  0x44   :  { %4698 = shalt.err (!%p4695_p3)
}
  0x45   :  { %s4711_s6 = smov 192   ;;  %s4712_s16 = smov 12  }
  0x46   :  { %82 = dma.hbm_to_vmem [thread:$0]  %s6058_s8, 3072, %s4838_s19, [#allocation11], %s4711_s6, %s4711_s6, %s4712_s16  }
  0x47   :  { %4699 = dma.done.wait [#allocation6], 2048  }
  0x48   :  { %4700 = vsyncadd [#allocation6], 4294965248 }
  0x49   :  { %4701 = dma.done.wait [#allocation8], 8192  }
  0x4a   :  { %4702 = vsyncadd [#allocation8], 4294959104 }
  0x4b   :  { %4703 = dma.done.wait [#allocation11], 3072  }
  0x4c   :  { %4704 = vsyncadd [#allocation11], 4294964224  ;;  %v4713_v1 = vmov 0   ;;  %v6066_v2 = vmov 0.0   ;;  %v108_v3 = vld [vmem:[%s6050_s0] sm:$0xff]  ;;  %v109_v5 = vld [vmem:[%s6050_s0 + $0x8] sm:$0xff]  ;;  %v110_v20 = vlaneseq }
  0x4d   :  { %4073 = vset.pattern.permute.xlu0 %v4713_v1  ;;  %3940 = vmatprep.subr.bf16.mxu0 %v6066_v2  ;;  %v4074_v4 = vld [vmem:[%s6051_s1] sm:$0xff]   ;;  %v4075_v6 = vld [vmem:[%s6051_s1 + $0x8] sm:$0xff]   ;;  %vm4715_vm0 = vmmov 0   ;;  %v4076_v7 = vld [vmem:[%s6051_s1 + $0x10] sm:$0xff]   ;;  %v4716_v26 = vmov 1.0|1.0  }
  0x4e   :  { %415 = vmatprep.mubr.bf16.mxu1 %v4713_v1  ;;  %113 = vperm.xlu0 %4073, %v108_v3   ;;  %v4077_v8 = vld [vmem:[%s6051_s1 + $0x18] sm:$0xff]   ;;  %v4078_v9 = vld [vmem:[%s6051_s1 + $0x20] sm:$0xff]   ;;  %v4079_v10 = vld [vmem:[%s6051_s1 + $0x28] sm:$0xff]   ;;  %v111_v22 = vand.u32 127, %v110_v20  ;;  %vm379_vm4 = vcmask 523264   ;;  %vm3458_vm5 = vcmask 130048  }
  0x4f   :  { %3941 = vmatpush3.bf16.msra.mxu0 %v4074_v4  ;;  %3956 = vmatprep.mubr.msk.bf16.mxu0 %vm4715_vm0, %v6066_v2  ;;  %v4093_v11 = vld [vmem:[#allocation5 + $0x4] ss:$16 sps:$4 sm:$0xff]   ;;  %v4096_v12 = vld [vmem:[#allocation5] ss:$16 sps:$4 sm:$0xff]   ;;  %v4119_v41 = vld [vmem:[#allocation5 + $0xc] ss:$16 sps:$4 sm:$0xff]  }
  0x50   :  { %3942 = vmatprep.subr.bf16.mxu0 %v6066_v2  ;;  %383 = vmatprep.subr.bf16.mxu1 %v4093_v11  ;;  %v4080_v13 = vld [vmem:[%s6051_s1 + $0x30] sm:$0xff]   ;;  %v4081_v16 = vld [vmem:[%s6051_s1 + $0x38] sm:$0xff]   ;;  %vm3565_vm6 = vcmask 1041408   ;;  %vm3689_vm7 = vcmask 1024  }
  0x51   :  { %v4099_v14 = vld [vmem:[#allocation5 + $0x24] ss:$16 sps:$4 sm:$0xff]   ;;  %384 = vmatpush1.bf16.msra.mxu1 %v4096_v12  ;;  %v4102_v15 = vld [vmem:[#allocation5 + $0x20] ss:$16 sps:$4 sm:$0xff]   ;;  %v4117_v46 = vld [vmem:[#allocation5 + $0x8] ss:$16 sps:$4 sm:$0xff]  }
  0x52   :  { %116 = vperm.xlu0 %4073, %v109_v5   ;;  %385 = vmatprep.subr.bf16.mxu1 %v4099_v14  ;;  %v4105_v17 = vld [vmem:[#allocation5 + $0x44] ss:$16 sps:$4 sm:$0xff]   ;;  %v4108_v19 = vld [vmem:[#allocation5 + $0x40] ss:$16 sps:$4 sm:$0xff]   ;;  %v4123_v49 = vld [vmem:[#allocation5 + $0x2c] ss:$16 sps:$4 sm:$0xff]  }
  0x53   :  { %3943 = vmatpush3.bf16.msra.mxu0 %v4075_v6  ;;  %v4917_v18 = vld [vmem:[%s6053_s3 + $0x4] ss:$16 sps:$4 sm:$0xff]   ;;  %v4924_v24 = vld [vmem:[%s6053_s3] ss:$16 sps:$4 sm:$0xff]   ;;  %v4121_v50 = vld [vmem:[#allocation5 + $0x28] ss:$16 sps:$4 sm:$0xff]  }
  0x54   :  { %3944 = vmatprep.subr.bf16.mxu0 %v6066_v2  ;;  %v4929_v25 = vld [vmem:[%s6053_s3 + $0x24] ss:$16 sps:$4 sm:$0xff]   ;;  %v4935_v27 = vld [vmem:[%s6053_s3 + $0x20] ss:$16 sps:$4 sm:$0xff]   ;;  %v4124_v52 = vld [vmem:[#allocation5 + $0x48] ss:$16 sps:$4 sm:$0xff]  }
  0x55   :  { %386 = vmatpush1.bf16.msra.mxu1 %v4102_v15  ;;  %v4942_v28 = vld [vmem:[%s6053_s3 + $0x44] ss:$16 sps:$4 sm:$0xff]   ;;  %v4948_v29 = vld [vmem:[%s6053_s3 + $0x40] ss:$16 sps:$4 sm:$0xff]   ;;  %v4127_v54 = vld [vmem:[#allocation5 + $0x68] ss:$16 sps:$4 sm:$0xff]  }
  0x56   :  { %387 = vmatprep.subr.bf16.mxu1 %v4105_v17  ;;  %v4954_v30 = vld [vmem:[%s6053_s3 + $0x64] ss:$16 sps:$4 sm:$0xff]   ;;  %v4960_v31 = vld [vmem:[%s6053_s3 + $0x60] ss:$16 sps:$4 sm:$0xff]   ;;  %v5036_v55 = vld [vmem:[%s6053_s3 + $0xc] ss:$16 sps:$4 sm:$0xff]  }
  0x57   :  { %3945 = vmatpush3.bf16.msra.mxu0 %v4076_v7  ;;  %v4966_v32 = vld [vmem:[%s6053_s3 + $0x84] ss:$16 sps:$4 sm:$0xff]   ;;  %v4972_v33 = vld [vmem:[%s6053_s3 + $0x80] ss:$16 sps:$4 sm:$0xff]   ;;  %v5041_v56 = vld [vmem:[%s6053_s3 + $0x8] ss:$16 sps:$4 sm:$0xff]  }
  0x58   :  { %3946 = vmatprep.subr.bf16.mxu0 %v6066_v2  ;;  %v4978_v34 = vld [vmem:[%s6053_s3 + $0xa4] ss:$16 sps:$4 sm:$0xff]   ;;  %v4984_v35 = vld [vmem:[%s6053_s3 + $0xa0] ss:$16 sps:$4 sm:$0xff]   ;;  %v5047_v57 = vld [vmem:[%s6053_s3 + $0x2c] ss:$16 sps:$4 sm:$0xff]  }
  0x59   :  { %388 = vmatpush1.bf16.msra.mxu1 %v4108_v19  ;;  %v4990_v36 = vld [vmem:[%s6053_s3 + $0xc4] ss:$16 sps:$4 sm:$0xff]   ;;  %v4997_v38 = vld [vmem:[%s6053_s3 + $0xc0] ss:$16 sps:$4 sm:$0xff]   ;;  %v5054_v58 = vld [vmem:[%s6053_s3 + $0x28] ss:$16 sps:$4 sm:$0xff]  }
  0x5a   :  { %v4111_v37 = vld [vmem:[#allocation5 + $0x64] ss:$16 sps:$4 sm:$0xff]   ;;  %v4114_v39 = vld [vmem:[#allocation5 + $0x60] ss:$16 sps:$4 sm:$0xff]   ;;  %v4126_v51 = vld [vmem:[#allocation5 + $0x4c] ss:$16 sps:$4 sm:$0xff]  }
  0x5b   :  { %3947 = vmatpush3.bf16.msra.mxu0 %v4077_v8  ;;  %389 = vmatprep.subr.bf16.mxu1 %v4111_v37  ;;  %v5003_v40 = vld [vmem:[%s6053_s3 + $0xe4] ss:$16 sps:$4 sm:$0xff]   ;;  %v5008_v42 = vld [vmem:[%s6053_s3 + $0xe0] ss:$16 sps:$4 sm:$0xff]   ;;  %v5061_v59 = vld [vmem:[%s6053_s3 + $0x4c] ss:$16 sps:$4 sm:$0xff]  }
  0x5c   :  { %3948 = vmatprep.subr.bf16.mxu0 %v6066_v2  ;;  %v4129_v53 = vld [vmem:[#allocation5 + $0x6c] ss:$16 sps:$4 sm:$0xff]   ;;  %v5067_v60 = vld [vmem:[%s6053_s3 + $0x48] ss:$16 sps:$4 sm:$0xff]  }
  0x5d   :  { %390 = vmatpush1.bf16.msra.mxu1 %v4114_v39  ;;  %v5073_v61 = vld [vmem:[%s6053_s3 + $0x6c] ss:$16 sps:$4 sm:$0xff]   ;;  %v5079_v62 = vld [vmem:[%s6053_s3 + $0x68] ss:$16 sps:$4 sm:$0xff]   ;;  %v276_v15 = vld [vmem:[%s6054_s4] sm:$0xf] }
  0x5e   :  { %426 = vmatprep.subr.bf16.mxu1 %v4119_v41  ;;  %v5085_v63 = vld [vmem:[%s6053_s3 + $0x8c] ss:$16 sps:$4 sm:$0xff]   ;;  %v5091_v0 = vld [vmem:[%s6053_s3 + $0x88] ss:$16 sps:$4 sm:$0xff]  }
  0x5f   :  { %3949 = vmatpush3.bf16.msra.mxu0 %v4078_v9  ;;  %v5097_v3 = vld [vmem:[%s6053_s3 + $0xac] ss:$16 sps:$4 sm:$0xff]   ;;  %v5103_v4 = vld [vmem:[%s6053_s3 + $0xa8] ss:$16 sps:$4 sm:$0xff]  }
  0x60   :  { %3950 = vmatprep.subr.bf16.mxu0 %v6066_v2  ;;  %v5109_v5 = vld [vmem:[%s6053_s3 + $0xcc] ss:$16 sps:$4 sm:$0xff]   ;;  %v5115_v6 = vld [vmem:[%s6053_s3 + $0xc8] ss:$16 sps:$4 sm:$0xff]  }
  0x61   :  { %v5121_v7 = vld [vmem:[%s6053_s3 + $0xec] ss:$16 sps:$4 sm:$0xff]   ;;  %v5127_v8 = vld [vmem:[%s6053_s3 + $0xe8] ss:$16 sps:$4 sm:$0xff]  }
  0x63   :  { %3951 = vmatpush3.bf16.msra.mxu0 %v4079_v10 }
  0x64   :  { %3952 = vmatprep.subr.bf16.mxu0 %v6066_v2 }
  0x67   :  { %3953 = vmatpush3.bf16.msra.mxu0 %v4080_v13  ;;  %v5151_v13 = vshrl.u32 %v110_v20, 7 }
  0x68   :  { %3954 = vmatprep.subr.bf16.mxu0 %v6066_v2 }
  0x69   :  { %v281_v14 = vsub.s32 0, %v5151_v13  ;;  %v289_v39 = vsub.s32 2, %v5151_v13  ;;  %v6068_v41 = vsub.s32 3, %v5151_v13 }
  0x6b   :  { %3955 = vmatpush3.bf16.msra.mxu0 %v4081_v16  ;;  %v285_v16 = vsub.s32 1, %v5151_v13  ;;  %v282_v19 = vrot.slane %v276_v15, %v281_v14 }
  0x6c   :  { %629 = vmatprep.subr.bf16.mxu0 %v4917_v18 }
  0xcd   :  { %v114_v21 = vpop.permute.xlu0 %113 }
  0xce   :  { %vm118_vm1 = vcmp.eq.s32.totalorder %v114_v21, %v111_v22 }
  0xd1   :  { %v117_v23 = vpop.permute.xlu0 %116 }
  0xd2   :  { %vm119_vm2 = vcmp.eq.s32.totalorder %v117_v23, %v111_v22  ;;  %v286_v22 = vrot.slane %v276_v15, %v285_v16 }
  0xd3   :  { %vm3706_vm3 = vmpackc.low %vm119_vm2, %vm118_vm1 }
  0xd4   :  { %3957 = vmatmul.mubr.msk.bf16.vlgmr.msra.gmra.mrb[0].mxu0 %vm3706_vm3, %v4716_v26 }
  0xd5   :  { %630 = vmatpush1.bf16.msra.mxu0 %v4924_v24  ;;  %661 = vmatprep.mubr.bf16.mxu0 %v4713_v1 }
  0xd6   :  { %631 = vmatprep.subr.bf16.mxu0 %v4929_v25 }
  0xd9   :  { %632 = vmatpush1.bf16.msra.mxu0 %v4935_v27 }
  0xda   :  { %633 = vmatprep.subr.bf16.mxu0 %v4942_v28 }
  0xdd   :  { %634 = vmatpush1.bf16.msra.mxu0 %v4948_v29 }
  0xde   :  { %635 = vmatprep.subr.bf16.mxu0 %v4954_v30 }
  0xe1   :  { %636 = vmatpush1.bf16.msra.mxu0 %v4960_v31 }
  0xe2   :  { %637 = vmatprep.subr.bf16.mxu0 %v4966_v32 }
  0xe5   :  { %638 = vmatpush1.bf16.msra.mxu0 %v4972_v33 }
  0xe6   :  { %639 = vmatprep.subr.bf16.mxu0 %v4978_v34 }
  0xe9   :  { %640 = vmatpush1.bf16.msra.mxu0 %v4984_v35 }
  0xea   :  { %641 = vmatprep.subr.bf16.mxu0 %v4990_v36 }
  0xed   :  { %642 = vmatpush1.bf16.msra.mxu0 %v4997_v38 }
  0xee   :  { %643 = vmatprep.subr.bf16.mxu0 %v5003_v40 }
  0xf1   :  { %644 = vmatpush1.bf16.msra.mxu0 %v5008_v42 }
  0xf2   :  { %741 = vmatprep.subr.bf16.mxu0 %v4917_v18 }
  0xf4   :  { %662 = vmatmul.mubr.bf16.vlgmr.msra.gmra.mrb[4].mxu0 %v4713_v1 }
  0xf5   :  { %742 = vmatpush1.bf16.msra.mxu0 %v4924_v24  ;;  %773 = vmatprep.mubr.bf16.mxu0 %v4713_v1 }
  0xf6   :  { %743 = vmatprep.subr.bf16.mxu0 %v4929_v25 }
  0xf9   :  { %744 = vmatpush1.bf16.msra.mxu0 %v4935_v27 }
  0xfa   :  { %745 = vmatprep.subr.bf16.mxu0 %v4942_v28 }
  0xfd   :  { %746 = vmatpush1.bf16.msra.mxu0 %v4948_v29 }
  0xfe   :  { %747 = vmatprep.subr.bf16.mxu0 %v4954_v30 }
 0x101   :  { %748 = vmatpush1.bf16.msra.mxu0 %v4960_v31 }
 0x102   :  { %749 = vmatprep.subr.bf16.mxu0 %v4966_v32 }
 0x105   :  { %750 = vmatpush1.bf16.msra.mxu0 %v4972_v33 }
 0x106   :  { %751 = vmatprep.subr.bf16.mxu0 %v4978_v34 }
 0x109   :  { %752 = vmatpush1.bf16.msra.mxu0 %v4984_v35 }
 0x10a   :  { %753 = vmatprep.subr.bf16.mxu0 %v4990_v36 }
 0x10d   :  { %754 = vmatpush1.bf16.msra.mxu0 %v4997_v38 }
 0x10e   :  { %755 = vmatprep.subr.bf16.mxu0 %v5003_v40 }
 0x111   :  { %756 = vmatpush1.bf16.msra.mxu0 %v5008_v42 }
 0x112   :  { %871 = vmatprep.subr.bf16.mxu0 %v4917_v18 }
 0x1a7   :  { %v221_v43 = vpop.f32.mrb[0].mxu0 }
 0x1a8   :  { %v3958_v44 = vpop.f32.mrb[1].mxu0 }
 0x1a9   :  { %v224_v45 = vpop.f32.mrb[2].mxu0  ;;  %v290_v44 = vrot.slane %v276_v15, %v289_v39 }
 0x1aa   :  { %v277_v47 = vpack.c.bf16 %v224_v45, %v221_v43  ;;  %v3959_v48 = vpop.f32.mrb[3].mxu0 }
 0x1ac   :  { %3724 = vmatmul.mubr.msk.bf16.vlgmr.msra.gmra.mrb[0].mxu1 %vm379_vm4, %v277_v47 }
 0x1ad   :  { %427 = vmatpush1.bf16.msra.mxu1 %v4117_v46  ;;  %458 = vmatprep.mubr.bf16.mxu1 %v4713_v1  ;;  %v294_v46 = vrot.slane %v276_v15, %v6068_v41 }
 0x1ae   :  { %428 = vmatprep.subr.bf16.mxu1 %v4123_v49 }
 0x1b1   :  { %429 = vmatpush1.bf16.msra.mxu1 %v4121_v50 }
 0x1b2   :  { %430 = vmatprep.subr.bf16.mxu1 %v4126_v51 }
 0x1b5   :  { %431 = vmatpush1.bf16.msra.mxu1 %v4124_v52 }
 0x1b6   :  { %432 = vmatprep.subr.bf16.mxu1 %v4129_v53 }
 0x1b9   :  { %433 = vmatpush1.bf16.msra.mxu1 %v4127_v54 }
 0x1ba   :  { %670 = vmatprep.subr.bf16.mxu1 %v5036_v55 }
 0x1bc   :  { %3725 = vmatmul.mubr.msk.bf16.vlgmr.msra.gmra.mrb[4].mxu1 %vm379_vm4, %v277_v47 }
 0x1bd   :  { %671 = vmatpush1.bf16.msra.mxu1 %v5041_v56  ;;  %702 = vmatprep.mubr.bf16.mxu1 %v4713_v1 }
 0x1be   :  { %672 = vmatprep.subr.bf16.mxu1 %v5047_v57 }
 0x1c1   :  { %673 = vmatpush1.bf16.msra.mxu1 %v5054_v58 }
 0x1c2   :  { %674 = vmatprep.subr.bf16.mxu1 %v5061_v59 }
 0x1c5   :  { %675 = vmatpush1.bf16.msra.mxu1 %v5067_v60 }
 0x1c6   :  { %676 = vmatprep.subr.bf16.mxu1 %v5073_v61 }
 0x1c7   :  { %v663_v9 = vpop.f32.mrb[4].mxu0 }
 0x1c8   :  { %v665_v10 = vpop.f32.mrb[5].mxu0 }
 0x1c9   :  { %677 = vmatpush1.bf16.msra.mxu1 %v5079_v62  ;;  %v667_v11 = vpop.f32.mrb[6].mxu0 }
 0x1ca   :  { %678 = vmatprep.subr.bf16.mxu1 %v5085_v63  ;;  %v668_v12 = vpop.f32.mrb[7].mxu0 }
 0x1cd   :  { %679 = vmatpush1.bf16.msra.mxu1 %v5091_v0 }
 0x1ce   :  { %680 = vmatprep.subr.bf16.mxu1 %v5097_v3 }
 0x1d1   :  { %681 = vmatpush1.bf16.msra.mxu1 %v5103_v4 }
 0x1d2   :  { %682 = vmatprep.subr.bf16.mxu1 %v5109_v5 }
 0x1d5   :  { %683 = vmatpush1.bf16.msra.mxu1 %v5115_v6 }
 0x1d6   :  { %684 = vmatprep.subr.bf16.mxu1 %v5121_v7 }
 0x1d9   :  { %685 = vmatpush1.bf16.msra.mxu1 %v5127_v8 }
 0x1da   :  { %782 = vmatprep.subr.bf16.mxu1 %v5036_v55 }
 0x1dc   :  { %703 = vmatmul.mubr.bf16.vlgmr.msra.gmra.mrb[8].mxu1 %v4713_v1 }
 0x1dd   :  { %783 = vmatpush1.bf16.msra.mxu1 %v5041_v56  ;;  %814 = vmatprep.mubr.bf16.mxu1 %v4713_v1 }
 0x1de   :  { %784 = vmatprep.subr.bf16.mxu1 %v5047_v57 }
 0x1e1   :  { %785 = vmatpush1.bf16.msra.mxu1 %v5054_v58 }
 0x1e2   :  { %786 = vmatprep.subr.bf16.mxu1 %v5061_v59 }
 0x1e5   :  { %787 = vmatpush1.bf16.msra.mxu1 %v5067_v60 }
 0x1e6   :  { %788 = vmatprep.subr.bf16.mxu1 %v5073_v61 }
 0x1e9   :  { %789 = vmatpush1.bf16.msra.mxu1 %v5079_v62 }
 0x1ea   :  { %790 = vmatprep.subr.bf16.mxu1 %v5085_v63 }
 0x1ed   :  { %791 = vmatpush1.bf16.msra.mxu1 %v5091_v0 }
 0x1ee   :  { %792 = vmatprep.subr.bf16.mxu1 %v5097_v3 }
 0x1f1   :  { %793 = vmatpush1.bf16.msra.mxu1 %v5103_v4 }
 0x1f2   :  { %794 = vmatprep.subr.bf16.mxu1 %v5109_v5 }
 0x1f5   :  { %795 = vmatpush1.bf16.msra.mxu1 %v5115_v6 }
 0x1f6   :  { %796 = vmatprep.subr.bf16.mxu1 %v5121_v7 }
 0x1f9   :  { %797 = vmatpush1.bf16.msra.mxu1 %v5127_v8 }
 0x1fa   :  { %912 = vmatprep.subr.bf16.mxu1 %v5036_v55 }
 0x27f   :  { %v417_v17 = vpop.f32.mrb[0].mxu1 }
 0x280   :  { %v419_v21 = vpop.f32.mrb[1].mxu1  ;;  %v5178_v52 = vadd.f32 %v417_v17, %v282_v19 }
 0x281   :  { %v421_v23 = vpop.f32.mrb[2].mxu1  ;;  %v5176_v51 = vadd.f32 %v419_v21, %v286_v22 }
 0x282   :  { %v5162_v26 = vadd.f32 %v421_v23, %v282_v19  ;;  %v423_v20 = vpop.f32.mrb[3].mxu1  ;;  %v711_v54 = vadd.f32 %v663_v9, %v5178_v52 }
 0x283   :  { %v5164_v37 = vadd.f32 %v423_v20, %v286_v22  ;;  %v712_v53 = vadd.f32 %v665_v10, %v5176_v51 }
 0x284   :  { %v3758_v12 = vmul.f32 -1.442695, %v711_v54 }
 0x285   :  { %v3759_v11 = vmul.f32 -1.442695, %v712_v53 }
 0x287   :  { %4282 = vpow2.f32 %v3759_v11 }
 0x288   :  { %4284 = vpow2.f32 %v3758_v12 }
 0x28f   :  { %v460_v43 = vpop.f32.mrb[4].mxu1 }
 0x290   :  { %v462_v45 = vpop.f32.mrb[5].mxu1  ;;  %v5182_v2 = vadd.f32 %v460_v43, %v290_v44 }
 0x291   :  { %v464_v47 = vpop.f32.mrb[6].mxu1  ;;  %v4283_v23 = vpop.eup %4282 }
 0x292   :  { %v5172_v48 = vadd.f32 %v464_v47, %v290_v44  ;;  %v466_v49 = vpop.f32.mrb[7].mxu1  ;;  %v4285_v15 = vpop.eup %4284  ;;  %v725_v20 = vadd.f32 1.0, %v4283_v23 }
 0x293   :  { %v5174_v50 = vadd.f32 %v466_v49, %v294_v46  ;;  %v724_v47 = vadd.f32 1.0, %v4285_v15  ;;  %v5184_v49 = vadd.f32 %v462_v45, %v294_v46 }
 0x294   :  { %4286 = vrcp.f32 %v725_v20 }
 0x295   :  { %4288 = vrcp.f32 %v724_v47 }
 0x29e   :  { %v4287_v54 = vpop.eup %4286 }
 0x29f   :  { %v4289_v11 = vpop.eup %4288  ;;  %v734_v44 = vmul.f32 0.0, %v4287_v54 }
 0x2af   :  { %v704_v21 = vpop.f32.mrb[8].mxu1 }
 0x2b0   :  { %v713_v17 = vadd.f32 %v704_v21, %v5182_v2  ;;  %v706_v19 = vpop.f32.mrb[9].mxu1 }
 0x2b1   :  { %v714_v10 = vadd.f32 %v706_v19, %v5184_v49  ;;  %v708_v9 = vpop.f32.mrb[10].mxu1 }
 0x2b2   :  { %v3760_v22 = vmul.f32 -1.442695, %v713_v17  ;;  %v709_v53 = vpop.f32.mrb[11].mxu1 }
 0x2b3   :  { %4290 = vtanh.f32 %v714_v10 }
 0x2b4   :  { %4292 = vpow2.f32 %v3760_v22 }
 0x2bd   :  { %v4291_v12 = vpop.eup %4290 }
 0x2be   :  { %v4293_v43 = vpop.eup %4292  ;;  %v735_v45 = vmul.f32 %v4291_v12, %v4289_v11 }
 0x2bf   :  { %v726_v46 = vadd.f32 1.0, %v4293_v43 }
 0x2c0   :  { %v5188_v23 = vadd.f32 %v735_v45, %v734_v44 }
 0x2c1   :  { %4294 = vrcp.f32 %v726_v46 }
 0x2c2   :  { %4296 = vtanh.f32 %v5188_v23 }
 0x2cb   :  { %v4295_v15 = vpop.eup %4294 }
 0x2cc   :  { %v4297_v20 = vpop.eup %4296 }
 0x2cd   :  { %v738_v21 = vmul.f32 %v4297_v20, %v4295_v15 }
 0x2cf   :  { %739 = vst [vmem:[#allocation2] sm:$0x3] %v738_v21  ;;  %v740_v47 = vpack.c.bf16 %v738_v21, %v738_v21 }
 0x2d1   :  { %774 = vmatmul.mubr.bf16.vlgmr.msra.gmra.mrb[8].mxu0 %v740_v47  ;;  %815 = vmatmul.mubr.bf16.vlgmr.msra.gmra.mrb[12].mxu1 %v740_v47 }
 0x2d2   :  { %872 = vmatpush1.bf16.msra.mxu0 %v4924_v24  ;;  %913 = vmatpush1.bf16.msra.mxu1 %v5041_v56 }
 0x2d3   :  { %873 = vmatprep.subr.bf16.mxu0 %v4929_v25  ;;  %914 = vmatprep.subr.bf16.mxu1 %v5047_v57 }
 0x2d4   :  { %903 = vmatprep.mubr.bf16.mxu0 %v4713_v1  ;;  %944 = vmatprep.mubr.bf16.mxu1 %v4713_v1 }
 0x2d6   :  { %874 = vmatpush1.bf16.msra.mxu0 %v4935_v27  ;;  %915 = vmatpush1.bf16.msra.mxu1 %v5054_v58 }
 0x2d7   :  { %875 = vmatprep.subr.bf16.mxu0 %v4942_v28  ;;  %916 = vmatprep.subr.bf16.mxu1 %v5061_v59 }
 0x2da   :  { %876 = vmatpush1.bf16.msra.mxu0 %v4948_v29  ;;  %917 = vmatpush1.bf16.msra.mxu1 %v5067_v60 }
 0x2db   :  { %877 = vmatprep.subr.bf16.mxu0 %v4954_v30  ;;  %918 = vmatprep.subr.bf16.mxu1 %v5073_v61 }
 0x2de   :  { %878 = vmatpush1.bf16.msra.mxu0 %v4960_v31  ;;  %919 = vmatpush1.bf16.msra.mxu1 %v5079_v62 }
 0x2df   :  { %879 = vmatprep.subr.bf16.mxu0 %v4966_v32  ;;  %920 = vmatprep.subr.bf16.mxu1 %v5085_v63 }
 0x2e2   :  { %880 = vmatpush1.bf16.msra.mxu0 %v4972_v33  ;;  %921 = vmatpush1.bf16.msra.mxu1 %v5091_v0 }
 0x2e3   :  { %881 = vmatprep.subr.bf16.mxu0 %v4978_v34  ;;  %922 = vmatprep.subr.bf16.mxu1 %v5097_v3 }
 0x2e6   :  { %882 = vmatpush1.bf16.msra.mxu0 %v4984_v35  ;;  %923 = vmatpush1.bf16.msra.mxu1 %v5103_v4 }
 0x2e7   :  { %883 = vmatprep.subr.bf16.mxu0 %v4990_v36  ;;  %924 = vmatprep.subr.bf16.mxu1 %v5109_v5 }
 0x2ea   :  { %884 = vmatpush1.bf16.msra.mxu0 %v4997_v38  ;;  %925 = vmatpush1.bf16.msra.mxu1 %v5115_v6 }
 0x2eb   :  { %885 = vmatprep.subr.bf16.mxu0 %v5003_v40  ;;  %926 = vmatprep.subr.bf16.mxu1 %v5121_v7 }
 0x2ee   :  { %886 = vmatpush1.bf16.msra.mxu0 %v5008_v42  ;;  %927 = vmatpush1.bf16.msra.mxu1 %v5127_v8 }
 0x2ef   :  { %1001 = vmatprep.subr.bf16.mxu0 %v4917_v18  ;;  %1042 = vmatprep.subr.bf16.mxu1 %v5036_v55 }
 0x3a4   :  { %v775_v17 = vpop.f32.mrb[8].mxu0  ;;  %v816_v19 = vpop.f32.mrb[12].mxu1 }
 0x3a5   :  { %v827_v10 = vrot.slane %v775_v17, 6  ;;  %v777_v9 = vpop.f32.mrb[9].mxu0  ;;  %v818_v22 = vpop.f32.mrb[13].mxu1  ;;  %v829_v20 = vrot.slane %v816_v19, 6  ;;  %v859_v19 = vrot.slane %v5188_v23, 6 }
 0x3a6   :  { %v828_v53 = vrot.slane %v777_v9, 6  ;;  %v779_v54 = vpop.f32.mrb[10].mxu0  ;;  %v820_v11 = vpop.f32.mrb[14].mxu1  ;;  %v830_v21 = vrot.slane %v818_v22, 6 }
 0x3a7   :  { %v835_v12 = vadd.f32 %v827_v10, %v5178_v52  ;;  %v780_v43 = vpop.f32.mrb[11].mxu0  ;;  %v821_v44 = vpop.f32.mrb[15].mxu1  ;;  %v837_v47 = vadd.f32 %v829_v20, %v5182_v2 }
 0x3a8   :  { %v836_v45 = vadd.f32 %v828_v53, %v5176_v51  ;;  %v838_v17 = vadd.f32 %v830_v21, %v5184_v49 }
 0x3a9   :  { %v3761_v46 = vmul.f32 -1.442695, %v835_v12  ;;  %v3763_v41 = vmul.f32 -1.442695, %v837_v47 }
 0x3aa   :  { %v3762_v15 = vmul.f32 -1.442695, %v836_v45 }
 0x3ab   :  { %4298 = vpow2.f32 %v3761_v46 }
 0x3ac   :  { %4300 = vpow2.f32 %v3762_v15 }
 0x3ad   :  { %4302 = vtanh.f32 %v838_v17 }
 0x3ae   :  { %4304 = vpow2.f32 %v3763_v41 }
 0x3b5   :  { %v4299_v9 = vpop.eup %4298 }
 0x3b6   :  { %v848_v54 = vadd.f32 1.0, %v4299_v9  ;;  %v4301_v11 = vpop.eup %4300 }
 0x3b7   :  { %v849_v10 = vadd.f32 1.0, %v4301_v11  ;;  %v4303_v53 = vpop.eup %4302 }
 0x3b8   :  { %4306 = vrcp.f32 %v848_v54  ;;  %v4305_v12 = vpop.eup %4304 }
 0x3b9   :  { %4308 = vrcp.f32 %v849_v10  ;;  %v850_v45 = vadd.f32 1.0, %v4305_v12 }
 0x3bb   :  { %4310 = vrcp.f32 %v850_v45 }
 0x3c2   :  { %v4307_v43 = vpop.eup %4306 }
 0x3c3   :  { %v862_v44 = vmul.f32 %v4307_v43, %v4303_v53  ;;  %v4309_v22 = vpop.eup %4308 }
 0x3c4   :  { %v861_v46 = vmul.f32 %v4309_v22, %v859_v19 }
 0x3c5   :  { %v4311_v20 = vpop.eup %4310 }
 0x3c6   :  { %v5230_v15 = vadd.f32 %v862_v44, %v861_v46 }
 0x3c8   :  { %4312 = vtanh.f32 %v5230_v15 }
 0x3d2   :  { %v4313_v21 = vpop.eup %4312 }
 0x3d3   :  { %v865_v41 = vmul.f32 %v4313_v21, %v4311_v20 }
 0x3d5   :  { %866 = vst [vmem:[#allocation2] sm:$0xc] %v865_v41  ;;  %v867_v47 = vpack.c.bf16 %v865_v41, %v865_v41 }
 0x3d7   :  { %v869_v17 = vrot.slane %v867_v47, 1 }
 0x3d9   :  { %904 = vmatmul.mubr.bf16.vlgmr.msra.gmra.mrb[12].mxu0 %v869_v17  ;;  %945 = vmatmul.mubr.bf16.vlgmr.msra.gmra.mrb[16].mxu1 %v869_v17 }
 0x3da   :  { %1002 = vmatpush1.bf16.msra.mxu0 %v4924_v24  ;;  %1043 = vmatpush1.bf16.msra.mxu1 %v5041_v56 }
 0x3db   :  { %1003 = vmatprep.subr.bf16.mxu0 %v4929_v25  ;;  %1044 = vmatprep.subr.bf16.mxu1 %v5047_v57 }
 0x3dc   :  { %1033 = vmatprep.mubr.bf16.mxu0 %v4713_v1  ;;  %1074 = vmatprep.mubr.bf16.mxu1 %v4713_v1 }
 0x3de   :  { %1004 = vmatpush1.bf16.msra.mxu0 %v4935_v27  ;;  %1045 = vmatpush1.bf16.msra.mxu1 %v5054_v58 }
 0x3df   :  { %1005 = vmatprep.subr.bf16.mxu0 %v4942_v28  ;;  %1046 = vmatprep.subr.bf16.mxu1 %v5061_v59 }
 0x3e2   :  { %1006 = vmatpush1.bf16.msra.mxu0 %v4948_v29  ;;  %1047 = vmatpush1.bf16.msra.mxu1 %v5067_v60 }
 0x3e3   :  { %1007 = vmatprep.subr.bf16.mxu0 %v4954_v30  ;;  %1048 = vmatprep.subr.bf16.mxu1 %v5073_v61 }
 0x3e6   :  { %1008 = vmatpush1.bf16.msra.mxu0 %v4960_v31  ;;  %1049 = vmatpush1.bf16.msra.mxu1 %v5079_v62 }
 0x3e7   :  { %1009 = vmatprep.subr.bf16.mxu0 %v4966_v32  ;;  %1050 = vmatprep.subr.bf16.mxu1 %v5085_v63 }
 0x3ea   :  { %1010 = vmatpush1.bf16.msra.mxu0 %v4972_v33  ;;  %1051 = vmatpush1.bf16.msra.mxu1 %v5091_v0 }
 0x3eb   :  { %1011 = vmatprep.subr.bf16.mxu0 %v4978_v34  ;;  %1052 = vmatprep.subr.bf16.mxu1 %v5097_v3 }
 0x3ee   :  { %1012 = vmatpush1.bf16.msra.mxu0 %v4984_v35  ;;  %1053 = vmatpush1.bf16.msra.mxu1 %v5103_v4 }
 0x3ef   :  { %1013 = vmatprep.subr.bf16.mxu0 %v4990_v36  ;;  %1054 = vmatprep.subr.bf16.mxu1 %v5109_v5 }
 0x3f2   :  { %1014 = vmatpush1.bf16.msra.mxu0 %v4997_v38  ;;  %1055 = vmatpush1.bf16.msra.mxu1 %v5115_v6 }
 0x3f3   :  { %1015 = vmatprep.subr.bf16.mxu0 %v5003_v40  ;;  %1056 = vmatprep.subr.bf16.mxu1 %v5121_v7 }
 0x3f6   :  { %1016 = vmatpush1.bf16.msra.mxu0 %v5008_v42  ;;  %1057 = vmatpush1.bf16.msra.mxu1 %v5127_v8 }
 0x3f7   :  { %1131 = vmatprep.subr.bf16.mxu0 %v4917_v18  ;;  %1172 = vmatprep.subr.bf16.mxu1 %v5036_v55 }
 0x4ac   :  { %v905_v23 = vpop.f32.mrb[12].mxu0  ;;  %v946_v9 = vpop.f32.mrb[16].mxu1 }
 0x4ad   :  { %v957_v54 = vrot.slane %v905_v23, 4  ;;  %v907_v11 = vpop.f32.mrb[13].mxu0  ;;  %v948_v10 = vpop.f32.mrb[17].mxu1  ;;  %v959_v18 = vrot.slane %v946_v9, 4  ;;  %v989_v9 = vrot.slane %v5230_v15, 6 }
 0x4ae   :  { %v958_v53 = vrot.slane %v907_v11, 4  ;;  %v909_v12 = vpop.f32.mrb[14].mxu0  ;;  %v950_v43 = vpop.f32.mrb[18].mxu1  ;;  %v960_v21 = vrot.slane %v948_v10, 4  ;;  %v5310_v15 = vld [vmem:[%s6053_s3 + $0x4] ss:$16 sps:$4 sm:$0xff]  }
 0x4af   :  { %v965_v19 = vadd.f32 %v957_v54, %v5178_v52  ;;  %v910_v44 = vpop.f32.mrb[15].mxu0  ;;  %v951_v22 = vpop.f32.mrb[19].mxu1  ;;  %v967_v41 = vadd.f32 %v959_v18, %v5182_v2 }
 0x4b0   :  { %v966_v45 = vadd.f32 %v958_v53, %v5176_v51  ;;  %v968_v47 = vadd.f32 %v960_v21, %v5184_v49 }
 0x4b1   :  { %v3764_v46 = vmul.f32 -1.442695, %v965_v19  ;;  %v3766_v17 = vmul.f32 -1.442695, %v967_v41 }
 0x4b2   :  { %v3765_v20 = vmul.f32 -1.442695, %v966_v45 }
 0x4b3   :  { %4314 = vpow2.f32 %v3764_v46 }
 0x4b4   :  { %4316 = vpow2.f32 %v3765_v20 }
 0x4b5   :  { %4318 = vtanh.f32 %v968_v47 }
 0x4b6   :  { %4320 = vpow2.f32 %v3766_v17 }
 0x4bd   :  { %v4315_v23 = vpop.eup %4314 }
 0x4be   :  { %v978_v11 = vadd.f32 1.0, %v4315_v23  ;;  %v4317_v12 = vpop.eup %4316 }
 0x4bf   :  { %v979_v54 = vadd.f32 1.0, %v4317_v12  ;;  %v4319_v53 = vpop.eup %4318 }
 0x4c0   :  { %4322 = vrcp.f32 %v978_v11  ;;  %v4321_v43 = vpop.eup %4320 }
 0x4c1   :  { %4324 = vrcp.f32 %v979_v54  ;;  %v980_v22 = vadd.f32 1.0, %v4321_v43 }
 0x4c3   :  { %4326 = vrcp.f32 %v980_v22 }
 0x4ca   :  { %v4323_v19 = vpop.eup %4322 }
 0x4cb   :  { %v992_v44 = vmul.f32 %v4323_v19, %v4319_v53  ;;  %v4325_v10 = vpop.eup %4324 }
 0x4cc   :  { %v991_v45 = vmul.f32 %v4325_v10, %v989_v9 }
 0x4cd   :  { %v4327_v20 = vpop.eup %4326 }
 0x4ce   :  { %v5272_v46 = vadd.f32 %v992_v44, %v991_v45 }
 0x4d0   :  { %4328 = vtanh.f32 %v5272_v46 }
 0x4da   :  { %v4329_v18 = vpop.eup %4328 }
 0x4db   :  { %v995_v21 = vmul.f32 %v4329_v18, %v4327_v20 }
 0x4dd   :  { %996 = vst [vmem:[#allocation2] sm:$0x30] %v995_v21  ;;  %v997_v41 = vpack.c.bf16 %v995_v21, %v995_v21 }
 0x4df   :  { %v999_v47 = vrot.slane %v997_v41, 2 }
 0x4e1   :  { %1034 = vmatmul.mubr.bf16.vlgmr.msra.gmra.mrb[16].mxu0 %v999_v47  ;;  %1075 = vmatmul.mubr.bf16.vlgmr.msra.gmra.mrb[20].mxu1 %v999_v47 }
 0x4e2   :  { %1132 = vmatpush1.bf16.msra.mxu0 %v4924_v24  ;;  %1173 = vmatpush1.bf16.msra.mxu1 %v5041_v56 }
 0x4e3   :  { %1133 = vmatprep.subr.bf16.mxu0 %v4929_v25  ;;  %1174 = vmatprep.subr.bf16.mxu1 %v5047_v57 }
 0x4e4   :  { %1163 = vmatprep.mubr.bf16.mxu0 %v4713_v1  ;;  %1204 = vmatprep.mubr.bf16.mxu1 %v4713_v1 }
 0x4e6   :  { %1134 = vmatpush1.bf16.msra.mxu0 %v4935_v27  ;;  %1175 = vmatpush1.bf16.msra.mxu1 %v5054_v58 }
 0x4e7   :  { %1135 = vmatprep.subr.bf16.mxu0 %v4942_v28  ;;  %1176 = vmatprep.subr.bf16.mxu1 %v5061_v59 }
 0x4ea   :  { %1136 = vmatpush1.bf16.msra.mxu0 %v4948_v29  ;;  %1177 = vmatpush1.bf16.msra.mxu1 %v5067_v60 }
 0x4eb   :  { %1137 = vmatprep.subr.bf16.mxu0 %v4954_v30  ;;  %1178 = vmatprep.subr.bf16.mxu1 %v5073_v61 }
 0x4ee   :  { %1138 = vmatpush1.bf16.msra.mxu0 %v4960_v31  ;;  %1179 = vmatpush1.bf16.msra.mxu1 %v5079_v62 }
 0x4ef   :  { %1139 = vmatprep.subr.bf16.mxu0 %v4966_v32  ;;  %1180 = vmatprep.subr.bf16.mxu1 %v5085_v63 }
 0x4f2   :  { %1140 = vmatpush1.bf16.msra.mxu0 %v4972_v33  ;;  %1181 = vmatpush1.bf16.msra.mxu1 %v5091_v0 }
 0x4f3   :  { %1141 = vmatprep.subr.bf16.mxu0 %v4978_v34  ;;  %1182 = vmatprep.subr.bf16.mxu1 %v5097_v3 }
 0x4f6   :  { %1142 = vmatpush1.bf16.msra.mxu0 %v4984_v35  ;;  %1183 = vmatpush1.bf16.msra.mxu1 %v5103_v4 }
 0x4f7   :  { %1143 = vmatprep.subr.bf16.mxu0 %v4990_v36  ;;  %1184 = vmatprep.subr.bf16.mxu1 %v5109_v5 }
 0x4fa   :  { %1144 = vmatpush1.bf16.msra.mxu0 %v4997_v38  ;;  %1185 = vmatpush1.bf16.msra.mxu1 %v5115_v6 }
 0x4fb   :  { %1145 = vmatprep.subr.bf16.mxu0 %v5003_v40  ;;  %1186 = vmatprep.subr.bf16.mxu1 %v5121_v7 }
 0x4fe   :  { %1146 = vmatpush1.bf16.msra.mxu0 %v5008_v42  ;;  %1187 = vmatpush1.bf16.msra.mxu1 %v5127_v8 }
 0x4ff   :  { %1246 = vmatprep.subr.bf16.mxu0 %v5310_v15  ;;  %1287 = vmatprep.subr.bf16.mxu1 %v5036_v55 }
 0x5b4   :  { %v1035_v17 = vpop.f32.mrb[16].mxu0  ;;  %v1076_v23 = vpop.f32.mrb[20].mxu1 }
 0x5b5   :  { %v1087_v11 = vrot.slane %v1035_v17, 2  ;;  %v1037_v12 = vpop.f32.mrb[17].mxu0  ;;  %v1078_v54 = vpop.f32.mrb[21].mxu1  ;;  %v1089_v18 = vrot.slane %v1076_v23, 2  ;;  %v1119_v23 = vrot.slane %v5272_v46, 6 }
 0x5b6   :  { %v1088_v53 = vrot.slane %v1037_v12, 2  ;;  %v1039_v43 = vpop.f32.mrb[18].mxu0  ;;  %v1080_v19 = vpop.f32.mrb[22].mxu1  ;;  %v1090_v21 = vrot.slane %v1078_v54, 2 }
 0x5b7   :  { %v1095_v9 = vadd.f32 %v1087_v11, %v5178_v52  ;;  %v1040_v44 = vpop.f32.mrb[19].mxu0  ;;  %v1081_v10 = vpop.f32.mrb[23].mxu1  ;;  %v1097_v41 = vadd.f32 %v1089_v18, %v5182_v2 }
 0x5b8   :  { %v1096_v22 = vadd.f32 %v1088_v53, %v5176_v51  ;;  %v1098_v47 = vadd.f32 %v1090_v21, %v5184_v49 }
 0x5b9   :  { %v3767_v45 = vmul.f32 -1.442695, %v1095_v9  ;;  %v3769_v17 = vmul.f32 -1.442695, %v1097_v41 }
 0x5ba   :  { %v3768_v20 = vmul.f32 -1.442695, %v1096_v22 }
 0x5bb   :  { %4330 = vpow2.f32 %v3767_v45 }
 0x5bc   :  { %4332 = vpow2.f32 %v3768_v20 }
 0x5bd   :  { %4334 = vtanh.f32 %v1098_v47 }
 0x5be   :  { %4336 = vpow2.f32 %v3769_v17 }
 0x5c5   :  { %v4331_v12 = vpop.eup %4330 }
 0x5c6   :  { %v1108_v43 = vadd.f32 1.0, %v4331_v12  ;;  %v4333_v19 = vpop.eup %4332 }
 0x5c7   :  { %v1109_v52 = vadd.f32 1.0, %v4333_v19  ;;  %v4335_v51 = vpop.eup %4334 }
 0x5c8   :  { %4338 = vrcp.f32 %v1108_v43  ;;  %v4337_v11 = vpop.eup %4336 }
 0x5c9   :  { %4340 = vrcp.f32 %v1109_v52  ;;  %v1110_v44 = vadd.f32 1.0, %v4337_v11 }
 0x5cb   :  { %4342 = vrcp.f32 %v1110_v44 }
 0x5d2   :  { %v4339_v53 = vpop.eup %4338 }
 0x5d3   :  { %v1122_v9 = vmul.f32 %v4339_v53, %v4335_v51  ;;  %v4341_v54 = vpop.eup %4340 }
 0x5d4   :  { %v1121_v2 = vmul.f32 %v4341_v54, %v1119_v23 }
 0x5d5   :  { %v4343_v49 = vpop.eup %4342 }
 0x5d6   :  { %v5319_v10 = vadd.f32 %v1122_v9, %v1121_v2 }
 0x5d8   :  { %4344 = vtanh.f32 %v5319_v10  ;;  %v1237_v19 = vrot.slane %v5319_v10, 6  ;;  %v5367_v10 = vld [vmem:[%s6053_s3] ss:$16 sps:$4 sm:$0xff]  }
 0x5e2   :  { %v4345_v22 = vpop.eup %4344 }
 0x5e3   :  { %v1125_v45 = vmul.f32 %v4345_v22, %v4343_v49  ;;  %v5374_v49 = vld [vmem:[%s6053_s3 + $0x24] ss:$16 sps:$4 sm:$0xff]   ;;  %v5383_v22 = vld [vmem:[%s6053_s3 + $0x20] ss:$16 sps:$4 sm:$0xff]  }
 0x5e5   :  { %1126 = vst [vmem:[#allocation2] sm:$0xc0] %v1125_v45  ;;  %v1127_v20 = vpack.c.bf16 %v1125_v45, %v1125_v45 }
 0x5e7   :  { %v1129_v18 = vrot.slane %v1127_v20, 3 }
 0x5e9   :  { %1164 = vmatmul.mubr.bf16.vlgmr.msra.gmra.mrb[20].mxu0 %v1129_v18  ;;  %1205 = vmatmul.mubr.bf16.vlgmr.msra.gmra.mrb[24].mxu1 %v1129_v18 }
 0x5ea   :  { %1247 = vmatpush1.bf16.msra.mxu0 %v4924_v24  ;;  %1288 = vmatpush1.bf16.msra.mxu1 %v5041_v56 }
 0x5eb   :  { %1248 = vmatprep.subr.bf16.mxu0 %v4929_v25  ;;  %1289 = vmatprep.subr.bf16.mxu1 %v5047_v57 }
 0x5ec   :  { %1278 = vmatprep.mubr.bf16.mxu0 %v4713_v1  ;;  %1319 = vmatprep.mubr.bf16.mxu1 %v4713_v1 }
 0x5ee   :  { %1249 = vmatpush1.bf16.msra.mxu0 %v4935_v27  ;;  %1290 = vmatpush1.bf16.msra.mxu1 %v5054_v58 }
 0x5ef   :  { %1250 = vmatprep.subr.bf16.mxu0 %v4942_v28  ;;  %1291 = vmatprep.subr.bf16.mxu1 %v5061_v59 }
 0x5f2   :  { %1251 = vmatpush1.bf16.msra.mxu0 %v4948_v29  ;;  %1292 = vmatpush1.bf16.msra.mxu1 %v5067_v60 }
 0x5f3   :  { %1252 = vmatprep.subr.bf16.mxu0 %v4954_v30  ;;  %1293 = vmatprep.subr.bf16.mxu1 %v5073_v61 }
 0x5f6   :  { %1253 = vmatpush1.bf16.msra.mxu0 %v4960_v31  ;;  %1294 = vmatpush1.bf16.msra.mxu1 %v5079_v62 }
 0x5f7   :  { %1254 = vmatprep.subr.bf16.mxu0 %v4966_v32  ;;  %1295 = vmatprep.subr.bf16.mxu1 %v5085_v63 }
 0x5fa   :  { %1255 = vmatpush1.bf16.msra.mxu0 %v4972_v33  ;;  %1296 = vmatpush1.bf16.msra.mxu1 %v5091_v0 }
 0x5fb   :  { %1256 = vmatprep.subr.bf16.mxu0 %v4978_v34  ;;  %1297 = vmatprep.subr.bf16.mxu1 %v5097_v3 }
 0x5fe   :  { %1257 = vmatpush1.bf16.msra.mxu0 %v4984_v35  ;;  %1298 = vmatpush1.bf16.msra.mxu1 %v5103_v4 }
 0x5ff   :  { %1258 = vmatprep.subr.bf16.mxu0 %v4990_v36  ;;  %1299 = vmatprep.subr.bf16.mxu1 %v5109_v5 }
 0x602   :  { %1259 = vmatpush1.bf16.msra.mxu0 %v4997_v38  ;;  %1300 = vmatpush1.bf16.msra.mxu1 %v5115_v6 }
 0x603   :  { %1260 = vmatprep.subr.bf16.mxu0 %v5003_v40  ;;  %1301 = vmatprep.subr.bf16.mxu1 %v5121_v7 }
 0x606   :  { %1261 = vmatpush1.bf16.msra.mxu0 %v5008_v42  ;;  %1302 = vmatpush1.bf16.msra.mxu1 %v5127_v8 }
 0x607   :  { %1376 = vmatprep.subr.bf16.mxu0 %v5310_v15  ;;  %1417 = vmatprep.subr.bf16.mxu1 %v5036_v55 }
 0x6bc   :  { %v1165_v24 = vpop.f32.mrb[20].mxu0  ;;  %v1206_v25 = vpop.f32.mrb[24].mxu1 }
 0x6bd   :  { %v1213_v27 = vadd.f32 %v1165_v24, %v5162_v26  ;;  %v1167_v28 = vpop.f32.mrb[21].mxu0  ;;  %v1208_v29 = vpop.f32.mrb[25].mxu1  ;;  %v1215_v38 = vadd.f32 %v1206_v25, %v5172_v48 }
 0x6be   :  { %v1214_v30 = vadd.f32 %v1167_v28, %v5164_v37  ;;  %v1169_v31 = vpop.f32.mrb[22].mxu0  ;;  %v1210_v32 = vpop.f32.mrb[26].mxu1  ;;  %v1216_v40 = vadd.f32 %v1208_v29, %v5174_v50 }
 0x6bf   :  { %v3770_v33 = vmul.f32 -1.442695, %v1213_v27  ;;  %v1170_v34 = vpop.f32.mrb[23].mxu0  ;;  %v1211_v35 = vpop.f32.mrb[27].mxu1  ;;  %v3772_v42 = vmul.f32 -1.442695, %v1215_v38 }
 0x6c0   :  { %v3771_v36 = vmul.f32 -1.442695, %v1214_v30 }
 0x6c1   :  { %4346 = vpow2.f32 %v3770_v33 }
 0x6c2   :  { %4348 = vpow2.f32 %v3771_v36 }
 0x6c3   :  { %4350 = vtanh.f32 %v1216_v40 }
 0x6c4   :  { %4352 = vpow2.f32 %v3772_v42 }
 0x6cb   :  { %v4347_v46 = vpop.eup %4346 }
 0x6cc   :  { %v1226_v21 = vadd.f32 1.0, %v4347_v46  ;;  %v4349_v41 = vpop.eup %4348 }
 0x6cd   :  { %v1227_v47 = vadd.f32 1.0, %v4349_v41  ;;  %v4351_v17 = vpop.eup %4350 }
 0x6ce   :  { %4354 = vrcp.f32 %v1226_v21  ;;  %v4353_v12 = vpop.eup %4352 }
 0x6cf   :  { %4356 = vrcp.f32 %v1227_v47  ;;  %v1228_v11 = vadd.f32 1.0, %v4353_v12 }
 0x6d1   :  { %4358 = vrcp.f32 %v1228_v11 }
 0x6d8   :  { %v4355_v43 = vpop.eup %4354 }
 0x6d9   :  { %v1240_v52 = vmul.f32 %v4355_v43, %v4351_v17  ;;  %v4357_v51 = vpop.eup %4356 }
 0x6da   :  { %v1239_v53 = vmul.f32 %v4357_v51, %v1237_v19 }
 0x6db   :  { %v4359_v9 = vpop.eup %4358 }
 0x6dc   :  { %v5361_v23 = vadd.f32 %v1240_v52, %v1239_v53 }
 0x6de   :  { %4360 = vtanh.f32 %v5361_v23  ;;  %v1364_v47 = vrot.slane %v5361_v23, 6  ;;  %v4564_v23 = vld [vmem:[%s6053_s3 + $0x8] ss:$16 sps:$4 sm:$0xff]  }
 0x6e8   :  { %v4361_v54 = vpop.eup %4360 }
 0x6e9   :  { %v1243_v44 = vmul.f32 %v4361_v54, %v4359_v9 }
 0x6eb   :  { %1244 = vst [vmem:[#allocation2 + $0x8] sm:$0x3] %v1243_v44  ;;  %v1245_v2 = vpack.c.bf16 %v1243_v44, %v1243_v44  ;;  %v4565_v44 = vld [vmem:[%s6053_s3 + $0x2c] ss:$16 sps:$4 sm:$0xff]  }
 0x6ed   :  { %1279 = vmatmul.mubr.bf16.vlgmr.msra.gmra.mrb[24].mxu0 %v1245_v2  ;;  %1320 = vmatmul.mubr.bf16.vlgmr.msra.gmra.mrb[28].mxu1 %v1245_v2  ;;  %v4566_v2 = vld [vmem:[%s6053_s3 + $0x28] ss:$16 sps:$4 sm:$0xff]  }
 0x6ee   :  { %1377 = vmatpush1.bf16.msra.mxu0 %v5367_v10  ;;  %1418 = vmatpush1.bf16.msra.mxu1 %v5041_v56  ;;  %v5390_v56 = vld [vmem:[%s6053_s3 + $0x44] ss:$16 sps:$4 sm:$0xff]  }
 0x6ef   :  { %1378 = vmatprep.subr.bf16.mxu0 %v5374_v49  ;;  %1419 = vmatprep.subr.bf16.mxu1 %v5047_v57  ;;  %v5397_v57 = vld [vmem:[%s6053_s3 + $0x40] ss:$16 sps:$4 sm:$0xff]  }
 0x6f0   :  { %1408 = vmatprep.mubr.bf16.mxu0 %v4713_v1  ;;  %1449 = vmatprep.mubr.bf16.mxu1 %v4713_v1 }
 0x6f2   :  { %1379 = vmatpush1.bf16.msra.mxu0 %v5383_v22  ;;  %1420 = vmatpush1.bf16.msra.mxu1 %v5054_v58  ;;  %v5404_v58 = vld [vmem:[%s6053_s3 + $0x64] ss:$16 sps:$4 sm:$0xff]  }
 0x6f3   :  { %1380 = vmatprep.subr.bf16.mxu0 %v5390_v56  ;;  %1421 = vmatprep.subr.bf16.mxu1 %v5061_v59  ;;  %v5411_v59 = vld [vmem:[%s6053_s3 + $0x60] ss:$16 sps:$4 sm:$0xff]  }
 0x6f6   :  { %1381 = vmatpush1.bf16.msra.mxu0 %v5397_v57  ;;  %1422 = vmatpush1.bf16.msra.mxu1 %v5067_v60  ;;  %v5418_v60 = vld [vmem:[%s6053_s3 + $0x84] ss:$16 sps:$4 sm:$0xff]  }
 0x6f7   :  { %1382 = vmatprep.subr.bf16.mxu0 %v5404_v58  ;;  %1423 = vmatprep.subr.bf16.mxu1 %v5073_v61  ;;  %v5425_v61 = vld [vmem:[%s6053_s3 + $0x80] ss:$16 sps:$4 sm:$0xff]  }
 0x6fa   :  { %1383 = vmatpush1.bf16.msra.mxu0 %v5411_v59  ;;  %1424 = vmatpush1.bf16.msra.mxu1 %v5079_v62  ;;  %v5432_v62 = vld [vmem:[%s6053_s3 + $0xa4] ss:$16 sps:$4 sm:$0xff]  }
 0x6fb   :  { %1384 = vmatprep.subr.bf16.mxu0 %v5418_v60  ;;  %1425 = vmatprep.subr.bf16.mxu1 %v5085_v63  ;;  %v5439_v63 = vld [vmem:[%s6053_s3 + $0xa0] ss:$16 sps:$4 sm:$0xff]  }
 0x6fe   :  { %1385 = vmatpush1.bf16.msra.mxu0 %v5425_v61  ;;  %1426 = vmatpush1.bf16.msra.mxu1 %v5091_v0  ;;  %v5446_v0 = vld [vmem:[%s6053_s3 + $0xc4] ss:$16 sps:$4 sm:$0xff]  }
 0x6ff   :  { %1386 = vmatprep.subr.bf16.mxu0 %v5432_v62  ;;  %1427 = vmatprep.subr.bf16.mxu1 %v5097_v3  ;;  %v5453_v3 = vld [vmem:[%s6053_s3 + $0xc0] ss:$16 sps:$4 sm:$0xff]  }
 0x702   :  { %1387 = vmatpush1.bf16.msra.mxu0 %v5439_v63  ;;  %1428 = vmatpush1.bf16.msra.mxu1 %v5103_v4  ;;  %v5460_v4 = vld [vmem:[%s6053_s3 + $0xe4] ss:$16 sps:$4 sm:$0xff]  }
 0x703   :  { %1388 = vmatprep.subr.bf16.mxu0 %v5446_v0  ;;  %1429 = vmatprep.subr.bf16.mxu1 %v5109_v5  ;;  %v5467_v5 = vld [vmem:[%s6053_s3 + $0xe0] ss:$16 sps:$4 sm:$0xff]  }
 0x706   :  { %1389 = vmatpush1.bf16.msra.mxu0 %v5453_v3  ;;  %1430 = vmatpush1.bf16.msra.mxu1 %v5115_v6 }
 0x707   :  { %1390 = vmatprep.subr.bf16.mxu0 %v5460_v4  ;;  %1431 = vmatprep.subr.bf16.mxu1 %v5121_v7 }
 0x70a   :  { %1391 = vmatpush1.bf16.msra.mxu0 %v5467_v5  ;;  %1432 = vmatpush1.bf16.msra.mxu1 %v5127_v8 }
 0x70b   :  { %1506 = vmatprep.subr.bf16.mxu0 %v5310_v15  ;;  %1547 = vmatprep.subr.bf16.mxu1 %v5036_v55 }
 0x7c0   :  { %v1280_v6 = vpop.f32.mrb[24].mxu0  ;;  %v1321_v45 = vpop.f32.mrb[28].mxu1 }
 0x7c1   :  { %v1332_v20 = vrot.slane %v1280_v6, 6  ;;  %v1282_v18 = vpop.f32.mrb[25].mxu0  ;;  %v1323_v24 = vpop.f32.mrb[29].mxu1  ;;  %v1334_v15 = vrot.slane %v1321_v45, 6 }
 0x7c2   :  { %v1333_v25 = vrot.slane %v1282_v18, 6  ;;  %v1284_v7 = vpop.f32.mrb[26].mxu0  ;;  %v1325_v27 = vpop.f32.mrb[30].mxu1  ;;  %v1335_v55 = vrot.slane %v1323_v24, 6 }
 0x7c3   :  { %v1340_v28 = vadd.f32 %v1332_v20, %v5162_v26  ;;  %v1285_v29 = vpop.f32.mrb[27].mxu0  ;;  %v1326_v30 = vpop.f32.mrb[31].mxu1  ;;  %v1342_v33 = vadd.f32 %v1334_v15, %v5172_v48 }
 0x7c4   :  { %v1341_v31 = vadd.f32 %v1333_v25, %v5164_v37  ;;  %v1343_v34 = vadd.f32 %v1335_v55, %v5174_v50 }
 0x7c5   :  { %v3773_v32 = vmul.f32 -1.442695, %v1340_v28  ;;  %v3775_v35 = vmul.f32 -1.442695, %v1342_v33 }
 0x7c6   :  { %v3774_v8 = vmul.f32 -1.442695, %v1341_v31 }
 0x7c7   :  { %4362 = vpow2.f32 %v3773_v32 }
 0x7c8   :  { %4364 = vpow2.f32 %v3774_v8 }
 0x7c9   :  { %4366 = vtanh.f32 %v1343_v34 }
 0x7ca   :  { %4368 = vpow2.f32 %v3775_v35 }
 0x7d1   :  { %v4363_v36 = vpop.eup %4362 }
 0x7d2   :  { %v1353_v38 = vadd.f32 1.0, %v4363_v36  ;;  %v4365_v40 = vpop.eup %4364 }
 0x7d3   :  { %v1354_v42 = vadd.f32 1.0, %v4365_v40  ;;  %v4367_v46 = vpop.eup %4366 }
 0x7d4   :  { %4370 = vrcp.f32 %v1353_v38  ;;  %v4369_v21 = vpop.eup %4368 }
 0x7d5   :  { %4372 = vrcp.f32 %v1354_v42  ;;  %v1355_v43 = vadd.f32 1.0, %v4369_v21 }
 0x7d7   :  { %4374 = vrcp.f32 %v1355_v43 }
 0x7de   :  { %v4371_v41 = vpop.eup %4370 }
 0x7df   :  { %v1367_v17 = vmul.f32 %v4371_v41, %v4367_v46  ;;  %v4373_v12 = vpop.eup %4372 }
 0x7e0   :  { %v1366_v19 = vmul.f32 %v4373_v12, %v1364_v47 }
 0x7e1   :  { %v4375_v51 = vpop.eup %4374 }
 0x7e2   :  { %v5478_v52 = vadd.f32 %v1367_v17, %v1366_v19 }
 0x7e4   :  { %4376 = vtanh.f32 %v5478_v52  ;;  %v1494_v46 = vrot.slane %v5478_v52, 6  ;;  %v4156_v52 = vld [vmem:[#allocation7 + $0x4] ss:$16 sps:$4 sm:$0xff]  }
 0x7ee   :  { %v4377_v11 = vpop.eup %4376 }
 0x7ef   :  { %v1370_v53 = vmul.f32 %v4377_v11, %v4375_v51 }
 0x7f1   :  { %1371 = vst [vmem:[#allocation2 + $0x8] sm:$0xc] %v1370_v53  ;;  %v1372_v9 = vpack.c.bf16 %v1370_v53, %v1370_v53 }
 0x7f3   :  { %v1374_v54 = vrot.slane %v1372_v9, 1  ;;  %v4159_v9 = vld [vmem:[#allocation7 + $0xc] ss:$16 sps:$4 sm:$0xff]  }
 0x7f5   :  { %1409 = vmatmul.mubr.bf16.vlgmr.msra.gmra.mrb[28].mxu0 %v1374_v54  ;;  %1450 = vmatmul.mubr.bf16.vlgmr.msra.gmra.mrb[32].mxu1 %v1374_v54  ;;  %v4154_v54 = vld [vmem:[#allocation7] ss:$16 sps:$4 sm:$0xff]  }
 0x7f6   :  { %1507 = vmatpush1.bf16.msra.mxu0 %v5367_v10  ;;  %1548 = vmatpush1.bf16.msra.mxu1 %v4564_v23  ;;  %v4567_v10 = vld [vmem:[%s6053_s3 + $0x4c] ss:$16 sps:$4 sm:$0xff]  }
 0x7f7   :  { %1508 = vmatprep.subr.bf16.mxu0 %v5374_v49  ;;  %1549 = vmatprep.subr.bf16.mxu1 %v4565_v44  ;;  %v4568_v49 = vld [vmem:[%s6053_s3 + $0x48] ss:$16 sps:$4 sm:$0xff]  }
 0x7f8   :  { %1538 = vmatprep.mubr.bf16.mxu0 %v4713_v1  ;;  %1579 = vmatprep.mubr.bf16.mxu1 %v4713_v1  ;;  %v4157_v23 = vld [vmem:[#allocation7 + $0x8] ss:$16 sps:$4 sm:$0xff]   ;;  %v4162_v44 = vld [vmem:[#allocation7 + $0x24] ss:$16 sps:$4 sm:$0xff]  }
 0x7fa   :  { %1509 = vmatpush1.bf16.msra.mxu0 %v5383_v22  ;;  %1550 = vmatpush1.bf16.msra.mxu1 %v4566_v2  ;;  %v4569_v22 = vld [vmem:[%s6053_s3 + $0x6c] ss:$16 sps:$4 sm:$0xff]  }
 0x7fb   :  { %1510 = vmatprep.subr.bf16.mxu0 %v5390_v56  ;;  %1551 = vmatprep.subr.bf16.mxu1 %v4567_v10  ;;  %v4570_v56 = vld [vmem:[%s6053_s3 + $0x68] ss:$16 sps:$4 sm:$0xff]   ;;  %v4165_v2 = vld [vmem:[#allocation7 + $0x2c] ss:$16 sps:$4 sm:$0xff]   ;;  %v4160_v10 = vld [vmem:[#allocation7 + $0x20] ss:$16 sps:$4 sm:$0xff]  }
 0x7fe   :  { %1511 = vmatpush1.bf16.msra.mxu0 %v5397_v57  ;;  %1552 = vmatpush1.bf16.msra.mxu1 %v4568_v49  ;;  %v4571_v57 = vld [vmem:[%s6053_s3 + $0x8c] ss:$16 sps:$4 sm:$0xff]  }
 0x7ff   :  { %1512 = vmatprep.subr.bf16.mxu0 %v5404_v58  ;;  %1553 = vmatprep.subr.bf16.mxu1 %v4569_v22  ;;  %v4572_v58 = vld [vmem:[%s6053_s3 + $0x88] ss:$16 sps:$4 sm:$0xff]  }
 0x800   :  { %v4163_v49 = vld [vmem:[#allocation7 + $0x28] ss:$16 sps:$4 sm:$0xff]   ;;  %v4168_v22 = vld [vmem:[#allocation7 + $0x44] ss:$16 sps:$4 sm:$0xff]  }
 0x802   :  { %1513 = vmatpush1.bf16.msra.mxu0 %v5411_v59  ;;  %1554 = vmatpush1.bf16.msra.mxu1 %v4570_v56  ;;  %v4573_v59 = vld [vmem:[%s6053_s3 + $0xac] ss:$16 sps:$4 sm:$0xff]  }
 0x803   :  { %1514 = vmatprep.subr.bf16.mxu0 %v5418_v60  ;;  %1555 = vmatprep.subr.bf16.mxu1 %v4571_v57  ;;  %v4574_v60 = vld [vmem:[%s6053_s3 + $0xa8] ss:$16 sps:$4 sm:$0xff]   ;;  %v4171_v56 = vld [vmem:[#allocation7 + $0x4c] ss:$16 sps:$4 sm:$0xff]   ;;  %v4166_v57 = vld [vmem:[#allocation7 + $0x40] ss:$16 sps:$4 sm:$0xff]  }
 0x806   :  { %1515 = vmatpush1.bf16.msra.mxu0 %v5425_v61  ;;  %1556 = vmatpush1.bf16.msra.mxu1 %v4572_v58  ;;  %v4575_v61 = vld [vmem:[%s6053_s3 + $0xcc] ss:$16 sps:$4 sm:$0xff]  }
 0x807   :  { %1516 = vmatprep.subr.bf16.mxu0 %v5432_v62  ;;  %1557 = vmatprep.subr.bf16.mxu1 %v4573_v59  ;;  %v4576_v62 = vld [vmem:[%s6053_s3 + $0xc8] ss:$16 sps:$4 sm:$0xff]  }
 0x808   :  { %v4169_v58 = vld [vmem:[#allocation7 + $0x48] ss:$16 sps:$4 sm:$0xff]   ;;  %v4174_v59 = vld [vmem:[#allocation7 + $0x64] ss:$16 sps:$4 sm:$0xff]  }
 0x80a   :  { %1517 = vmatpush1.bf16.msra.mxu0 %v5439_v63  ;;  %1558 = vmatpush1.bf16.msra.mxu1 %v4574_v60  ;;  %v4577_v63 = vld [vmem:[%s6053_s3 + $0xec] ss:$16 sps:$4 sm:$0xff]  }
 0x80b   :  { %1518 = vmatprep.subr.bf16.mxu0 %v5446_v0  ;;  %1559 = vmatprep.subr.bf16.mxu1 %v4575_v61  ;;  %v4578_v0 = vld [vmem:[%s6053_s3 + $0xe8] ss:$16 sps:$4 sm:$0xff]   ;;  %v4177_v60 = vld [vmem:[#allocation7 + $0x6c] ss:$16 sps:$4 sm:$0xff]   ;;  %v4172_v61 = vld [vmem:[#allocation7 + $0x60] ss:$16 sps:$4 sm:$0xff]  }
 0x80e   :  { %1519 = vmatpush1.bf16.msra.mxu0 %v5453_v3  ;;  %1560 = vmatpush1.bf16.msra.mxu1 %v4576_v62  ;;  %v4175_v62 = vld [vmem:[#allocation7 + $0x68] ss:$16 sps:$4 sm:$0xff]  }
 0x80f   :  { %1520 = vmatprep.subr.bf16.mxu0 %v5460_v4  ;;  %1561 = vmatprep.subr.bf16.mxu1 %v4577_v63  ;;  %v4180_v63 = vld [vmem:[#allocation7 + $0x84] ss:$16 sps:$4 sm:$0xff]  }
 0x812   :  { %1521 = vmatpush1.bf16.msra.mxu0 %v5467_v5  ;;  %1562 = vmatpush1.bf16.msra.mxu1 %v4578_v0  ;;  %v4183_v0 = vld [vmem:[#allocation7 + $0x8c] ss:$16 sps:$4 sm:$0xff]  }
 0x813   :  { %1881 = vmatprep.subr.bf16.mxu0 %v4156_v52  ;;  %1924 = vmatprep.subr.bf16.mxu1 %v4159_v9 }
 0x8c8   :  { %v1410_v3 = vpop.f32.mrb[28].mxu0  ;;  %v1451_v6 = vpop.f32.mrb[32].mxu1 }
 0x8c9   :  { %v1462_v45 = vrot.slane %v1410_v3, 4  ;;  %v1412_v20 = vpop.f32.mrb[29].mxu0  ;;  %v1453_v18 = vpop.f32.mrb[33].mxu1  ;;  %v1464_v31 = vrot.slane %v1451_v6, 4  ;;  %v4178_v3 = vld [vmem:[#allocation7 + $0x80] ss:$16 sps:$4 sm:$0xff]  }
 0x8ca   :  { %v1463_v24 = vrot.slane %v1412_v20, 4  ;;  %v1414_v25 = vpop.f32.mrb[30].mxu0  ;;  %v1455_v4 = vpop.f32.mrb[34].mxu1  ;;  %v1465_v32 = vrot.slane %v1453_v18, 4  ;;  %v4181_v6 = vld [vmem:[#allocation7 + $0x88] ss:$16 sps:$4 sm:$0xff]  }
 0x8cb   :  { %v1470_v7 = vadd.f32 %v1462_v45, %v5162_v26  ;;  %v1415_v27 = vpop.f32.mrb[31].mxu0  ;;  %v1456_v28 = vpop.f32.mrb[35].mxu1  ;;  %v1472_v8 = vadd.f32 %v1464_v31, %v5172_v48  ;;  %v4186_v45 = vld [vmem:[#allocation7 + $0xa4] ss:$16 sps:$4 sm:$0xff]   ;;  %v4189_v20 = vld [vmem:[#allocation7 + $0xac] ss:$16 sps:$4 sm:$0xff]  }
 0x8cc   :  { %v1471_v29 = vadd.f32 %v1463_v24, %v5164_v37  ;;  %v1473_v15 = vadd.f32 %v1465_v32, %v5174_v50  ;;  %v4184_v18 = vld [vmem:[#allocation7 + $0xa0] ss:$16 sps:$4 sm:$0xff]   ;;  %v4187_v24 = vld [vmem:[#allocation7 + $0xa8] ss:$16 sps:$4 sm:$0xff]   ;;  %v4192_v25 = vld [vmem:[#allocation7 + $0xc4] ss:$16 sps:$4 sm:$0xff]  }
 0x8cd   :  { %v3776_v5 = vmul.f32 -1.442695, %v1470_v7  ;;  %v3778_v55 = vmul.f32 -1.442695, %v1472_v8  ;;  %v4195_v4 = vld [vmem:[#allocation7 + $0xcc] ss:$16 sps:$4 sm:$0xff]  }
 0x8ce   :  { %v3777_v30 = vmul.f32 -1.442695, %v1471_v29  ;;  %v4190_v7 = vld [vmem:[#allocation7 + $0xc0] ss:$16 sps:$4 sm:$0xff]   ;;  %v4193_v27 = vld [vmem:[#allocation7 + $0xc8] ss:$16 sps:$4 sm:$0xff]  }
 0x8cf   :  { %4378 = vpow2.f32 %v3776_v5  ;;  %v4198_v28 = vld [vmem:[#allocation7 + $0xe4] ss:$16 sps:$4 sm:$0xff]   ;;  %v4201_v29 = vld [vmem:[#allocation7 + $0xec] ss:$16 sps:$4 sm:$0xff]   ;;  %v4196_v5 = vld [vmem:[#allocation7 + $0xe0] ss:$16 sps:$4 sm:$0xff]  }
 0x8d0   :  { %4380 = vpow2.f32 %v3777_v30  ;;  %v4199_v30 = vld [vmem:[#allocation7 + $0xe8] ss:$16 sps:$4 sm:$0xff]   ;;  %v5553_v31 = vld [vmem:[#allocation9 + $0x4] ss:$16 sps:$4 sm:$0xff]   ;;  %v5555_v32 = vld [vmem:[#allocation9 + $0xc] ss:$16 sps:$4 sm:$0xff]  }
 0x8d1   :  { %4382 = vtanh.f32 %v1473_v15 }
 0x8d2   :  { %4384 = vpow2.f32 %v3778_v55 }
 0x8d9   :  { %v4379_v33 = vpop.eup %4378 }
 0x8da   :  { %v1483_v34 = vadd.f32 1.0, %v4379_v33  ;;  %v4381_v35 = vpop.eup %4380 }
 0x8db   :  { %v1484_v36 = vadd.f32 1.0, %v4381_v35  ;;  %v4383_v38 = vpop.eup %4382 }
 0x8dc   :  { %4386 = vrcp.f32 %v1483_v34  ;;  %v4385_v40 = vpop.eup %4384 }
 0x8dd   :  { %4388 = vrcp.f32 %v1484_v36  ;;  %v1485_v47 = vadd.f32 1.0, %v4385_v40 }
 0x8df   :  { %4390 = vrcp.f32 %v1485_v47 }
 0x8e6   :  { %v4387_v42 = vpop.eup %4386 }
 0x8e7   :  { %v1497_v21 = vmul.f32 %v4387_v42, %v4383_v38  ;;  %v4389_v41 = vpop.eup %4388 }
 0x8e8   :  { %v1496_v17 = vmul.f32 %v4389_v41, %v1494_v46 }
 0x8e9   :  { %v4391_v43 = vpop.eup %4390 }
 0x8ea   :  { %v5548_v12 = vadd.f32 %v1497_v21, %v1496_v17 }
 0x8ec   :  { %4392 = vtanh.f32 %v5548_v12 }
 0x8f6   :  { %v4393_v19 = vpop.eup %4392 }
 0x8f7   :  { %v1500_v51 = vmul.f32 %v4393_v19, %v4391_v43 }
 0x8f9   :  { %1501 = vst [vmem:[#allocation2 + $0x8] sm:$0x30] %v1500_v51  ;;  %v1502_v11 = vpack.c.bf16 %v1500_v51, %v1500_v51 }
 0x8fb   :  { %v1504_v53 = vrot.slane %v1502_v11, 2 }
 0x8fd   :  { %1539 = vmatmul.mubr.bf16.vlgmr.msra.gmra.mrb[32].mxu0 %v1504_v53  ;;  %1580 = vmatmul.mubr.bf16.vlgmr.msra.gmra.mrb[36].mxu1 %v1504_v53 }
 0x8fe   :  { %1913 = vmatprep.mubr.bf16.mxu0 %v4713_v1  ;;  %1956 = vmatprep.mubr.bf16.mxu1 %v4713_v1 }
 0x8ff   :  { %1882 = vmatpush1.bf16.msra.mxu0 %v4154_v54  ;;  %1925 = vmatpush1.bf16.msra.mxu1 %v4157_v23 }
 0x900   :  { %1883 = vmatprep.subr.bf16.mxu0 %v4162_v44  ;;  %1926 = vmatprep.subr.bf16.mxu1 %v4165_v2  ;;  %v1624_v44 = vrot.slane %v5548_v12, 6  ;;  %v5570_v12 = vld [vmem:[#allocation9 + $0x2c] ss:$16 sps:$4 sm:$0xff]  }
 0x903   :  { %1884 = vmatpush1.bf16.msra.mxu0 %v4160_v10  ;;  %1927 = vmatpush1.bf16.msra.mxu1 %v4163_v49 }
 0x904   :  { %1885 = vmatprep.subr.bf16.mxu0 %v4168_v22  ;;  %1928 = vmatprep.subr.bf16.mxu1 %v4171_v56 }
 0x907   :  { %1886 = vmatpush1.bf16.msra.mxu0 %v4166_v57  ;;  %1929 = vmatpush1.bf16.msra.mxu1 %v4169_v58  ;;  %v1632_v58 = vld [vmem:[#allocation2] sm:$0xff] }
 0x908   :  { %1887 = vmatprep.subr.bf16.mxu0 %v4174_v59  ;;  %1930 = vmatprep.subr.bf16.mxu1 %v4177_v60  ;;  %v5564_v60 = vld [vmem:[#allocation9] ss:$16 sps:$4 sm:$0xff]  }
 0x90b   :  { %1888 = vmatpush1.bf16.msra.mxu0 %v4172_v61  ;;  %1931 = vmatpush1.bf16.msra.mxu1 %v4175_v62  ;;  %v5566_v61 = vld [vmem:[#allocation9 + $0x8] ss:$16 sps:$4 sm:$0xff]  }
 0x90c   :  { %1889 = vmatprep.subr.bf16.mxu0 %v4180_v63  ;;  %1932 = vmatprep.subr.bf16.mxu1 %v4183_v0  ;;  %v5568_v63 = vld [vmem:[#allocation9 + $0x24] ss:$16 sps:$4 sm:$0xff]   ;;  %v5574_v0 = vld [vmem:[#allocation9 + $0x20] ss:$16 sps:$4 sm:$0xff]  }
 0x90f   :  { %1890 = vmatpush1.bf16.msra.mxu0 %v4178_v3  ;;  %1933 = vmatpush1.bf16.msra.mxu1 %v4181_v6  ;;  %v5576_v3 = vld [vmem:[#allocation9 + $0x28] ss:$16 sps:$4 sm:$0xff]   ;;  %v5580_v6 = vld [vmem:[#allocation9 + $0x44] ss:$16 sps:$4 sm:$0xff]  }
 0x910   :  { %1891 = vmatprep.subr.bf16.mxu0 %v4186_v45  ;;  %1934 = vmatprep.subr.bf16.mxu1 %v4189_v20  ;;  %v5582_v45 = vld [vmem:[#allocation9 + $0x4c] ss:$16 sps:$4 sm:$0xff]   ;;  %v5588_v20 = vld [vmem:[#allocation9 + $0x40] ss:$16 sps:$4 sm:$0xff]  }
 0x913   :  { %1892 = vmatpush1.bf16.msra.mxu0 %v4184_v18  ;;  %1935 = vmatpush1.bf16.msra.mxu1 %v4187_v24  ;;  %v5590_v18 = vld [vmem:[#allocation9 + $0x48] ss:$16 sps:$4 sm:$0xff]   ;;  %v5594_v24 = vld [vmem:[#allocation9 + $0x64] ss:$16 sps:$4 sm:$0xff]  }
 0x914   :  { %1893 = vmatprep.subr.bf16.mxu0 %v4192_v25  ;;  %1936 = vmatprep.subr.bf16.mxu1 %v4195_v4  ;;  %v5596_v25 = vld [vmem:[#allocation9 + $0x6c] ss:$16 sps:$4 sm:$0xff]   ;;  %v5600_v4 = vld [vmem:[#allocation9 + $0x60] ss:$16 sps:$4 sm:$0xff]  }
 0x917   :  { %1894 = vmatpush1.bf16.msra.mxu0 %v4190_v7  ;;  %1937 = vmatpush1.bf16.msra.mxu1 %v4193_v27  ;;  %v5602_v7 = vld [vmem:[#allocation9 + $0x68] ss:$16 sps:$4 sm:$0xff]   ;;  %v5606_v27 = vld [vmem:[#allocation9 + $0x84] ss:$16 sps:$4 sm:$0xff]  }
 0x918   :  { %1895 = vmatprep.subr.bf16.mxu0 %v4198_v28  ;;  %1938 = vmatprep.subr.bf16.mxu1 %v4201_v29  ;;  %v5608_v28 = vld [vmem:[#allocation9 + $0x8c] ss:$16 sps:$4 sm:$0xff]   ;;  %v5612_v29 = vld [vmem:[#allocation9 + $0x80] ss:$16 sps:$4 sm:$0xff]  }
 0x91b   :  { %1896 = vmatpush1.bf16.msra.mxu0 %v4196_v5  ;;  %1939 = vmatpush1.bf16.msra.mxu1 %v4199_v30  ;;  %v5614_v5 = vld [vmem:[#allocation9 + $0x88] ss:$16 sps:$4 sm:$0xff]   ;;  %v5618_v30 = vld [vmem:[#allocation9 + $0xa4] ss:$16 sps:$4 sm:$0xff]  }
 0x91c   :  { %2127 = vmatprep.subr.bf16.mxu0 %v5553_v31  ;;  %2168 = vmatprep.subr.bf16.mxu1 %v5555_v32 }
 0x9d0   :  { %v1540_v8 = vpop.f32.mrb[32].mxu0  ;;  %v1581_v15 = vpop.f32.mrb[36].mxu1 }
 0x9d1   :  { %v1592_v55 = vrot.slane %v1540_v8, 2  ;;  %v1542_v33 = vpop.f32.mrb[33].mxu0  ;;  %v1583_v34 = vpop.f32.mrb[37].mxu1  ;;  %v1594_v17 = vrot.slane %v1581_v15, 2  ;;  %v5620_v8 = vld [vmem:[#allocation9 + $0xac] ss:$16 sps:$4 sm:$0xff]  }
 0x9d2   :  { %v1593_v35 = vrot.slane %v1542_v33, 2  ;;  %v1544_v36 = vpop.f32.mrb[34].mxu0  ;;  %v1585_v38 = vpop.f32.mrb[38].mxu1  ;;  %v1595_v43 = vrot.slane %v1583_v34, 2  ;;  %v5624_v15 = vld [vmem:[#allocation9 + $0xa0] ss:$16 sps:$4 sm:$0xff]  }
 0x9d3   :  { %v1600_v40 = vadd.f32 %v1592_v55, %v5162_v26  ;;  %v1545_v42 = vpop.f32.mrb[35].mxu0  ;;  %v1586_v46 = vpop.f32.mrb[39].mxu1  ;;  %v1602_v19 = vadd.f32 %v1594_v17, %v5172_v48  ;;  %v5626_v55 = vld [vmem:[#allocation9 + $0xa8] ss:$16 sps:$4 sm:$0xff]   ;;  %v5630_v33 = vld [vmem:[#allocation9 + $0xc4] ss:$16 sps:$4 sm:$0xff]  }
 0x9d4   :  { %v1601_v21 = vadd.f32 %v1593_v35, %v5164_v37  ;;  %v1603_v51 = vadd.f32 %v1595_v43, %v5174_v50  ;;  %v5632_v34 = vld [vmem:[#allocation9 + $0xcc] ss:$16 sps:$4 sm:$0xff]   ;;  %v5636_v35 = vld [vmem:[#allocation9 + $0xc0] ss:$16 sps:$4 sm:$0xff]   ;;  %v5638_v36 = vld [vmem:[#allocation9 + $0xc8] ss:$16 sps:$4 sm:$0xff]  }
 0x9d5   :  { %v3779_v41 = vmul.f32 -1.442695, %v1600_v40  ;;  %v3781_v11 = vmul.f32 -1.442695, %v1602_v19  ;;  %v5642_v38 = vld [vmem:[#allocation9 + $0xe4] ss:$16 sps:$4 sm:$0xff]  }
 0x9d6   :  { %v3780_v47 = vmul.f32 -1.442695, %v1601_v21  ;;  %v5644_v40 = vld [vmem:[#allocation9 + $0xec] ss:$16 sps:$4 sm:$0xff]   ;;  %v5648_v42 = vld [vmem:[#allocation9 + $0xe0] ss:$16 sps:$4 sm:$0xff]  }
 0x9d7   :  { %4394 = vpow2.f32 %v3779_v41  ;;  %v5650_v46 = vld [vmem:[#allocation9 + $0xe8] ss:$16 sps:$4 sm:$0xff]   ;;  %v1698_v21 = vld [vmem:[%s6057_s7] sm:$0xf] }
 0x9d8   :  { %4396 = vpow2.f32 %v3780_v47  ;;  %v1704_v17 = vrot.slane %v1698_v21, %v281_v14  ;;  %v1712_v43 = vrot.slane %v1698_v21, %v289_v39 }
 0x9d9   :  { %4398 = vtanh.f32 %v1603_v51 }
 0x9da   :  { %4400 = vpow2.f32 %v3781_v11  ;;  %v1708_v11 = vrot.slane %v1698_v21, %v285_v16 }
 0x9e1   :  { %v4395_v53 = vpop.eup %4394 }
 0x9e2   :  { %v1613_v52 = vadd.f32 1.0, %v4395_v53  ;;  %v4397_v9 = vpop.eup %4396  ;;  %v6069_v53 = vsub.s32 3, %v5151_v13 }
 0x9e3   :  { %v1614_v26 = vadd.f32 1.0, %v4397_v9  ;;  %v4399_v37 = vpop.eup %4398 }
 0x9e4   :  { %4402 = vrcp.f32 %v1613_v52  ;;  %v4401_v54 = vpop.eup %4400  ;;  %v1716_v52 = vrot.slane %v1698_v21, %v6069_v53 }
 0x9e5   :  { %4404 = vrcp.f32 %v1614_v26  ;;  %v1615_v49 = vadd.f32 1.0, %v4401_v54 }
 0x9e7   :  { %4406 = vrcp.f32 %v1615_v49 }
 0x9ee   :  { %v4403_v23 = vpop.eup %4402 }
 0x9ef   :  { %v1627_v2 = vmul.f32 %v4403_v23, %v4399_v37  ;;  %v4405_v10 = vpop.eup %4404 }
 0x9f0   :  { %v1626_v48 = vmul.f32 %v4405_v10, %v1624_v44 }
 0x9f1   :  { %v4407_v50 = vpop.eup %4406 }
 0x9f2   :  { %v1628_v22 = vadd.f32 %v1627_v2, %v1626_v48 }
 0x9f4   :  { %4408 = vtanh.f32 %v1628_v22 }
 0x9fe   :  { %v4409_v56 = vpop.eup %4408 }
 0x9ff   :  { %v1630_v57 = vmul.f32 %v4409_v56, %v4407_v50 }
 0xa01   :  { %1631 = vst [vmem:[#allocation2 + $0x8] sm:$0xc0] %v1630_v57 }
 0xa08   :  { %v1633_v59 = vld [vmem:[#allocation2 + $0x8] sm:$0xff] }
 0xa09   :  { %v1699_v62 = vpack.c.bf16 %v1633_v59, %v1632_v58 }
 0xa0b   :  { %1914 = vmatmul.mubr.bf16.vlgmr.msra.gmra.mrb[36].mxu0 %v1699_v62  ;;  %1957 = vmatmul.mubr.bf16.vlgmr.msra.gmra.mrb[40].mxu1 %v1699_v62 }
 0xa0c   :  { %2128 = vmatpush1.bf16.msra.mxu0 %v5564_v60  ;;  %2169 = vmatpush1.bf16.msra.mxu1 %v5566_v61 }
 0xa0d   :  { %2129 = vmatprep.subr.bf16.mxu0 %v5568_v63  ;;  %2170 = vmatprep.subr.bf16.mxu1 %v5570_v12 }
 0xa0e   :  { %2159 = vmatprep.mubr.bf16.mxu0 %v4713_v1  ;;  %2200 = vmatprep.mubr.bf16.mxu1 %v4713_v1 }
 0xa10   :  { %2130 = vmatpush1.bf16.msra.mxu0 %v5574_v0  ;;  %2171 = vmatpush1.bf16.msra.mxu1 %v5576_v3 }
 0xa11   :  { %2131 = vmatprep.subr.bf16.mxu0 %v5580_v6  ;;  %2172 = vmatprep.subr.bf16.mxu1 %v5582_v45 }
 0xa14   :  { %2132 = vmatpush1.bf16.msra.mxu0 %v5588_v20  ;;  %2173 = vmatpush1.bf16.msra.mxu1 %v5590_v18 }
 0xa15   :  { %2133 = vmatprep.subr.bf16.mxu0 %v5594_v24  ;;  %2174 = vmatprep.subr.bf16.mxu1 %v5596_v25 }
 0xa18   :  { %2134 = vmatpush1.bf16.msra.mxu0 %v5600_v4  ;;  %2175 = vmatpush1.bf16.msra.mxu1 %v5602_v7 }
 0xa19   :  { %2135 = vmatprep.subr.bf16.mxu0 %v5606_v27  ;;  %2176 = vmatprep.subr.bf16.mxu1 %v5608_v28 }
 0xa1c   :  { %2136 = vmatpush1.bf16.msra.mxu0 %v5612_v29  ;;  %2177 = vmatpush1.bf16.msra.mxu1 %v5614_v5 }
 0xa1d   :  { %2137 = vmatprep.subr.bf16.mxu0 %v5618_v30  ;;  %2178 = vmatprep.subr.bf16.mxu1 %v5620_v8 }
 0xa20   :  { %2138 = vmatpush1.bf16.msra.mxu0 %v5624_v15  ;;  %2179 = vmatpush1.bf16.msra.mxu1 %v5626_v55 }
 0xa21   :  { %2139 = vmatprep.subr.bf16.mxu0 %v5630_v33  ;;  %2180 = vmatprep.subr.bf16.mxu1 %v5632_v34 }
 0xa24   :  { %2140 = vmatpush1.bf16.msra.mxu0 %v5636_v35  ;;  %2181 = vmatpush1.bf16.msra.mxu1 %v5638_v36 }
 0xa25   :  { %2141 = vmatprep.subr.bf16.mxu0 %v5642_v38  ;;  %2182 = vmatprep.subr.bf16.mxu1 %v5644_v40 }
 0xa28   :  { %2142 = vmatpush1.bf16.msra.mxu0 %v5648_v42  ;;  %2183 = vmatpush1.bf16.msra.mxu1 %v5650_v46 }
 0xa29   :  { %2239 = vmatprep.subr.bf16.mxu0 %v5553_v31  ;;  %2280 = vmatprep.subr.bf16.mxu1 %v5555_v32 }
 0xa2b   :  { %2160 = vmatmul.mubr.bf16.vlgmr.msra.gmra.mrb[40].mxu0 %v4713_v1  ;;  %2201 = vmatmul.mubr.bf16.vlgmr.msra.gmra.mrb[44].mxu1 %v4713_v1 }
 0xa2c   :  { %2240 = vmatpush1.bf16.msra.mxu0 %v5564_v60  ;;  %2281 = vmatpush1.bf16.msra.mxu1 %v5566_v61 }
 0xa2d   :  { %2241 = vmatprep.subr.bf16.mxu0 %v5568_v63  ;;  %2282 = vmatprep.subr.bf16.mxu1 %v5570_v12 }
 0xa2e   :  { %2271 = vmatprep.mubr.bf16.mxu0 %v4713_v1  ;;  %2312 = vmatprep.mubr.bf16.mxu1 %v4713_v1 }
 0xa30   :  { %2242 = vmatpush1.bf16.msra.mxu0 %v5574_v0  ;;  %2283 = vmatpush1.bf16.msra.mxu1 %v5576_v3 }
 0xa31   :  { %2243 = vmatprep.subr.bf16.mxu0 %v5580_v6  ;;  %2284 = vmatprep.subr.bf16.mxu1 %v5582_v45 }
 0xa34   :  { %2244 = vmatpush1.bf16.msra.mxu0 %v5588_v20  ;;  %2285 = vmatpush1.bf16.msra.mxu1 %v5590_v18 }
 0xa35   :  { %2245 = vmatprep.subr.bf16.mxu0 %v5594_v24  ;;  %2286 = vmatprep.subr.bf16.mxu1 %v5596_v25 }
 0xa38   :  { %2246 = vmatpush1.bf16.msra.mxu0 %v5600_v4  ;;  %2287 = vmatpush1.bf16.msra.mxu1 %v5602_v7 }
 0xa39   :  { %2247 = vmatprep.subr.bf16.mxu0 %v5606_v27  ;;  %2288 = vmatprep.subr.bf16.mxu1 %v5608_v28 }
 0xa3c   :  { %2248 = vmatpush1.bf16.msra.mxu0 %v5612_v29  ;;  %2289 = vmatpush1.bf16.msra.mxu1 %v5614_v5 }
 0xa3d   :  { %2249 = vmatprep.subr.bf16.mxu0 %v5618_v30  ;;  %2290 = vmatprep.subr.bf16.mxu1 %v5620_v8 }
 0xa40   :  { %2250 = vmatpush1.bf16.msra.mxu0 %v5624_v15  ;;  %2291 = vmatpush1.bf16.msra.mxu1 %v5626_v55 }
 0xa41   :  { %2251 = vmatprep.subr.bf16.mxu0 %v5630_v33  ;;  %2292 = vmatprep.subr.bf16.mxu1 %v5632_v34 }
 0xa44   :  { %2252 = vmatpush1.bf16.msra.mxu0 %v5636_v35  ;;  %2293 = vmatpush1.bf16.msra.mxu1 %v5638_v36 }
 0xa45   :  { %2253 = vmatprep.subr.bf16.mxu0 %v5642_v38  ;;  %2294 = vmatprep.subr.bf16.mxu1 %v5644_v40 }
 0xa48   :  { %2254 = vmatpush1.bf16.msra.mxu0 %v5648_v42  ;;  %2295 = vmatpush1.bf16.msra.mxu1 %v5650_v46 }
 0xa49   :  { %2369 = vmatprep.subr.bf16.mxu0 %v5553_v31  ;;  %2410 = vmatprep.subr.bf16.mxu1 %v5555_v32 }
 0xade   :  { %v1915_v41 = vpop.f32.mrb[36].mxu0  ;;  %v1958_v47 = vpop.f32.mrb[40].mxu1 }
 0xadf   :  { %v1917_v19 = vpop.f32.mrb[37].mxu0  ;;  %v1960_v51 = vpop.f32.mrb[41].mxu1  ;;  %v5713_v39 = vadd.f32 %v1915_v41, %v1704_v17  ;;  %v5719_v53 = vadd.f32 %v1958_v47, %v1712_v43 }
 0xae0   :  { %v1919_v9 = vpop.f32.mrb[38].mxu0  ;;  %v1962_v26 = vpop.f32.mrb[42].mxu1  ;;  %v5715_v10 = vadd.f32 %v1917_v19, %v1708_v11 }
 0xae1   :  { %v5705_v37 = vadd.f32 %v1919_v9, %v1704_v17  ;;  %v5707_v54 = vadd.f32 %v1962_v26, %v1712_v43  ;;  %v1921_v23 = vpop.f32.mrb[39].mxu0  ;;  %v1964_v44 = vpop.f32.mrb[43].mxu1  ;;  %v5722_v17 = vadd.f32 %v1960_v51, %v1716_v52 }
 0xae2   :  { %v5709_v14 = vadd.f32 %v1921_v23, %v1708_v11  ;;  %v5711_v2 = vadd.f32 %v1964_v44, %v1716_v52 }
 0xafe   :  { %v2161_v16 = vpop.f32.mrb[40].mxu0  ;;  %v2202_v49 = vpop.f32.mrb[44].mxu1 }
 0xaff   :  { %v2209_v13 = vadd.f32 %v2161_v16, %v5713_v39  ;;  %v2163_v48 = vpop.f32.mrb[41].mxu0  ;;  %v2204_v22 = vpop.f32.mrb[45].mxu1  ;;  %v2211_v41 = vadd.f32 %v2202_v49, %v5719_v53 }
 0xb00   :  { %v2210_v50 = vadd.f32 %v2163_v48, %v5715_v10  ;;  %v2165_v56 = vpop.f32.mrb[42].mxu0  ;;  %v2206_v57 = vpop.f32.mrb[46].mxu1  ;;  %v2212_v19 = vadd.f32 %v2204_v22, %v5722_v17 }
 0xb01   :  { %v3846_v58 = vmul.f32 -1.442695, %v2209_v13  ;;  %v2166_v59 = vpop.f32.mrb[43].mxu0  ;;  %v2207_v62 = vpop.f32.mrb[47].mxu1  ;;  %v3848_v11 = vmul.f32 -1.442695, %v2211_v41 }
 0xb02   :  { %v3847_v21 = vmul.f32 -1.442695, %v2210_v50 }
 0xb03   :  { %4410 = vpow2.f32 %v3846_v58 }
 0xb04   :  { %4412 = vpow2.f32 %v3847_v21 }
 0xb05   :  { %4414 = vtanh.f32 %v2212_v19 }
 0xb06   :  { %4416 = vpow2.f32 %v3848_v11 }
 0xb0d   :  { %v4411_v9 = vpop.eup %4410 }
 0xb0e   :  { %v2222_v26 = vadd.f32 1.0, %v4411_v9  ;;  %v4413_v23 = vpop.eup %4412 }
 0xb0f   :  { %v2223_v44 = vadd.f32 1.0, %v4413_v23  ;;  %v4415_v16 = vpop.eup %4414 }
 0xb10   :  { %4418 = vrcp.f32 %v2222_v26  ;;  %v4417_v13 = vpop.eup %4416 }
 0xb11   :  { %4420 = vrcp.f32 %v2223_v44  ;;  %v2224_v50 = vadd.f32 1.0, %v4417_v13 }
 0xb13   :  { %4422 = vrcp.f32 %v2224_v50 }
 0xb1a   :  { %v4419_v47 = vpop.eup %4418 }
 0xb1b   :  { %v2233_v43 = vmul.f32 %v4419_v47, %v4415_v16  ;;  %v4421_v48 = vpop.eup %4420 }
 0xb1c   :  { %v2232_v49 = vmul.f32 0.0, %v4421_v48 }
 0xb1d   :  { %v4423_v52 = vpop.eup %4422 }
 0xb1e   :  { %v5725_v51 = vadd.f32 %v2233_v43, %v2232_v49 }
 0xb20   :  { %4424 = vtanh.f32 %v5725_v51 }
 0xb2a   :  { %v4425_v22 = vpop.eup %4424 }
 0xb2b   :  { %v2236_v56 = vmul.f32 %v4425_v22, %v4423_v52 }
 0xb2d   :  { %2237 = vst [vmem:[#allocation3] sm:$0x3] %v2236_v56  ;;  %v2238_v57 = vpack.c.bf16 %v2236_v56, %v2236_v56 }
 0xb2f   :  { %2272 = vmatmul.mubr.bf16.vlgmr.msra.gmra.mrb[44].mxu0 %v2238_v57  ;;  %2313 = vmatmul.mubr.bf16.vlgmr.msra.gmra.mrb[48].mxu1 %v2238_v57 }
 0xb30   :  { %2370 = vmatpush1.bf16.msra.mxu0 %v5564_v60  ;;  %2411 = vmatpush1.bf16.msra.mxu1 %v5566_v61 }
 0xb31   :  { %2371 = vmatprep.subr.bf16.mxu0 %v5568_v63  ;;  %2412 = vmatprep.subr.bf16.mxu1 %v5570_v12 }
 0xb32   :  { %2401 = vmatprep.mubr.bf16.mxu0 %v4713_v1  ;;  %2442 = vmatprep.mubr.bf16.mxu1 %v4713_v1 }
 0xb34   :  { %2372 = vmatpush1.bf16.msra.mxu0 %v5574_v0  ;;  %2413 = vmatpush1.bf16.msra.mxu1 %v5576_v3 }
 0xb35   :  { %2373 = vmatprep.subr.bf16.mxu0 %v5580_v6  ;;  %2414 = vmatprep.subr.bf16.mxu1 %v5582_v45 }
 0xb38   :  { %2374 = vmatpush1.bf16.msra.mxu0 %v5588_v20  ;;  %2415 = vmatpush1.bf16.msra.mxu1 %v5590_v18 }
 0xb39   :  { %2375 = vmatprep.subr.bf16.mxu0 %v5594_v24  ;;  %2416 = vmatprep.subr.bf16.mxu1 %v5596_v25 }
 0xb3c   :  { %2376 = vmatpush1.bf16.msra.mxu0 %v5600_v4  ;;  %2417 = vmatpush1.bf16.msra.mxu1 %v5602_v7 }
 0xb3d   :  { %2377 = vmatprep.subr.bf16.mxu0 %v5606_v27  ;;  %2418 = vmatprep.subr.bf16.mxu1 %v5608_v28 }
 0xb40   :  { %2378 = vmatpush1.bf16.msra.mxu0 %v5612_v29  ;;  %2419 = vmatpush1.bf16.msra.mxu1 %v5614_v5 }
 0xb41   :  { %2379 = vmatprep.subr.bf16.mxu0 %v5618_v30  ;;  %2420 = vmatprep.subr.bf16.mxu1 %v5620_v8 }
 0xb44   :  { %2380 = vmatpush1.bf16.msra.mxu0 %v5624_v15  ;;  %2421 = vmatpush1.bf16.msra.mxu1 %v5626_v55 }
 0xb45   :  { %2381 = vmatprep.subr.bf16.mxu0 %v5630_v33  ;;  %2422 = vmatprep.subr.bf16.mxu1 %v5632_v34 }
 0xb48   :  { %2382 = vmatpush1.bf16.msra.mxu0 %v5636_v35  ;;  %2423 = vmatpush1.bf16.msra.mxu1 %v5638_v36 }
 0xb49   :  { %2383 = vmatprep.subr.bf16.mxu0 %v5642_v38  ;;  %2424 = vmatprep.subr.bf16.mxu1 %v5644_v40 }
 0xb4c   :  { %2384 = vmatpush1.bf16.msra.mxu0 %v5648_v42  ;;  %2425 = vmatpush1.bf16.msra.mxu1 %v5650_v46 }
 0xb4d   :  { %2499 = vmatprep.subr.bf16.mxu0 %v5553_v31  ;;  %2540 = vmatprep.subr.bf16.mxu1 %v5555_v32 }
 0xc02   :  { %v2273_v58 = vpop.f32.mrb[44].mxu0  ;;  %v2314_v59 = vpop.f32.mrb[48].mxu1 }
 0xc03   :  { %v2325_v62 = vrot.slane %v2273_v58, 6  ;;  %v2275_v21 = vpop.f32.mrb[45].mxu0  ;;  %v2316_v41 = vpop.f32.mrb[49].mxu1  ;;  %v2327_v43 = vrot.slane %v2314_v59, 6  ;;  %v2357_v59 = vrot.slane %v5725_v51, 6 }
 0xc04   :  { %v2326_v19 = vrot.slane %v2275_v21, 6  ;;  %v2277_v11 = vpop.f32.mrb[46].mxu0  ;;  %v2318_v9 = vpop.f32.mrb[50].mxu1  ;;  %v2328_v48 = vrot.slane %v2316_v41, 6 }
 0xc05   :  { %v2333_v26 = vadd.f32 %v2325_v62, %v5713_v39  ;;  %v2278_v23 = vpop.f32.mrb[47].mxu0  ;;  %v2319_v44 = vpop.f32.mrb[51].mxu1  ;;  %v2335_v50 = vadd.f32 %v2327_v43, %v5719_v53 }
 0xc06   :  { %v2334_v16 = vadd.f32 %v2326_v19, %v5715_v10  ;;  %v2336_v49 = vadd.f32 %v2328_v48, %v5722_v17 }
 0xc07   :  { %v3849_v13 = vmul.f32 -1.442695, %v2333_v26  ;;  %v3851_v52 = vmul.f32 -1.442695, %v2335_v50 }
 0xc08   :  { %v3850_v47 = vmul.f32 -1.442695, %v2334_v16 }
 0xc09   :  { %4426 = vpow2.f32 %v3849_v13 }
 0xc0a   :  { %4428 = vpow2.f32 %v3850_v47 }
 0xc0b   :  { %4430 = vtanh.f32 %v2336_v49 }
 0xc0c   :  { %4432 = vpow2.f32 %v3851_v52 }
 0xc13   :  { %v4427_v22 = vpop.eup %4426 }
 0xc14   :  { %v2346_v56 = vadd.f32 1.0, %v4427_v22  ;;  %v4429_v57 = vpop.eup %4428 }
 0xc15   :  { %v2347_v58 = vadd.f32 1.0, %v4429_v57  ;;  %v4431_v62 = vpop.eup %4430 }
 0xc16   :  { %4434 = vrcp.f32 %v2346_v56  ;;  %v4433_v21 = vpop.eup %4432 }
 0xc17   :  { %4436 = vrcp.f32 %v2347_v58  ;;  %v2348_v9 = vadd.f32 1.0, %v4433_v21 }
 0xc19   :  { %4438 = vrcp.f32 %v2348_v9 }
 0xc20   :  { %v4435_v19 = vpop.eup %4434 }
 0xc21   :  { %v2360_v11 = vmul.f32 %v4435_v19, %v4431_v62  ;;  %v4437_v41 = vpop.eup %4436 }
 0xc22   :  { %v2359_v26 = vmul.f32 %v4437_v41, %v2357_v59 }
 0xc23   :  { %v4439_v44 = vpop.eup %4438 }
 0xc24   :  { %v5767_v23 = vadd.f32 %v2360_v11, %v2359_v26 }
 0xc26   :  { %4440 = vtanh.f32 %v5767_v23 }
 0xc30   :  { %v4441_v16 = vpop.eup %4440 }
 0xc31   :  { %v2363_v13 = vmul.f32 %v4441_v16, %v4439_v44 }
 0xc33   :  { %2364 = vst [vmem:[#allocation3] sm:$0xc] %v2363_v13  ;;  %v2365_v47 = vpack.c.bf16 %v2363_v13, %v2363_v13 }
 0xc35   :  { %v2367_v43 = vrot.slane %v2365_v47, 1 }
 0xc37   :  { %2402 = vmatmul.mubr.bf16.vlgmr.msra.gmra.mrb[48].mxu0 %v2367_v43  ;;  %2443 = vmatmul.mubr.bf16.vlgmr.msra.gmra.mrb[52].mxu1 %v2367_v43 }
 0xc38   :  { %2500 = vmatpush1.bf16.msra.mxu0 %v5564_v60  ;;  %2541 = vmatpush1.bf16.msra.mxu1 %v5566_v61 }
 0xc39   :  { %2501 = vmatprep.subr.bf16.mxu0 %v5568_v63  ;;  %2542 = vmatprep.subr.bf16.mxu1 %v5570_v12 }
 0xc3a   :  { %2531 = vmatprep.mubr.bf16.mxu0 %v4713_v1  ;;  %2572 = vmatprep.mubr.bf16.mxu1 %v4713_v1 }
 0xc3c   :  { %2502 = vmatpush1.bf16.msra.mxu0 %v5574_v0  ;;  %2543 = vmatpush1.bf16.msra.mxu1 %v5576_v3 }
 0xc3d   :  { %2503 = vmatprep.subr.bf16.mxu0 %v5580_v6  ;;  %2544 = vmatprep.subr.bf16.mxu1 %v5582_v45 }
 0xc40   :  { %2504 = vmatpush1.bf16.msra.mxu0 %v5588_v20  ;;  %2545 = vmatpush1.bf16.msra.mxu1 %v5590_v18 }
 0xc41   :  { %2505 = vmatprep.subr.bf16.mxu0 %v5594_v24  ;;  %2546 = vmatprep.subr.bf16.mxu1 %v5596_v25 }
 0xc44   :  { %2506 = vmatpush1.bf16.msra.mxu0 %v5600_v4  ;;  %2547 = vmatpush1.bf16.msra.mxu1 %v5602_v7 }
 0xc45   :  { %2507 = vmatprep.subr.bf16.mxu0 %v5606_v27  ;;  %2548 = vmatprep.subr.bf16.mxu1 %v5608_v28 }
 0xc48   :  { %2508 = vmatpush1.bf16.msra.mxu0 %v5612_v29  ;;  %2549 = vmatpush1.bf16.msra.mxu1 %v5614_v5 }
 0xc49   :  { %2509 = vmatprep.subr.bf16.mxu0 %v5618_v30  ;;  %2550 = vmatprep.subr.bf16.mxu1 %v5620_v8 }
 0xc4c   :  { %2510 = vmatpush1.bf16.msra.mxu0 %v5624_v15  ;;  %2551 = vmatpush1.bf16.msra.mxu1 %v5626_v55 }
 0xc4d   :  { %2511 = vmatprep.subr.bf16.mxu0 %v5630_v33  ;;  %2552 = vmatprep.subr.bf16.mxu1 %v5632_v34 }
 0xc50   :  { %2512 = vmatpush1.bf16.msra.mxu0 %v5636_v35  ;;  %2553 = vmatpush1.bf16.msra.mxu1 %v5638_v36 }
 0xc51   :  { %2513 = vmatprep.subr.bf16.mxu0 %v5642_v38  ;;  %2554 = vmatprep.subr.bf16.mxu1 %v5644_v40 }
 0xc54   :  { %2514 = vmatpush1.bf16.msra.mxu0 %v5648_v42  ;;  %2555 = vmatpush1.bf16.msra.mxu1 %v5650_v46 }
 0xc55   :  { %2629 = vmatprep.subr.bf16.mxu0 %v5553_v31  ;;  %2670 = vmatprep.subr.bf16.mxu1 %v5555_v32 }
 0xd0a   :  { %v2403_v51 = vpop.f32.mrb[48].mxu0  ;;  %v2444_v48 = vpop.f32.mrb[52].mxu1 }
 0xd0b   :  { %v2455_v50 = vrot.slane %v2403_v51, 4  ;;  %v2405_v49 = vpop.f32.mrb[49].mxu0  ;;  %v2446_v52 = vpop.f32.mrb[53].mxu1  ;;  %v2457_v41 = vrot.slane %v2444_v48, 4  ;;  %v2487_v48 = vrot.slane %v5767_v23, 6 }
 0xd0c   :  { %v2456_v22 = vrot.slane %v2405_v49, 4  ;;  %v2407_v56 = vpop.f32.mrb[50].mxu0  ;;  %v2448_v57 = vpop.f32.mrb[54].mxu1  ;;  %v2458_v9 = vrot.slane %v2446_v52, 4 }
 0xd0d   :  { %v2463_v58 = vadd.f32 %v2455_v50, %v5713_v39  ;;  %v2408_v62 = vpop.f32.mrb[51].mxu0  ;;  %v2449_v21 = vpop.f32.mrb[55].mxu1  ;;  %v2465_v26 = vadd.f32 %v2457_v41, %v5719_v53 }
 0xd0e   :  { %v2464_v19 = vadd.f32 %v2456_v22, %v5715_v10  ;;  %v2466_v44 = vadd.f32 %v2458_v9, %v5722_v17 }
 0xd0f   :  { %v3852_v59 = vmul.f32 -1.442695, %v2463_v58  ;;  %v3854_v16 = vmul.f32 -1.442695, %v2465_v26 }
 0xd10   :  { %v3853_v11 = vmul.f32 -1.442695, %v2464_v19 }
 0xd11   :  { %4442 = vpow2.f32 %v3852_v59 }
 0xd12   :  { %4444 = vpow2.f32 %v3853_v11 }
 0xd13   :  { %4446 = vtanh.f32 %v2466_v44 }
 0xd14   :  { %4448 = vpow2.f32 %v3854_v16 }
 0xd1b   :  { %v4443_v13 = vpop.eup %4442 }
 0xd1c   :  { %v2476_v47 = vadd.f32 1.0, %v4443_v13  ;;  %v4445_v43 = vpop.eup %4444 }
 0xd1d   :  { %v2477_v51 = vadd.f32 1.0, %v4445_v43  ;;  %v4447_v50 = vpop.eup %4446 }
 0xd1e   :  { %4450 = vrcp.f32 %v2476_v47  ;;  %v4449_v49 = vpop.eup %4448 }
 0xd1f   :  { %4452 = vrcp.f32 %v2477_v51  ;;  %v2478_v57 = vadd.f32 1.0, %v4449_v49 }
 0xd21   :  { %4454 = vrcp.f32 %v2478_v57 }
 0xd28   :  { %v4451_v22 = vpop.eup %4450 }
 0xd29   :  { %v2490_v56 = vmul.f32 %v4451_v22, %v4447_v50  ;;  %v4453_v52 = vpop.eup %4452 }
 0xd2a   :  { %v2489_v58 = vmul.f32 %v4453_v52, %v2487_v48 }
 0xd2b   :  { %v4455_v21 = vpop.eup %4454 }
 0xd2c   :  { %v5809_v62 = vadd.f32 %v2490_v56, %v2489_v58 }
 0xd2e   :  { %4456 = vtanh.f32 %v5809_v62 }
 0xd38   :  { %v4457_v19 = vpop.eup %4456 }
 0xd39   :  { %v2493_v59 = vmul.f32 %v4457_v19, %v4455_v21 }
 0xd3b   :  { %2494 = vst [vmem:[#allocation3] sm:$0x30] %v2493_v59  ;;  %v2495_v11 = vpack.c.bf16 %v2493_v59, %v2493_v59 }
 0xd3d   :  { %v2497_v41 = vrot.slane %v2495_v11, 2 }
 0xd3f   :  { %2532 = vmatmul.mubr.bf16.vlgmr.msra.gmra.mrb[52].mxu0 %v2497_v41  ;;  %2573 = vmatmul.mubr.bf16.vlgmr.msra.gmra.mrb[56].mxu1 %v2497_v41 }
 0xd40   :  { %2630 = vmatpush1.bf16.msra.mxu0 %v5564_v60  ;;  %2671 = vmatpush1.bf16.msra.mxu1 %v5566_v61 }
 0xd41   :  { %2631 = vmatprep.subr.bf16.mxu0 %v5568_v63  ;;  %2672 = vmatprep.subr.bf16.mxu1 %v5570_v12 }
 0xd42   :  { %2661 = vmatprep.mubr.bf16.mxu0 %v4713_v1  ;;  %2702 = vmatprep.mubr.bf16.mxu1 %v4713_v1 }
 0xd44   :  { %2632 = vmatpush1.bf16.msra.mxu0 %v5574_v0  ;;  %2673 = vmatpush1.bf16.msra.mxu1 %v5576_v3 }
 0xd45   :  { %2633 = vmatprep.subr.bf16.mxu0 %v5580_v6  ;;  %2674 = vmatprep.subr.bf16.mxu1 %v5582_v45 }
 0xd48   :  { %2634 = vmatpush1.bf16.msra.mxu0 %v5588_v20  ;;  %2675 = vmatpush1.bf16.msra.mxu1 %v5590_v18 }
 0xd49   :  { %2635 = vmatprep.subr.bf16.mxu0 %v5594_v24  ;;  %2676 = vmatprep.subr.bf16.mxu1 %v5596_v25 }
 0xd4c   :  { %2636 = vmatpush1.bf16.msra.mxu0 %v5600_v4  ;;  %2677 = vmatpush1.bf16.msra.mxu1 %v5602_v7 }
 0xd4d   :  { %2637 = vmatprep.subr.bf16.mxu0 %v5606_v27  ;;  %2678 = vmatprep.subr.bf16.mxu1 %v5608_v28 }
 0xd50   :  { %2638 = vmatpush1.bf16.msra.mxu0 %v5612_v29  ;;  %2679 = vmatpush1.bf16.msra.mxu1 %v5614_v5 }
 0xd51   :  { %2639 = vmatprep.subr.bf16.mxu0 %v5618_v30  ;;  %2680 = vmatprep.subr.bf16.mxu1 %v5620_v8 }
 0xd54   :  { %2640 = vmatpush1.bf16.msra.mxu0 %v5624_v15  ;;  %2681 = vmatpush1.bf16.msra.mxu1 %v5626_v55 }
 0xd55   :  { %2641 = vmatprep.subr.bf16.mxu0 %v5630_v33  ;;  %2682 = vmatprep.subr.bf16.mxu1 %v5632_v34 }
 0xd58   :  { %2642 = vmatpush1.bf16.msra.mxu0 %v5636_v35  ;;  %2683 = vmatpush1.bf16.msra.mxu1 %v5638_v36 }
 0xd59   :  { %2643 = vmatprep.subr.bf16.mxu0 %v5642_v38  ;;  %2684 = vmatprep.subr.bf16.mxu1 %v5644_v40 }
 0xd5c   :  { %2644 = vmatpush1.bf16.msra.mxu0 %v5648_v42  ;;  %2685 = vmatpush1.bf16.msra.mxu1 %v5650_v46 }
 0xd5d   :  { %2744 = vmatprep.subr.bf16.mxu0 %v5553_v31  ;;  %2785 = vmatprep.subr.bf16.mxu1 %v5555_v32 }
 0xe12   :  { %v2533_v23 = vpop.f32.mrb[52].mxu0  ;;  %v2574_v9 = vpop.f32.mrb[56].mxu1 }
 0xe13   :  { %v2585_v26 = vrot.slane %v2533_v23, 2  ;;  %v2535_v44 = vpop.f32.mrb[53].mxu0  ;;  %v2576_v16 = vpop.f32.mrb[57].mxu1  ;;  %v2587_v52 = vrot.slane %v2574_v9, 2  ;;  %v2617_v9 = vrot.slane %v5809_v62, 6 }
 0xe14   :  { %v2586_v13 = vrot.slane %v2535_v44, 2  ;;  %v2537_v47 = vpop.f32.mrb[54].mxu0  ;;  %v2578_v43 = vpop.f32.mrb[58].mxu1  ;;  %v2588_v57 = vrot.slane %v2576_v16, 2 }
 0xe15   :  { %v2593_v51 = vadd.f32 %v2585_v26, %v5713_v39  ;;  %v2538_v50 = vpop.f32.mrb[55].mxu0  ;;  %v2579_v49 = vpop.f32.mrb[59].mxu1  ;;  %v2595_v58 = vadd.f32 %v2587_v52, %v5719_v53 }
 0xe16   :  { %v2594_v22 = vadd.f32 %v2586_v13, %v5715_v10  ;;  %v2596_v21 = vadd.f32 %v2588_v57, %v5722_v17 }
 0xe17   :  { %v3855_v48 = vmul.f32 -1.442695, %v2593_v51  ;;  %v3857_v19 = vmul.f32 -1.442695, %v2595_v58 }
 0xe18   :  { %v3856_v56 = vmul.f32 -1.442695, %v2594_v22 }
 0xe19   :  { %4458 = vpow2.f32 %v3855_v48 }
 0xe1a   :  { %4460 = vpow2.f32 %v3856_v56 }
 0xe1b   :  { %4462 = vtanh.f32 %v2596_v21 }
 0xe1c   :  { %4464 = vpow2.f32 %v3857_v19 }
 0xe23   :  { %v4459_v59 = vpop.eup %4458 }
 0xe24   :  { %v2606_v11 = vadd.f32 1.0, %v4459_v59  ;;  %v4461_v41 = vpop.eup %4460 }
 0xe25   :  { %v2607_v39 = vadd.f32 1.0, %v4461_v41  ;;  %v4463_v10 = vpop.eup %4462 }
 0xe26   :  { %4466 = vrcp.f32 %v2606_v11  ;;  %v4465_v23 = vpop.eup %4464 }
 0xe27   :  { %4468 = vrcp.f32 %v2607_v39  ;;  %v2608_v13 = vadd.f32 1.0, %v4465_v23 }
 0xe29   :  { %4470 = vrcp.f32 %v2608_v13 }
 0xe30   :  { %v4467_v26 = vpop.eup %4466 }
 0xe31   :  { %v2620_v44 = vmul.f32 %v4467_v26, %v4463_v10  ;;  %v4469_v16 = vpop.eup %4468 }
 0xe32   :  { %v2619_v53 = vmul.f32 %v4469_v16, %v2617_v9 }
 0xe33   :  { %v4471_v17 = vpop.eup %4470 }
 0xe34   :  { %v5851_v47 = vadd.f32 %v2620_v44, %v2619_v53 }
 0xe36   :  { %4472 = vtanh.f32 %v5851_v47  ;;  %v2735_v53 = vrot.slane %v5851_v47, 6 }
 0xe40   :  { %v4473_v43 = vpop.eup %4472 }
 0xe41   :  { %v2623_v51 = vmul.f32 %v4473_v43, %v4471_v17 }
 0xe43   :  { %2624 = vst [vmem:[#allocation3] sm:$0xc0] %v2623_v51  ;;  %v2625_v50 = vpack.c.bf16 %v2623_v51, %v2623_v51 }
 0xe45   :  { %v2627_v49 = vrot.slane %v2625_v50, 3 }
 0xe47   :  { %2662 = vmatmul.mubr.bf16.vlgmr.msra.gmra.mrb[56].mxu0 %v2627_v49  ;;  %2703 = vmatmul.mubr.bf16.vlgmr.msra.gmra.mrb[60].mxu1 %v2627_v49 }
 0xe48   :  { %2745 = vmatpush1.bf16.msra.mxu0 %v5564_v60  ;;  %2786 = vmatpush1.bf16.msra.mxu1 %v5566_v61 }
 0xe49   :  { %2746 = vmatprep.subr.bf16.mxu0 %v5568_v63  ;;  %2787 = vmatprep.subr.bf16.mxu1 %v5570_v12 }
 0xe4a   :  { %2776 = vmatprep.mubr.bf16.mxu0 %v4713_v1  ;;  %2817 = vmatprep.mubr.bf16.mxu1 %v4713_v1 }
 0xe4c   :  { %2747 = vmatpush1.bf16.msra.mxu0 %v5574_v0  ;;  %2788 = vmatpush1.bf16.msra.mxu1 %v5576_v3 }
 0xe4d   :  { %2748 = vmatprep.subr.bf16.mxu0 %v5580_v6  ;;  %2789 = vmatprep.subr.bf16.mxu1 %v5582_v45 }
 0xe50   :  { %2749 = vmatpush1.bf16.msra.mxu0 %v5588_v20  ;;  %2790 = vmatpush1.bf16.msra.mxu1 %v5590_v18 }
 0xe51   :  { %2750 = vmatprep.subr.bf16.mxu0 %v5594_v24  ;;  %2791 = vmatprep.subr.bf16.mxu1 %v5596_v25 }
 0xe54   :  { %2751 = vmatpush1.bf16.msra.mxu0 %v5600_v4  ;;  %2792 = vmatpush1.bf16.msra.mxu1 %v5602_v7 }
 0xe55   :  { %2752 = vmatprep.subr.bf16.mxu0 %v5606_v27  ;;  %2793 = vmatprep.subr.bf16.mxu1 %v5608_v28 }
 0xe58   :  { %2753 = vmatpush1.bf16.msra.mxu0 %v5612_v29  ;;  %2794 = vmatpush1.bf16.msra.mxu1 %v5614_v5 }
 0xe59   :  { %2754 = vmatprep.subr.bf16.mxu0 %v5618_v30  ;;  %2795 = vmatprep.subr.bf16.mxu1 %v5620_v8 }
 0xe5c   :  { %2755 = vmatpush1.bf16.msra.mxu0 %v5624_v15  ;;  %2796 = vmatpush1.bf16.msra.mxu1 %v5626_v55 }
 0xe5d   :  { %2756 = vmatprep.subr.bf16.mxu0 %v5630_v33  ;;  %2797 = vmatprep.subr.bf16.mxu1 %v5632_v34 }
 0xe60   :  { %2757 = vmatpush1.bf16.msra.mxu0 %v5636_v35  ;;  %2798 = vmatpush1.bf16.msra.mxu1 %v5638_v36 }
 0xe61   :  { %2758 = vmatprep.subr.bf16.mxu0 %v5642_v38  ;;  %2799 = vmatprep.subr.bf16.mxu1 %v5644_v40 }
 0xe64   :  { %2759 = vmatpush1.bf16.msra.mxu0 %v5648_v42  ;;  %2800 = vmatpush1.bf16.msra.mxu1 %v5650_v46 }
 0xe65   :  { %2874 = vmatprep.subr.bf16.mxu0 %v5553_v31  ;;  %2915 = vmatprep.subr.bf16.mxu1 %v5555_v32 }
 0xf1a   :  { %v2663_v62 = vpop.f32.mrb[56].mxu0  ;;  %v2704_v22 = vpop.f32.mrb[60].mxu1 }
 0xf1b   :  { %v2711_v48 = vadd.f32 %v2663_v62, %v5705_v37  ;;  %v2665_v56 = vpop.f32.mrb[57].mxu0  ;;  %v2706_v52 = vpop.f32.mrb[61].mxu1  ;;  %v2713_v31 = vadd.f32 %v2704_v22, %v5707_v54 }
 0xf1c   :  { %v2712_v57 = vadd.f32 %v2665_v56, %v5709_v14  ;;  %v2667_v58 = vpop.f32.mrb[58].mxu0  ;;  %v2708_v21 = vpop.f32.mrb[62].mxu1  ;;  %v2714_v32 = vadd.f32 %v2706_v52, %v5711_v2 }
 0xf1d   :  { %v3858_v19 = vmul.f32 -1.442695, %v2711_v48  ;;  %v2668_v59 = vpop.f32.mrb[59].mxu0  ;;  %v2709_v11 = vpop.f32.mrb[63].mxu1  ;;  %v3860_v39 = vmul.f32 -1.442695, %v2713_v31 }
 0xf1e   :  { %v3859_v41 = vmul.f32 -1.442695, %v2712_v57  ;;  %v4581_v31 = vld [vmem:[#allocation9] ss:$16 sps:$4 sm:$0xff]  }
 0xf1f   :  { %4474 = vpow2.f32 %v3858_v19 }
 0xf20   :  { %4476 = vpow2.f32 %v3859_v41 }
 0xf21   :  { %4478 = vtanh.f32 %v2714_v32  ;;  %v4582_v32 = vld [vmem:[#allocation9 + $0x8] ss:$16 sps:$4 sm:$0xff]  }
 0xf22   :  { %4480 = vpow2.f32 %v3860_v39  ;;  %v4583_v39 = vld [vmem:[#allocation9 + $0x24] ss:$16 sps:$4 sm:$0xff]  }
 0xf29   :  { %v4475_v10 = vpop.eup %4474 }
 0xf2a   :  { %v2724_v23 = vadd.f32 1.0, %v4475_v10  ;;  %v4477_v26 = vpop.eup %4476  ;;  %v4584_v10 = vld [vmem:[#allocation9 + $0x2c] ss:$16 sps:$4 sm:$0xff]  }
 0xf2b   :  { %v2725_v9 = vadd.f32 1.0, %v4477_v26  ;;  %v4479_v44 = vpop.eup %4478  ;;  %v4586_v26 = vld [vmem:[#allocation9 + $0x28] ss:$16 sps:$4 sm:$0xff]  }
 0xf2c   :  { %4482 = vrcp.f32 %v2724_v23  ;;  %v4481_v16 = vpop.eup %4480  ;;  %v4585_v23 = vld [vmem:[#allocation9 + $0x20] ss:$16 sps:$4 sm:$0xff]  }
 0xf2d   :  { %4484 = vrcp.f32 %v2725_v9  ;;  %v2726_v51 = vadd.f32 1.0, %v4481_v16  ;;  %v4587_v9 = vld [vmem:[#allocation9 + $0x44] ss:$16 sps:$4 sm:$0xff]   ;;  %v4589_v16 = vld [vmem:[#allocation9 + $0x40] ss:$16 sps:$4 sm:$0xff]  }
 0xf2f   :  { %4486 = vrcp.f32 %v2726_v51  ;;  %v4594_v51 = vld [vmem:[#allocation9 + $0x68] ss:$16 sps:$4 sm:$0xff]  }
 0xf36   :  { %v4483_v13 = vpop.eup %4482 }
 0xf37   :  { %v2738_v17 = vmul.f32 %v4483_v13, %v4479_v44  ;;  %v4485_v43 = vpop.eup %4484  ;;  %v4588_v44 = vld [vmem:[#allocation9 + $0x4c] ss:$16 sps:$4 sm:$0xff]   ;;  %v4590_v13 = vld [vmem:[#allocation9 + $0x48] ss:$16 sps:$4 sm:$0xff]  }
 0xf38   :  { %v2737_v50 = vmul.f32 %v4485_v43, %v2735_v53  ;;  %v4591_v53 = vld [vmem:[#allocation9 + $0x64] ss:$16 sps:$4 sm:$0xff]   ;;  %v4593_v43 = vld [vmem:[#allocation9 + $0x60] ss:$16 sps:$4 sm:$0xff]  }
 0xf39   :  { %v4487_v62 = vpop.eup %4486 }
 0xf3a   :  { %v5893_v49 = vadd.f32 %v2738_v17, %v2737_v50  ;;  %v4592_v17 = vld [vmem:[#allocation9 + $0x6c] ss:$16 sps:$4 sm:$0xff]   ;;  %v4595_v50 = vld [vmem:[#allocation9 + $0x84] ss:$16 sps:$4 sm:$0xff]  }
 0xf3c   :  { %4488 = vtanh.f32 %v5893_v49 }
 0xf46   :  { %v4489_v22 = vpop.eup %4488 }
 0xf47   :  { %v2741_v48 = vmul.f32 %v4489_v22, %v4487_v62  ;;  %v4597_v62 = vld [vmem:[#allocation9 + $0x80] ss:$16 sps:$4 sm:$0xff]   ;;  %v4598_v22 = vld [vmem:[#allocation9 + $0x88] ss:$16 sps:$4 sm:$0xff]  }
 0xf49   :  { %2742 = vst [vmem:[#allocation3 + $0x8] sm:$0x3] %v2741_v48  ;;  %v2743_v56 = vpack.c.bf16 %v2741_v48, %v2741_v48  ;;  %v4599_v48 = vld [vmem:[#allocation9 + $0xa4] ss:$16 sps:$4 sm:$0xff]  }
 0xf4b   :  { %2777 = vmatmul.mubr.bf16.vlgmr.msra.gmra.mrb[60].mxu0 %v2743_v56  ;;  %2818 = vmatmul.mubr.bf16.vlgmr.msra.gmra.mrb[64].mxu1 %v2743_v56  ;;  %v4600_v56 = vld [vmem:[#allocation9 + $0xac] ss:$16 sps:$4 sm:$0xff]  }
 0xf4c   :  { %2875 = vmatpush1.bf16.msra.mxu0 %v5564_v60  ;;  %2916 = vmatpush1.bf16.msra.mxu1 %v5566_v61  ;;  %v4579_v60 = vld [vmem:[#allocation9 + $0x4] ss:$16 sps:$4 sm:$0xff]   ;;  %v4580_v61 = vld [vmem:[#allocation9 + $0xc] ss:$16 sps:$4 sm:$0xff]  }
 0xf4d   :  { %2876 = vmatprep.subr.bf16.mxu0 %v5568_v63  ;;  %2917 = vmatprep.subr.bf16.mxu1 %v5570_v12 }
 0xf4e   :  { %2906 = vmatprep.mubr.bf16.mxu0 %v4713_v1  ;;  %2947 = vmatprep.mubr.bf16.mxu1 %v4713_v1 }
 0xf50   :  { %2877 = vmatpush1.bf16.msra.mxu0 %v5574_v0  ;;  %2918 = vmatpush1.bf16.msra.mxu1 %v5576_v3 }
 0xf51   :  { %2878 = vmatprep.subr.bf16.mxu0 %v5580_v6  ;;  %2919 = vmatprep.subr.bf16.mxu1 %v5582_v45 }
 0xf54   :  { %2879 = vmatpush1.bf16.msra.mxu0 %v5588_v20  ;;  %2920 = vmatpush1.bf16.msra.mxu1 %v5590_v18 }
 0xf55   :  { %2880 = vmatprep.subr.bf16.mxu0 %v5594_v24  ;;  %2921 = vmatprep.subr.bf16.mxu1 %v5596_v25 }
 0xf58   :  { %2881 = vmatpush1.bf16.msra.mxu0 %v5600_v4  ;;  %2922 = vmatpush1.bf16.msra.mxu1 %v5602_v7 }
 0xf59   :  { %2882 = vmatprep.subr.bf16.mxu0 %v5606_v27  ;;  %2923 = vmatprep.subr.bf16.mxu1 %v5608_v28 }
 0xf5c   :  { %2883 = vmatpush1.bf16.msra.mxu0 %v5612_v29  ;;  %2924 = vmatpush1.bf16.msra.mxu1 %v5614_v5 }
 0xf5d   :  { %2884 = vmatprep.subr.bf16.mxu0 %v5618_v30  ;;  %2925 = vmatprep.subr.bf16.mxu1 %v5620_v8 }
 0xf60   :  { %2885 = vmatpush1.bf16.msra.mxu0 %v5624_v15  ;;  %2926 = vmatpush1.bf16.msra.mxu1 %v5626_v55 }
 0xf61   :  { %2886 = vmatprep.subr.bf16.mxu0 %v5630_v33  ;;  %2927 = vmatprep.subr.bf16.mxu1 %v5632_v34 }
 0xf64   :  { %2887 = vmatpush1.bf16.msra.mxu0 %v5636_v35  ;;  %2928 = vmatpush1.bf16.msra.mxu1 %v5638_v36 }
 0xf65   :  { %2888 = vmatprep.subr.bf16.mxu0 %v5642_v38  ;;  %2929 = vmatprep.subr.bf16.mxu1 %v5644_v40 }
 0xf68   :  { %2889 = vmatpush1.bf16.msra.mxu0 %v5648_v42  ;;  %2930 = vmatpush1.bf16.msra.mxu1 %v5650_v46  ;;  %v2862_v42 = vrot.slane %v5893_v49, 6  ;;  %v4596_v49 = vld [vmem:[#allocation9 + $0x8c] ss:$16 sps:$4 sm:$0xff]  }
 0xf69   :  { %3004 = vmatprep.subr.bf16.mxu0 %v4579_v60  ;;  %3045 = vmatprep.subr.bf16.mxu1 %v4580_v61  ;;  %v4601_v60 = vld [vmem:[#allocation9 + $0xa0] ss:$16 sps:$4 sm:$0xff]   ;;  %v4602_v61 = vld [vmem:[#allocation9 + $0xa8] ss:$16 sps:$4 sm:$0xff]  }
0x101e   :  { %v2778_v63 = vpop.f32.mrb[60].mxu0  ;;  %v2819_v12 = vpop.f32.mrb[64].mxu1 }
0x101f   :  { %v2830_v0 = vrot.slane %v2778_v63, 6  ;;  %v2780_v3 = vpop.f32.mrb[61].mxu0  ;;  %v2821_v6 = vpop.f32.mrb[65].mxu1  ;;  %v2832_v29 = vrot.slane %v2819_v12, 6  ;;  %v4603_v63 = vld [vmem:[#allocation9 + $0xc4] ss:$16 sps:$4 sm:$0xff]  }
0x1020   :  { %v2831_v45 = vrot.slane %v2780_v3, 6  ;;  %v2782_v20 = vpop.f32.mrb[62].mxu0  ;;  %v2823_v18 = vpop.f32.mrb[66].mxu1  ;;  %v2833_v5 = vrot.slane %v2821_v6, 6  ;;  %v4604_v12 = vld [vmem:[#allocation9 + $0xcc] ss:$16 sps:$4 sm:$0xff]  }
0x1021   :  { %v2838_v24 = vadd.f32 %v2830_v0, %v5705_v37  ;;  %v2783_v25 = vpop.f32.mrb[63].mxu0  ;;  %v2824_v4 = vpop.f32.mrb[67].mxu1  ;;  %v2840_v30 = vadd.f32 %v2832_v29, %v5707_v54  ;;  %v4605_v0 = vld [vmem:[#allocation9 + $0xc0] ss:$16 sps:$4 sm:$0xff]   ;;  %v4606_v3 = vld [vmem:[#allocation9 + $0xc8] ss:$16 sps:$4 sm:$0xff]  }
0x1022   :  { %v2839_v7 = vadd.f32 %v2831_v45, %v5709_v14  ;;  %v2841_v8 = vadd.f32 %v2833_v5, %v5711_v2  ;;  %v4607_v6 = vld [vmem:[#allocation9 + $0xe4] ss:$16 sps:$4 sm:$0xff]   ;;  %v4608_v45 = vld [vmem:[#allocation9 + $0xec] ss:$16 sps:$4 sm:$0xff]   ;;  %v4609_v20 = vld [vmem:[#allocation9 + $0xe0] ss:$16 sps:$4 sm:$0xff]  }
0x1023   :  { %v3861_v27 = vmul.f32 -1.442695, %v2838_v24  ;;  %v3863_v15 = vmul.f32 -1.442695, %v2840_v30  ;;  %v4610_v18 = vld [vmem:[#allocation9 + $0xe8] ss:$16 sps:$4 sm:$0xff]  }
0x1024   :  { %v3862_v28 = vmul.f32 -1.442695, %v2839_v7  ;;  %v6070_v24 = vmov 0.0  }
0x1025   :  { %4490 = vpow2.f32 %v3861_v27 }
0x1026   :  { %4492 = vpow2.f32 %v3862_v28 }
0x1027   :  { %4494 = vtanh.f32 %v2841_v8 }
0x1028   :  { %4496 = vpow2.f32 %v3863_v15 }
0x102f   :  { %v4491_v55 = vpop.eup %4490 }
0x1030   :  { %v2851_v33 = vadd.f32 1.0, %v4491_v55  ;;  %v4493_v34 = vpop.eup %4492 }
0x1031   :  { %v2852_v35 = vadd.f32 1.0, %v4493_v34  ;;  %v4495_v36 = vpop.eup %4494 }
0x1032   :  { %4498 = vrcp.f32 %v2851_v33  ;;  %v4497_v38 = vpop.eup %4496 }
0x1033   :  { %4500 = vrcp.f32 %v2852_v35  ;;  %v2853_v52 = vadd.f32 1.0, %v4497_v38 }
0x1035   :  { %4502 = vrcp.f32 %v2853_v52 }
0x103c   :  { %v4499_v40 = vpop.eup %4498 }
0x103d   :  { %v2865_v46 = vmul.f32 %v4499_v40, %v4495_v36  ;;  %v4501_v47 = vpop.eup %4500 }
0x103e   :  { %v2864_v57 = vmul.f32 %v4501_v47, %v2862_v42 }
0x103f   :  { %v4503_v21 = vpop.eup %4502 }
0x1040   :  { %v5933_v58 = vadd.f32 %v2865_v46, %v2864_v57 }
0x1042   :  { %4504 = vtanh.f32 %v5933_v58 }
0x104c   :  { %v4505_v19 = vpop.eup %4504 }
0x104d   :  { %v2868_v59 = vmul.f32 %v4505_v19, %v4503_v21 }
0x104f   :  { %2869 = vst [vmem:[#allocation3 + $0x8] sm:$0xc] %v2868_v59  ;;  %v2870_v11 = vpack.c.bf16 %v2868_v59, %v2868_v59 }
0x1051   :  { %v2872_v41 = vrot.slane %v2870_v11, 1 }
0x1053   :  { %2907 = vmatmul.mubr.bf16.vlgmr.msra.gmra.mrb[64].mxu0 %v2872_v41  ;;  %2948 = vmatmul.mubr.bf16.vlgmr.msra.gmra.mrb[68].mxu1 %v2872_v41  ;;  %v2992_v41 = vrot.slane %v5933_v58, 6  ;;  %v4252_v58 = vld [vmem:[#allocation10 + $0x4] ss:$12 sps:$4 sm:$0xff]  }
0x1054   :  { %3005 = vmatpush1.bf16.msra.mxu0 %v4581_v31  ;;  %3046 = vmatpush1.bf16.msra.mxu1 %v4582_v32 }
0x1055   :  { %3006 = vmatprep.subr.bf16.mxu0 %v4583_v39  ;;  %3047 = vmatprep.subr.bf16.mxu1 %v4584_v10 }
0x1056   :  { %3036 = vmatprep.mubr.bf16.mxu0 %v4713_v1  ;;  %3077 = vmatprep.mubr.bf16.mxu1 %v4713_v1 }
0x1058   :  { %3007 = vmatpush1.bf16.msra.mxu0 %v4585_v23  ;;  %3048 = vmatpush1.bf16.msra.mxu1 %v4586_v26 }
0x1059   :  { %3008 = vmatprep.subr.bf16.mxu0 %v4587_v9  ;;  %3049 = vmatprep.subr.bf16.mxu1 %v4588_v44 }
0x105c   :  { %3009 = vmatpush1.bf16.msra.mxu0 %v4589_v16  ;;  %3050 = vmatpush1.bf16.msra.mxu1 %v4590_v13 }
0x105d   :  { %3010 = vmatprep.subr.bf16.mxu0 %v4591_v53  ;;  %3051 = vmatprep.subr.bf16.mxu1 %v4592_v17  ;;  %v4250_v53 = vld [vmem:[#allocation10] ss:$12 sps:$4 sm:$0xff]   ;;  %v4253_v17 = vld [vmem:[#allocation10 + $0x8] ss:$12 sps:$4 sm:$0xff]  }
0x1060   :  { %3011 = vmatpush1.bf16.msra.mxu0 %v4593_v43  ;;  %3052 = vmatpush1.bf16.msra.mxu1 %v4594_v51  ;;  %v4256_v43 = vld [vmem:[#allocation10 + $0x1c] ss:$12 sps:$4 sm:$0xff]   ;;  %v4254_v51 = vld [vmem:[#allocation10 + $0x18] ss:$12 sps:$4 sm:$0xff]  }
0x1061   :  { %3012 = vmatprep.subr.bf16.mxu0 %v4595_v50  ;;  %3053 = vmatprep.subr.bf16.mxu1 %v4596_v49  ;;  %v4257_v50 = vld [vmem:[#allocation10 + $0x20] ss:$12 sps:$4 sm:$0xff]  }
0x1062   :  { %v4260_v49 = vld [vmem:[#allocation10 + $0x34] ss:$12 sps:$4 sm:$0xff]  }
0x1064   :  { %3013 = vmatpush1.bf16.msra.mxu0 %v4597_v62  ;;  %3054 = vmatpush1.bf16.msra.mxu1 %v4598_v22  ;;  %v4261_v62 = vld [vmem:[#allocation10 + $0x38] ss:$12 sps:$4 sm:$0xff]  }
0x1065   :  { %3014 = vmatprep.subr.bf16.mxu0 %v4599_v48  ;;  %3055 = vmatprep.subr.bf16.mxu1 %v4600_v56  ;;  %v4264_v22 = vld [vmem:[#allocation10 + $0x4c] ss:$12 sps:$4 sm:$0xff]   ;;  %v4262_v48 = vld [vmem:[#allocation10 + $0x48] ss:$12 sps:$4 sm:$0xff]   ;;  %v4265_v56 = vld [vmem:[#allocation10 + $0x50] ss:$12 sps:$4 sm:$0xff]  }
0x1068   :  { %3015 = vmatpush1.bf16.msra.mxu0 %v4601_v60  ;;  %3056 = vmatpush1.bf16.msra.mxu1 %v4602_v61  ;;  %v4268_v60 = vld [vmem:[#allocation10 + $0x64] ss:$12 sps:$4 sm:$0xff]   ;;  %v4266_v61 = vld [vmem:[#allocation10 + $0x60] ss:$12 sps:$4 sm:$0xff]  }
0x1069   :  { %3016 = vmatprep.subr.bf16.mxu0 %v4603_v63  ;;  %3057 = vmatprep.subr.bf16.mxu1 %v4604_v12  ;;  %v4269_v63 = vld [vmem:[#allocation10 + $0x68] ss:$12 sps:$4 sm:$0xff]  }
0x106a   :  { %v4272_v12 = vld [vmem:[#allocation10 + $0x7c] ss:$12 sps:$4 sm:$0xff]  }
0x106c   :  { %3017 = vmatpush1.bf16.msra.mxu0 %v4605_v0  ;;  %3058 = vmatpush1.bf16.msra.mxu1 %v4606_v3  ;;  %v4270_v0 = vld [vmem:[#allocation10 + $0x78] ss:$12 sps:$4 sm:$0xff]   ;;  %v4273_v3 = vld [vmem:[#allocation10 + $0x80] ss:$12 sps:$4 sm:$0xff]  }
0x106d   :  { %3018 = vmatprep.subr.bf16.mxu0 %v4607_v6  ;;  %3059 = vmatprep.subr.bf16.mxu1 %v4608_v45  ;;  %v4274_v6 = vld [vmem:[#allocation10 + $0x90] ss:$12 sps:$4 sm:$0xff]   ;;  %v4276_v45 = vld [vmem:[#allocation10 + $0x94] ss:$12 sps:$4 sm:$0xff]  }
0x1070   :  { %3019 = vmatpush1.bf16.msra.mxu0 %v4609_v20  ;;  %3060 = vmatpush1.bf16.msra.mxu1 %v4610_v18  ;;  %v4277_v20 = vld [vmem:[#allocation10 + $0x98] ss:$12 sps:$4 sm:$0xff]  }
0x1071   :  { %3960 = vmatprep.subr.bf16.mxu1 %v6070_v24  ;;  %3293 = vmatprep.subr.bf16.mxu0 %v4252_v58  ;;  %v4280_v18 = vld [vmem:[#allocation10 + $0xac] ss:$12 sps:$4 sm:$0xff]  }
0x1126   :  { %v2908_v25 = vpop.f32.mrb[64].mxu0  ;;  %v2949_v4 = vpop.f32.mrb[68].mxu1 }
0x1127   :  { %v2960_v7 = vrot.slane %v2908_v25, 4  ;;  %v2910_v27 = vpop.f32.mrb[65].mxu0  ;;  %v2951_v28 = vpop.f32.mrb[69].mxu1  ;;  %v2962_v36 = vrot.slane %v2949_v4, 4  ;;  %v4278_v25 = vld [vmem:[#allocation10 + $0xa8] ss:$12 sps:$4 sm:$0xff]  }
0x1128   :  { %v2961_v29 = vrot.slane %v2910_v27, 4  ;;  %v2912_v5 = vpop.f32.mrb[66].mxu0  ;;  %v2953_v30 = vpop.f32.mrb[70].mxu1  ;;  %v2963_v38 = vrot.slane %v2951_v28, 4  ;;  %v4281_v4 = vld [vmem:[#allocation10 + $0xb0] ss:$12 sps:$4 sm:$0xff]  }
0x1129   :  { %v2968_v8 = vadd.f32 %v2960_v7, %v5705_v37  ;;  %v2913_v15 = vpop.f32.mrb[67].mxu0  ;;  %v2954_v55 = vpop.f32.mrb[71].mxu1  ;;  %v2970_v40 = vadd.f32 %v2962_v36, %v5707_v54 }
0x112a   :  { %v2969_v33 = vadd.f32 %v2961_v29, %v5709_v14  ;;  %v2971_v42 = vadd.f32 %v2963_v38, %v5711_v2 }
0x112b   :  { %v3864_v34 = vmul.f32 -1.442695, %v2968_v8  ;;  %v3866_v46 = vmul.f32 -1.442695, %v2970_v40 }
0x112c   :  { %v3865_v35 = vmul.f32 -1.442695, %v2969_v33 }
0x112d   :  { %4506 = vpow2.f32 %v3864_v34 }
0x112e   :  { %4508 = vpow2.f32 %v3865_v35 }
0x112f   :  { %4510 = vtanh.f32 %v2971_v42 }
0x1130   :  { %4512 = vpow2.f32 %v3866_v46 }
0x1137   :  { %v4507_v47 = vpop.eup %4506 }
0x1138   :  { %v2981_v52 = vadd.f32 1.0, %v4507_v47  ;;  %v4509_v57 = vpop.eup %4508 }
0x1139   :  { %v2982_v21 = vadd.f32 1.0, %v4509_v57  ;;  %v4511_v19 = vpop.eup %4510 }
0x113a   :  { %4514 = vrcp.f32 %v2981_v52  ;;  %v4513_v59 = vpop.eup %4512 }
0x113b   :  { %4516 = vrcp.f32 %v2982_v21  ;;  %v2983_v39 = vadd.f32 1.0, %v4513_v59 }
0x113d   :  { %4518 = vrcp.f32 %v2983_v39 }
0x1144   :  { %v4515_v11 = vpop.eup %4514 }
0x1145   :  { %v2995_v31 = vmul.f32 %v4515_v11, %v4511_v19  ;;  %v4517_v32 = vpop.eup %4516 }
0x1146   :  { %v2994_v10 = vmul.f32 %v4517_v32, %v2992_v41 }
0x1147   :  { %v4519_v26 = vpop.eup %4518 }
0x1148   :  { %v5944_v23 = vadd.f32 %v2995_v31, %v2994_v10 }
0x114a   :  { %4520 = vtanh.f32 %v5944_v23  ;;  %v3122_v41 = vrot.slane %v5944_v23, 6  ;;  %v4717_v23 = vmov 0.0|0.0  }
0x1154   :  { %v4521_v9 = vpop.eup %4520 }
0x1155   :  { %v2998_v44 = vmul.f32 %v4521_v9, %v4519_v26 }
0x1157   :  { %2999 = vst [vmem:[#allocation3 + $0x8] sm:$0x30] %v2998_v44  ;;  %v3000_v16 = vpack.c.bf16 %v2998_v44, %v2998_v44  ;;  %v3130_v44 = vld [vmem:[#allocation3] sm:$0xff] }
0x1159   :  { %v3002_v13 = vrot.slane %v3000_v16, 2 }
0x115b   :  { %3037 = vmatmul.mubr.bf16.vlgmr.msra.gmra.mrb[68].mxu0 %v3002_v13  ;;  %3078 = vmatmul.mubr.bf16.vlgmr.msra.gmra.mrb[72].mxu1 %v3002_v13 }
0x115c   :  { %3325 = vmatprep.mubr.bf16.mxu0 %v4713_v1  ;;  %3976 = vmatprep.mubr.msk.bf16.mxu1 %vm4715_vm0, %v6070_v24  ;;  %v4258_v1 = vld [vmem:[#allocation10 + $0x30] ss:$12 sps:$4 sm:$0xff]  }
0x115d   :  { %3294 = vmatpush1.bf16.msra.mxu0 %v4250_v53  ;;  %3961 = vmatpush3.bf16.msra.mxu1 %v4253_v17 }
0x115e   :  { %3962 = vmatprep.subr.bf16.mxu1 %v6070_v24  ;;  %3295 = vmatprep.subr.bf16.mxu0 %v4256_v43 }
0x1161   :  { %3296 = vmatpush1.bf16.msra.mxu0 %v4254_v51  ;;  %3963 = vmatpush3.bf16.msra.mxu1 %v4257_v50 }
0x1162   :  { %3964 = vmatprep.subr.bf16.mxu1 %v6070_v24  ;;  %3297 = vmatprep.subr.bf16.mxu0 %v4260_v49 }
0x1165   :  { %3298 = vmatpush1.bf16.msra.mxu0 %v4258_v1  ;;  %3965 = vmatpush3.bf16.msra.mxu1 %v4261_v62 }
0x1166   :  { %3966 = vmatprep.subr.bf16.mxu1 %v6070_v24  ;;  %3299 = vmatprep.subr.bf16.mxu0 %v4264_v22 }
0x1169   :  { %3300 = vmatpush1.bf16.msra.mxu0 %v4262_v48  ;;  %3967 = vmatpush3.bf16.msra.mxu1 %v4265_v56 }
0x116a   :  { %3968 = vmatprep.subr.bf16.mxu1 %v6070_v24  ;;  %3301 = vmatprep.subr.bf16.mxu0 %v4268_v60  ;;  %v3454_v60 = vld [vmem:[%s6063_s13] sm:$0xff] }
0x116d   :  { %3302 = vmatpush1.bf16.msra.mxu0 %v4266_v61  ;;  %3969 = vmatpush3.bf16.msra.mxu1 %v4269_v63 }
0x116e   :  { %3970 = vmatprep.subr.bf16.mxu1 %v6070_v24  ;;  %3303 = vmatprep.subr.bf16.mxu0 %v4272_v12  ;;  %v3455_v12 = vld [vmem:[%s6063_s13 + $0x8] sm:$0xff] }
0x1171   :  { %3304 = vmatpush1.bf16.msra.mxu0 %v4270_v0  ;;  %3971 = vmatpush3.bf16.msra.mxu1 %v4273_v3 }
0x1172   :  { %3972 = vmatprep.subr.bf16.mxu1 %v6070_v24  ;;  %3305 = vmatprep.subr.bf16.mxu0 %v4276_v45 }
0x1175   :  { %3306 = vmatpush1.bf16.msra.mxu0 %v4274_v6  ;;  %3973 = vmatpush3.bf16.msra.mxu1 %v4277_v20 }
0x1176   :  { %3307 = vmatprep.subr.bf16.mxu0 %v4280_v18  ;;  %3974 = vmatprep.subr.bf16.mxu1 %v6070_v24 }
0x1179   :  { %3308 = vmatpush1.bf16.msra.mxu0 %v4278_v25  ;;  %3975 = vmatpush3.bf16.msra.mxu1 %v4281_v4 }
0x117a   :  { %4036 = vmatprep.subr.bf16.mxu0 %v4717_v23 }
0x122e   :  { %v3038_v7 = vpop.f32.mrb[68].mxu0  ;;  %v3079_v27 = vpop.f32.mrb[72].mxu1 }
0x122f   :  { %v3090_v28 = vrot.slane %v3038_v7, 2  ;;  %v3040_v29 = vpop.f32.mrb[69].mxu0  ;;  %v3081_v5 = vpop.f32.mrb[73].mxu1  ;;  %v3092_v40 = vrot.slane %v3079_v27, 2 }
0x1230   :  { %v3091_v30 = vrot.slane %v3040_v29, 2  ;;  %v3042_v8 = vpop.f32.mrb[70].mxu0  ;;  %v3083_v15 = vpop.f32.mrb[74].mxu1  ;;  %v3093_v42 = vrot.slane %v3081_v5, 2 }
0x1231   :  { %v3098_v55 = vadd.f32 %v3090_v28, %v5705_v37  ;;  %v3043_v33 = vpop.f32.mrb[71].mxu0  ;;  %v3084_v34 = vpop.f32.mrb[75].mxu1  ;;  %v3100_v46 = vadd.f32 %v3092_v40, %v5707_v54 }
0x1232   :  { %v3099_v35 = vadd.f32 %v3091_v30, %v5709_v14  ;;  %v3101_v47 = vadd.f32 %v3093_v42, %v5711_v2 }
0x1233   :  { %v3867_v36 = vmul.f32 -1.442695, %v3098_v55  ;;  %v3869_v52 = vmul.f32 -1.442695, %v3100_v46 }
0x1234   :  { %v3868_v38 = vmul.f32 -1.442695, %v3099_v35 }
0x1235   :  { %4522 = vpow2.f32 %v3867_v36 }
0x1236   :  { %4524 = vpow2.f32 %v3868_v38 }
0x1237   :  { %4526 = vtanh.f32 %v3101_v47 }
0x1238   :  { %4528 = vpow2.f32 %v3869_v52 }
0x123f   :  { %v4523_v57 = vpop.eup %4522 }
0x1240   :  { %v3111_v21 = vadd.f32 1.0, %v4523_v57  ;;  %v4525_v19 = vpop.eup %4524  ;;  %v3490_v57 = vld [vmem:[%s6064_s14] sm:$0x3] }
0x1241   :  { %v3112_v37 = vadd.f32 1.0, %v4525_v19  ;;  %v4527_v14 = vpop.eup %4526 }
0x1242   :  { %4530 = vrcp.f32 %v3111_v21  ;;  %v4529_v59 = vpop.eup %4528 }
0x1243   :  { %4532 = vrcp.f32 %v3112_v37  ;;  %v3113_v39 = vadd.f32 1.0, %v4529_v59 }
0x1245   :  { %4534 = vrcp.f32 %v3113_v39  ;;  %v3599_v39 = vld [vmem:[%s6061_s11 + $0x18] sm:$0xff] }
0x124c   :  { %v4531_v11 = vpop.eup %4530 }
0x124d   :  { %v3125_v31 = vmul.f32 %v4531_v11, %v4527_v14  ;;  %v4533_v32 = vpop.eup %4532  ;;  %v3596_v11 = vld [vmem:[%s6061_s11] sm:$0xff] }
0x124e   :  { %v3124_v54 = vmul.f32 %v4533_v32, %v3122_v41  ;;  %v3597_v41 = vld [vmem:[%s6061_s11 + $0x8] sm:$0xff] }
0x124f   :  { %v4535_v2 = vpop.eup %4534  ;;  %v4037_v32 = vpack.c.bf16 %v3597_v41, %v3596_v11 }
0x1250   :  { %v3126_v10 = vadd.f32 %v3125_v31, %v3124_v54  ;;  %v3598_v31 = vld [vmem:[%s6061_s11 + $0x10] sm:$0xff] }
0x1251   :  { %v4040_v54 = vpack.c.bf16 %v3599_v39, %v3598_v31 }
0x1252   :  { %4536 = vtanh.f32 %v3126_v10  ;;  %v3600_v10 = vld [vmem:[%s6061_s11 + $0x20] sm:$0xff] }
0x125c   :  { %v4537_v26 = vpop.eup %4536 }
0x125d   :  { %v3128_v9 = vmul.f32 %v4537_v26, %v4535_v2  ;;  %v3601_v2 = vld [vmem:[%s6061_s11 + $0x28] sm:$0xff] }
0x125e   :  { %v4043_v26 = vpack.c.bf16 %v3601_v2, %v3600_v10 }
0x125f   :  { %3129 = vst [vmem:[#allocation3 + $0x8] sm:$0xc0] %v3128_v9 }
0x1266   :  { %v3131_v16 = vld [vmem:[#allocation3 + $0x8] sm:$0xff] }
0x1267   :  { %v3132_v13 = vpack.c.bf16 %v3131_v16, %v3130_v44 }
0x1269   :  { %3326 = vmatmul.mubr.bf16.vlgmr.msra.gmra.mrb[72].mxu0 %v3132_v13  ;;  %3977 = vmatmul.mubr.bf16.vlgmr.msra.gmra.mrb[76].mxu1 %v3132_v13 }
0x126a   :  { %4026 = vmatprep.mubr.msk.f32.mxu0 %vm4715_vm0, %v6070_v24  ;;  %4038 = vmatpush3.bf16.msra.mxu0 %v4037_v32 }
0x126b   :  { %4039 = vmatprep.subr.bf16.mxu0 %v4717_v23 }
0x126e   :  { %4041 = vmatpush3.bf16.msra.mxu0 %v4040_v54 }
0x126f   :  { %4042 = vmatprep.subr.bf16.mxu0 %v4717_v23 }
0x1272   :  { %4044 = vmatpush3.bf16.msra.mxu0 %v4043_v26 }
0x1273   :  { %4045 = vmatprep.subr.bf16.mxu0 %v4717_v23 }
0x133c   :  { %v3327_v58 = vpop.f32.mrb[72].mxu0  ;;  %v3370_v53 = vpop.f32.mrb[76].mxu1 }
0x133d   :  { %v3329_v17 = vpop.f32.mrb[73].mxu0  ;;  %v3978_v43 = vpop.f32.mrb[77].mxu1  ;;  %3984 = vmatprep.mubr.f32.mxu1 %v3327_v58 }
0x133e   :  { %v3331_v51 = vpop.f32.mrb[74].mxu0  ;;  %v3373_v50 = vpop.f32.mrb[78].mxu1 }
0x133f   :  { %v4034_v49 = vpack.c.bf16 %v3373_v50, %v3370_v53  ;;  %v3333_v1 = vpop.f32.mrb[75].mxu0  ;;  %v3979_v62 = vpop.f32.mrb[79].mxu1  ;;  %v3602_v53 = vld [vmem:[%s6061_s11 + $0x30] sm:$0xff]  ;;  %v3605_v50 = vld [vmem:[%s6061_s11 + $0x48] sm:$0xff] }
0x1340   :  { %v4029_v22 = vpack.c.bf16 %v3333_v1, %v3329_v17  ;;  %v3603_v17 = vld [vmem:[%s6061_s11 + $0x38] sm:$0xff]  ;;  %v3606_v1 = vld [vmem:[%s6061_s11 + $0x50] sm:$0xff] }
0x1341   :  { %v4046_v43 = vpack.c.bf16 %v3603_v17, %v3602_v53  ;;  %v3607_v62 = vld [vmem:[%s6061_s11 + $0x58] sm:$0xff] }
0x1342   :  { %4030 = vmatprep.subr.bf16.mxu1 %v4029_v22 }
0x1343   :  { %4032 = vmatpush3.bf16.xpose.msra.mxu1 %v4029_v22  ;;  %4047 = vmatpush3.bf16.msra.mxu0 %v4046_v43  ;;  %v4052_v22 = vpack.c.bf16 %v3607_v62, %v3606_v1 }
0x1344   :  { %4033 = vmatprep.subr.bf16.mxu1 %v4717_v23  ;;  %4048 = vmatprep.subr.bf16.mxu0 %v4717_v23 }
0x134a   :  { %3985 = vmatmul.mubr.f32.vlgmr.msra.gmra.mrb[80].mxu1 %v3331_v51  ;;  %v3604_v51 = vld [vmem:[%s6061_s11 + $0x40] sm:$0xff] }
0x134b   :  { %4035 = vmatpush3.bf16.msra.mxu1 %v4034_v49  ;;  %3991 = vmatprep.mubr.msk.f32.mxu1 %vm4715_vm0, %v6070_v24  ;;  %v4049_v49 = vpack.c.bf16 %v3605_v50, %v3604_v51 }
0x134d   :  { %4050 = vmatpush3.bf16.msra.mxu0 %v4049_v49 }
0x134e   :  { %4051 = vmatprep.subr.bf16.mxu0 %v4717_v23 }
0x1351   :  { %4053 = vmatpush3.bf16.msra.mxu0 %v4052_v22 }
0x1352   :  { %4054 = vmatprep.subr.bf16.mxu0 %v4717_v23 }
0x141d   :  { %v3986_v48 = vpop.f32.mrb[80].mxu1 }
0x141e   :  { %v3443_v56 = vpop.f32.mrb[81].mxu1  ;;  %v3453_v61 = vmul.f32 0.088388346, %v3986_v48  ;;  %v3608_v48 = vld [vmem:[%s6061_s11 + $0x60] sm:$0xff] }
0x141f   :  { %v3452_v63 = vmul.f32 0.088388346, %v3443_v56  ;;  %v3609_v56 = vld [vmem:[%s6061_s11 + $0x68] sm:$0xff] }
0x1420   :  { %v3457_v6 = vadd.f32 %v3455_v12, %v3453_v61  ;;  %v3610_v61 = vld [vmem:[%s6061_s11 + $0x70] sm:$0xff] }
0x1421   :  { %v3456_v0 = vadd.f32 %v3454_v60, %v3452_v63  ;;  %v4055_v60 = vpack.c.bf16 %v3609_v56, %v3608_v48  ;;  %v3611_v63 = vld [vmem:[%s6061_s11 + $0x78] sm:$0xff] }
0x1422   :  { %v3462_v24 = vsel %vm3458_vm5, %v3457_v6, -inf  ;;  %v4058_v12 = vpack.c.bf16 %v3611_v63, %v3610_v61 }
0x1423   :  { %v3459_v3 = vsel %vm3458_vm5, %v3456_v0, -inf  ;;  %4056 = vmatpush3.bf16.msra.mxu0 %v4055_v60 }
0x1424   :  { %3460 = vmax.xlane.f32.xlu1 %v3459_v3  ;;  %4057 = vmatprep.subr.bf16.mxu0 %v4717_v23 }
0x1427   :  { %4059 = vmatpush3.bf16.msra.mxu0 %v4058_v12 }
0x1428   :  { %3463 = vmax.xlane.f32.xlu1 %v3462_v24 }
0x14b1   :  { %v3461_v45 = vpop.xlane.xlu1 %3460 }
0x14b2   :  { %v3465_v20 = vsub.f32 %v3456_v0, %v3461_v45  ;;  %v3895_v45 = vld [vmem:[%s6059_s9] ss:$0 sm:$0xff] }
0x14b4   :  { %v3467_v18 = vmul.f32 1.442695, %v3465_v20 }
0x14b5   :  { %v3464_v25 = vpop.xlane.xlu1 %3463 }
0x14b6   :  { %4538 = vpow2.f32 %v3467_v18  ;;  %v3466_v4 = vsub.f32 %v3457_v6, %v3464_v25  ;;  %v3896_v18 = vld [vmem:[%s6060_s10] ss:$0 sm:$0xff] }
0x14b8   :  { %v3469_v7 = vmul.f32 1.442695, %v3466_v4 }
0x14ba   :  { %4540 = vpow2.f32 %v3469_v7  ;;  %v3897_v7 = vld [vmem:[#allocation4] ss:$0 sm:$0xff] }
0x14c0   :  { %v4539_v27 = vpop.eup %4538 }
0x14c1   :  { %v3471_v28 = vsel %vm3458_vm5, %v4539_v27, 0.0 }
0x14c2   :  { %3472 = vadd.xlane.f32.xlu0 %v3471_v28 }
0x14c4   :  { %v4541_v29 = vpop.eup %4540 }
0x14c5   :  { %v3474_v5 = vsel %vm3458_vm5, %v4541_v29, 0.0 }
0x14c6   :  { %3475 = vadd.xlane.f32.xlu1 %v3474_v5 }
0x154f   :  { %v3473_v30 = vpop.xlane.xlu0 %3472 }
0x1550   :  { %4542 = vrcp.f32 %v3473_v30 }
0x1553   :  { %v3476_v8 = vpop.xlane.xlu1 %3475 }
0x1554   :  { %4544 = vrcp.f32 %v3476_v8 }
0x155a   :  { %v4543_v15 = vpop.eup %4542 }
0x155b   :  { %v3478_v55 = vmul.f32 %v4543_v15, %v4539_v27 }
0x155d   :  { %v3481_v35 = vsel %vm3458_vm5, %v3478_v55, 0.0 }
0x155e   :  { %v4545_v33 = vpop.eup %4544 }
0x155f   :  { %v3480_v34 = vmul.f32 %v4545_v33, %v4541_v29 }
0x1561   :  { %v3482_v36 = vsel %vm3458_vm5, %v3480_v34, 0.0 }
0x1562   :  { %v3483_v38 = vadd.f32 %v3482_v36, %v3481_v35 }
0x1564   :  { %v3484_v40 = vrot.slane %v3483_v38, 4 }
0x1566   :  { %v3485_v42 = vadd.f32 %v3484_v40, %v3483_v38 }
0x1568   :  { %v3486_v46 = vrot.slane %v3485_v42, 2 }
0x156a   :  { %v3487_v47 = vadd.f32 %v3486_v46, %v3485_v42 }
0x156c   :  { %v3488_v52 = vrot.slane %v3487_v47, 1 }
0x156e   :  { %v3489_v21 = vadd.f32 %v3488_v52, %v3487_v47 }
0x1570   :  { %v3491_v19 = vmul.f32 %v3490_v57, %v3489_v21 }
0x1572   :  { %3992 = vmatmul.mubr.msk.f32.vlgmr.msra.gmra.mrb[82].mxu1 %vm3458_vm5, %v3491_v19 }
0x1645   :  { %v3561_v37 = vpop.f32.mrb[82].mxu1 }
0x1646   :  { %v3993_v14 = vpop.f32.mrb[83].mxu1  ;;  %v3566_v59 = vsel %vm3565_vm6, %v3561_v37, 0.0 }
0x1647   :  { %3567 = vadd.xlane.f32.xlu1 %v3566_v59 }
0x16d4   :  { %v3568_v9 = vpop.xlane.xlu1 %3567 }
0x16d5   :  { %v3570_v44 = vmul.f32 0.0078125, %v3568_v9 }
0x16d7   :  { %v3571_v16 = vsub.f32 %v3561_v37, %v3570_v44 }
0x16d9   :  { %v3572_v13 = vmul.f32 %v3571_v16, %v3571_v16 }
0x16db   :  { %v3573_v58 = vsel %vm3565_vm6, %v3572_v13, 0.0 }
0x16dc   :  { %3574 = vadd.xlane.f32.xlu1 %v3573_v58 }
0x1769   :  { %v3575_v0 = vpop.xlane.xlu1 %3574 }
0x176a   :  { %v3576_v3 = vmul.f32 0.0078125, %v3575_v0 }
0x176c   :  { %v3577_v6 = vadd.f32 1e-05, %v3576_v3 }
0x176e   :  { %4546 = vrsqrt.f32 %v3577_v6 }
0x1778   :  { %v4547_v24 = vpop.eup %4546 }
0x1779   :  { %v3579_v20 = vmul.f32 %v4547_v24, %v3571_v16 }
0x177b   :  { %v3587_v25 = vmul.f32 %v3895_v45, %v3579_v20 }
0x177d   :  { %v3595_v4 = vadd.f32 %v3896_v18, %v3587_v25 }
0x177f   :  { %4027 = vmatmul.mubr.f32.vlgmr.msra.gmra.mrb[76].mxu0 %v3595_v4 }
0x1852   :  { %v3685_v23 = vpop.f32.mrb[76].mxu0 }
0x1853   :  { %v3686_v27 = vadd.f32 %v3897_v7, %v3685_v23  ;;  %v4028_v28 = vpop.f32.mrb[77].mxu0 }
0x1855   :  { %3690 = vst.msk [vmem:[%s6065_s15] sm:$0x3] %vm3689_vm7, %v3686_v27 }
0x1856   :  { %3695 = vsyncpa [#allocation6], 1 }
0x1857   :  { %3696 = vsyncpa [#allocation8], 1 }
0x1858   :  { %3697 = vsyncpa [#allocation11], 1 }

</bundles_post_ra>
